<compile_context>
chip_gen: v6e
topology: v6e:2x2x1
jax: 0.10.0
libtpu: 0.0.40
codegen_flags: <defaults>
</compile_context>

<pallas_src>
import functools

import jax
import jax.numpy as jnp
from jax.experimental import pallas as pl
from jax.experimental.pallas import tpu as pltpu


# ----------------------------------------------------------------------------
# Pallas kernel 1: 3x3 conv (9 accumulating bf16 matmuls over a flattened,
# padded image) fused with BatchNorm(eval) affine + ReLU.
# ----------------------------------------------------------------------------
def _conv3x3_bn_relu_kernel(x_ref, w_ref, scale_ref, shift_ref, o_ref, *, wp, l_out):
    # x_ref : ((H+3)*(W+2), Cin)   bf16, flattened zero-padded image (one batch element)
    # w_ref : (9, Cin, Cout)       bf16, tap-major conv weights (resident across batch)
    # scale/shift : (1, Cout)      f32, folded BN affine
    # o_ref : (H*(W+2), Cout)      bf16 (junk padded-width columns dropped in wrapper)
    cout = o_ref.shape[-1]
    acc = jnp.zeros((l_out, cout), jnp.float32)
    for di in range(3):
        for dj in range(3):
            off = di * wp + dj                       # static element offset of this tap
            patch = x_ref[pl.ds(off, l_out), :]      # (l_out, Cin) bf16
            acc = acc + jnp.dot(patch, w_ref[di * 3 + dj],
                                preferred_element_type=jnp.float32)
    y = acc * scale_ref[...] + shift_ref[...]        # f32 epilogue (v5e-safe, no bf16 VPU)
    o_ref[...] = jnp.maximum(y, 0.0).astype(o_ref.dtype)


def conv_block(x, wf, scale, shift, pool):
    """x: (B, H, W, Cin) bf16 NHWC; wf: (9, Cin, Cout) bf16; scale/shift: (1, Cout) f32."""
    B, H, W, Cin = x.shape
    Cout = wf.shape[-1]
    Wp = W + 2
    n_flat = (H + 3) * Wp          # 1 top pad row, 2 bottom pad rows (keeps tap reads in-bounds)
    l_out = H * Wp
    xp = jnp.pad(x, ((0, 0), (1, 2), (1, 1), (0, 0))).reshape(B, n_flat, Cin)

    y = pl.pallas_call(
        functools.partial(_conv3x3_bn_relu_kernel, wp=Wp, l_out=l_out),
        grid=(B,),
        in_specs=[
            pl.BlockSpec((None, n_flat, Cin), lambda b: (b, 0, 0)),
            pl.BlockSpec((9, Cin, Cout), lambda b: (0, 0, 0)),   # weights stay resident
            pl.BlockSpec((1, Cout), lambda b: (0, 0)),
            pl.BlockSpec((1, Cout), lambda b: (0, 0)),
        ],
        out_specs=pl.BlockSpec((None, l_out, Cout), lambda b: (b, 0, 0)),
        out_shape=jax.ShapeDtypeStruct((B, l_out, Cout), jnp.bfloat16),
        compiler_params=pltpu.CompilerParams(
            dimension_semantics=("parallel",),
            vmem_limit_bytes=32 * 1024 * 1024,
        ),
    )(xp, wf, scale, shift)

    y = y.reshape(B, H, Wp, Cout)[:, :, :W, :]       # drop padded-width junk columns
    if pool:                                         # 2x2 max-pool, stride 2 (cheap XLA reduce)
        y = y.reshape(B, H // 2, 2, W // 2, 2, Cout).max(axis=(2, 4))
    return y


# ----------------------------------------------------------------------------
# Pallas kernel 2: cross-relation metric (per class, per query-local-tile)
#   sim = normalized_support @ normalized_query^T   -> (M, TQ), f32 on MXU
#   local score = sum of top-k neighbors per query local (lane-dense output)
# ----------------------------------------------------------------------------
def _cross_relation_kernel(s_ref, q_ref, local_ref, *, neighbor_k):
    # s_ref : (M, C)  bf16, L2-normalized support locals of this class
    # q_ref : (TQ, C) bf16, L2-normalized query locals (tile; zero rows = padding)
    # local_ref : (1, TQ) f32
    sim = jax.lax.dot_general(
        s_ref[...], q_ref[...], (((1,), (1,)), ((), ())),
        preferred_element_type=jnp.float32)          # (M, TQ) cosine similarities, f32
    acc = jnp.zeros((1, sim.shape[1]), jnp.float32)
    for i in range(neighbor_k):                      # iterative top-k (f32 sentinel)
        cur = jnp.max(sim, axis=0, keepdims=True)    # (1, TQ)
        acc = acc + cur
        if i + 1 < neighbor_k:                       # last mask pass is pure waste: skip it
            sim = jnp.where(sim >= cur, -jnp.inf, sim)
    local_ref[...] = acc


def _query_tiling(nq):
    """Pick a bounded, lane-aligned query tile so sim=(M, TQ) never blows VMEM."""
    if nq < 128:
        return nq, nq                                # single full-width tile, no padding
    nq_p = ((nq + 127) // 128) * 128                 # pad rows to a lane multiple
    for t in (512, 256, 128):
        if nq_p % t == 0:
            return t, nq_p
    return 128, nq_p                                 # unreachable (nq_p % 128 == 0)


def cross_relation(qn, sn, bq, hwq, neighbor_k=3):
    """qn: (Bq*HWq, C) bf16 normalized; sn: (n_way, M, C) bf16 normalized.

    Returns local scores (Bq, n_way, HWq) f32."""
    nq, c = qn.shape
    n_way, m, _ = sn.shape
    tq, nq_p = _query_tiling(nq)
    if nq_p != nq:                                   # zero-padded query locals score 0
        qn = jnp.pad(qn, ((0, nq_p - nq), (0, 0)))

    local = pl.pallas_call(
        functools.partial(_cross_relation_kernel, neighbor_k=neighbor_k),
        grid=(n_way, nq_p // tq),
        in_specs=[
            pl.BlockSpec((None, m, c), lambda cls, t: (cls, 0, 0)),  # support: resident per class
            pl.BlockSpec((tq, c), lambda cls, t: (t, 0)),            # query tile (streamed)
        ],
        out_specs=pl.BlockSpec((None, 1, tq), lambda cls, t: (cls, 0, t)),
        out_shape=jax.ShapeDtypeStruct((n_way, 1, nq_p), jnp.float32),
        compiler_params=pltpu.CompilerParams(
            dimension_semantics=("parallel", "parallel"),
            vmem_limit_bytes=32 * 1024 * 1024,
        ),
    )(sn, qn)

    local = local[:, :, :nq]                         # drop padded query columns
    # (n_way, 1, Bq*HWq) -> (Bq, n_way, HWq)
    return jnp.transpose(local.reshape(n_way, bq, hwq), (1, 0, 2))


# ----------------------------------------------------------------------------
# Conv64F encoder glue + parameter handling
# ----------------------------------------------------------------------------
def _l2norm(x, eps=1e-12):
    # TODO(synk): torch F.normalize clamps the norm; rsqrt(sum+eps) differs for ~zero vectors.
    xf = x.astype(jnp.float32)
    return xf * jax.lax.rsqrt(jnp.sum(xf * xf, axis=-1, keepdims=True) + eps)


def fold_conv_params(params, eps=1e-5):
    """Fold eval-mode BN into per-channel scale/shift; cast weights to bf16 tap-major."""
    folded = []
    for (w, gamma, beta, mean, var) in params:
        cin, cout = w.shape[2], w.shape[3]
        inv_std = jax.lax.rsqrt(var + eps)
        scale = (gamma * inv_std).reshape(1, cout).astype(jnp.float32)
        shift = (beta - mean * gamma * inv_std).reshape(1, cout).astype(jnp.float32)
        wf = w.reshape(9, cin, cout).astype(jnp.bfloat16)
        folded.append((wf, scale, shift))
    return folded


def cnn_encoder(x_nchw, folded_params):
    x = jnp.transpose(x_nchw, (0, 2, 3, 1)).astype(jnp.bfloat16)  # NCHW -> NHWC bf16
    for idx, (wf, scale, shift) in enumerate(folded_params):
        x = conv_block(x, wf, scale, shift, pool=(idx < 2))
    return x  # (B, H/4, W/4, 64) bf16 NHWC


def init_params(key):
    """Deterministic init mimicking init_weights(init_type='normal'): conv ~ N(0, 0.02)."""
    chans = [(3, 64), (64, 64), (64, 64), (64, 64)]
    params = []
    for i, (cin, cout) in enumerate(chans):
        k = jax.random.fold_in(key, i)
        w = 0.02 * jax.random.normal(k, (3, 3, cin, cout), jnp.float32)
        gamma = jnp.ones((cout,), jnp.float32)
        beta = jnp.zeros((cout,), jnp.float32)
        mean = jnp.zeros((cout,), jnp.float32)
        var = jnp.ones((cout,), jnp.float32)
        params.append((w, gamma, beta, mean, var))
    return params


# ----------------------------------------------------------------------------
# CrossRelationNet.forward
# ----------------------------------------------------------------------------
def cross_relation_net(query_data, support_data, params, neighbor_k=3):
    folded = fold_conv_params(params)

    # One encoder pass for the query batch, one for ALL stacked support sets.
    query_feature = cnn_encoder(query_data, folded)               # (Bq, h, w, C) bf16
    n_way = len(support_data)
    shot = support_data[0].shape[0]
    # TODO(synk): assumes equal shot count per class so supports stack into one batch.
    support_stack = jnp.concatenate(support_data, axis=0)
    support_feature = cnn_encoder(support_stack, folded)          # (n_way*shot, h, w, C)

    bq, h, w, c = query_feature.shape
    hwq = h * w
    m_per_class = shot * hwq

    # Hoisted L2 normalization (done once, f32 math), bf16 MXU operands.
    qn = _l2norm(query_feature.reshape(bq * hwq, c)).astype(jnp.bfloat16)
    sn = _l2norm(support_feature.reshape(n_way, m_per_class, c)).astype(jnp.bfloat16)

    local_scores = cross_relation(qn, sn, bq, hwq, neighbor_k)    # (Bq, n_way, HWq) f32
    scores = jnp.sum(local_scores, axis=-1)                       # (Bq, n_way)

    qf_nchw = jnp.transpose(query_feature, (0, 3, 1, 2)).astype(jnp.float32)  # torch NCHW
    return qf_nchw, scores, local_scores


if __name__ == "__main__":
    key = jax.random.PRNGKey(0)
    params = init_params(jax.random.fold_in(key, 100))

    # small deterministic inputs: query (2,3,16,16); 2-way support, 1 shot each (1,3,16,16)
    query = jax.random.normal(jax.random.fold_in(key, 0), (2, 3, 16, 16), jnp.float32)
    support_data = [
        jax.random.normal(jax.random.fold_in(key, 1), (1, 3, 16, 16), jnp.float32),
        jax.random.normal(jax.random.fold_in(key, 2), (1, 3, 16, 16), jnp.float32),
    ]

    forward = jax.jit(cross_relation_net)
    qf, scores, local_scores = forward(query, support_data, params)
    jax.block_until_ready((qf, scores, local_scores))

    assert qf.shape == (2, 64, 4, 4)
    assert scores.shape == (2, 2)
    assert local_scores.shape == (2, 2, 16)
    print("KERNEL_OK")
</pallas_src>

<mosaic_0001>
module attributes {stable_mosaic.version = 11 : i64} {
  func.func @_conv3x3_bn_relu_kernel(%arg0: i32, %arg1: memref<1x342x3xbf16, #tpu.memory_space<vmem>>, %arg2: memref<9x3x64xbf16, #tpu.memory_space<vmem>>, %arg3: memref<1x64xf32, #tpu.memory_space<vmem>>, %arg4: memref<1x64xf32, #tpu.memory_space<vmem>>, %arg5: memref<1x288x64xbf16, #tpu.memory_space<vmem>>) attributes {dimension_semantics = [#tpu.dimension_semantics<parallel>], iteration_bounds = array<i64: 2>, scalar_prefetch = 0 : i64, scratch_operands = 0 : i64, tpu.core_type = #tpu.core_type<tc>, window_params = [{transform_indices = @transform_0, window_bounds = array<i64: 1, 342, 3>}, {pipeline_mode = #tpu.pipeline_mode<synchronous>, transform_indices = @transform_1, window_bounds = array<i64: 9, 3, 64>}, {pipeline_mode = #tpu.pipeline_mode<synchronous>, transform_indices = @transform_2, window_bounds = array<i64: 1, 64>}, {pipeline_mode = #tpu.pipeline_mode<synchronous>, transform_indices = @transform_3, window_bounds = array<i64: 1, 64>}, {transform_indices = @transform_4, window_bounds = array<i64: 1, 288, 64>}]} {
    %cst = arith.constant 0.000000e+00 : f32
    %0 = vector.broadcast %cst : f32 to vector<288x64xf32>
    %c0 = arith.constant 0 : index
    %c0_0 = arith.constant 0 : index
    %c0_1 = arith.constant 0 : index
    %1 = vector.load %arg1[%c0, %c0_0, %c0_1] : memref<1x342x3xbf16, #tpu.memory_space<vmem>>, vector<1x288x3xbf16>
    %2 = vector.shape_cast %1 : vector<1x288x3xbf16> to vector<288x3xbf16>
    %c0_2 = arith.constant 0 : index
    %c0_3 = arith.constant 0 : index
    %c0_4 = arith.constant 0 : index
    %3 = vector.load %arg2[%c0_2, %c0_3, %c0_4] : memref<9x3x64xbf16, #tpu.memory_space<vmem>>, vector<1x3x64xbf16>
    %4 = vector.shape_cast %3 : vector<1x3x64xbf16> to vector<3x64xbf16>
    %cst_5 = arith.constant dense<0.000000e+00> : vector<288x64xf32>
    %5 = tpu.matmul %2, %4, %cst_5 {dimension_numbers = #tpu.dot_dimension_numbers<[1], [0], [0], [1], [0, 0, 1, 1], [], []>} : vector<288x3xbf16>, vector<3x64xbf16>, vector<288x64xf32> -> vector<288x64xf32>
    %6 = arith.addf %0, %5 : vector<288x64xf32>
    %c0_6 = arith.constant 0 : index
    %c1 = arith.constant 1 : index
    %c0_7 = arith.constant 0 : index
    %7 = vector.load %arg1[%c0_6, %c1, %c0_7] : memref<1x342x3xbf16, #tpu.memory_space<vmem>>, vector<1x288x3xbf16>
    %8 = vector.shape_cast %7 : vector<1x288x3xbf16> to vector<288x3xbf16>
    %c1_8 = arith.constant 1 : index
    %c0_9 = arith.constant 0 : index
    %c0_10 = arith.constant 0 : index
    %9 = vector.load %arg2[%c1_8, %c0_9, %c0_10] : memref<9x3x64xbf16, #tpu.memory_space<vmem>>, vector<1x3x64xbf16>
    %10 = vector.shape_cast %9 : vector<1x3x64xbf16> to vector<3x64xbf16>
    %cst_11 = arith.constant dense<0.000000e+00> : vector<288x64xf32>
    %11 = tpu.matmul %8, %10, %cst_11 {dimension_numbers = #tpu.dot_dimension_numbers<[1], [0], [0], [1], [0, 0, 1, 1], [], []>} : vector<288x3xbf16>, vector<3x64xbf16>, vector<288x64xf32> -> vector<288x64xf32>
    %12 = arith.addf %6, %11 : vector<288x64xf32>
    %c0_12 = arith.constant 0 : index
    %c2 = arith.constant 2 : index
    %c0_13 = arith.constant 0 : index
    %13 = vector.load %arg1[%c0_12, %c2, %c0_13] : memref<1x342x3xbf16, #tpu.memory_space<vmem>>, vector<1x288x3xbf16>
    %14 = vector.shape_cast %13 : vector<1x288x3xbf16> to vector<288x3xbf16>
    %c2_14 = arith.constant 2 : index
    %c0_15 = arith.constant 0 : index
    %c0_16 = arith.constant 0 : index
    %15 = vector.load %arg2[%c2_14, %c0_15, %c0_16] : memref<9x3x64xbf16, #tpu.memory_space<vmem>>, vector<1x3x64xbf16>
    %16 = vector.shape_cast %15 : vector<1x3x64xbf16> to vector<3x64xbf16>
    %cst_17 = arith.constant dense<0.000000e+00> : vector<288x64xf32>
    %17 = tpu.matmul %14, %16, %cst_17 {dimension_numbers = #tpu.dot_dimension_numbers<[1], [0], [0], [1], [0, 0, 1, 1], [], []>} : vector<288x3xbf16>, vector<3x64xbf16>, vector<288x64xf32> -> vector<288x64xf32>
    %18 = arith.addf %12, %17 : vector<288x64xf32>
    %c0_18 = arith.constant 0 : index
    %c18 = arith.constant 18 : index
    %c0_19 = arith.constant 0 : index
    %19 = vector.load %arg1[%c0_18, %c18, %c0_19] : memref<1x342x3xbf16, #tpu.memory_space<vmem>>, vector<1x288x3xbf16>
    %20 = vector.shape_cast %19 : vector<1x288x3xbf16> to vector<288x3xbf16>
    %c3 = arith.constant 3 : index
    %c0_20 = arith.constant 0 : index
    %c0_21 = arith.constant 0 : index
    %21 = vector.load %arg2[%c3, %c0_20, %c0_21] : memref<9x3x64xbf16, #tpu.memory_space<vmem>>, vector<1x3x64xbf16>
    %22 = vector.shape_cast %21 : vector<1x3x64xbf16> to vector<3x64xbf16>
    %cst_22 = arith.constant dense<0.000000e+00> : vector<288x64xf32>
    %23 = tpu.matmul %20, %22, %cst_22 {dimension_numbers = #tpu.dot_dimension_numbers<[1], [0], [0], [1], [0, 0, 1, 1], [], []>} : vector<288x3xbf16>, vector<3x64xbf16>, vector<288x64xf32> -> vector<288x64xf32>
    %24 = arith.addf %18, %23 : vector<288x64xf32>
    %c0_23 = arith.constant 0 : index
    %c19 = arith.constant 19 : index
    %c0_24 = arith.constant 0 : index
    %25 = vector.load %arg1[%c0_23, %c19, %c0_24] : memref<1x342x3xbf16, #tpu.memory_space<vmem>>, vector<1x288x3xbf16>
    %26 = vector.shape_cast %25 : vector<1x288x3xbf16> to vector<288x3xbf16>
    %c4 = arith.constant 4 : index
    %c0_25 = arith.constant 0 : index
    %c0_26 = arith.constant 0 : index
    %27 = vector.load %arg2[%c4, %c0_25, %c0_26] : memref<9x3x64xbf16, #tpu.memory_space<vmem>>, vector<1x3x64xbf16>
    %28 = vector.shape_cast %27 : vector<1x3x64xbf16> to vector<3x64xbf16>
    %cst_27 = arith.constant dense<0.000000e+00> : vector<288x64xf32>
    %29 = tpu.matmul %26, %28, %cst_27 {dimension_numbers = #tpu.dot_dimension_numbers<[1], [0], [0], [1], [0, 0, 1, 1], [], []>} : vector<288x3xbf16>, vector<3x64xbf16>, vector<288x64xf32> -> vector<288x64xf32>
    %30 = arith.addf %24, %29 : vector<288x64xf32>
    %c0_28 = arith.constant 0 : index
    %c20 = arith.constant 20 : index
    %c0_29 = arith.constant 0 : index
    %31 = vector.load %arg1[%c0_28, %c20, %c0_29] : memref<1x342x3xbf16, #tpu.memory_space<vmem>>, vector<1x288x3xbf16>
    %32 = vector.shape_cast %31 : vector<1x288x3xbf16> to vector<288x3xbf16>
    %c5 = arith.constant 5 : index
    %c0_30 = arith.constant 0 : index
    %c0_31 = arith.constant 0 : index
    %33 = vector.load %arg2[%c5, %c0_30, %c0_31] : memref<9x3x64xbf16, #tpu.memory_space<vmem>>, vector<1x3x64xbf16>
    %34 = vector.shape_cast %33 : vector<1x3x64xbf16> to vector<3x64xbf16>
    %cst_32 = arith.constant dense<0.000000e+00> : vector<288x64xf32>
    %35 = tpu.matmul %32, %34, %cst_32 {dimension_numbers = #tpu.dot_dimension_numbers<[1], [0], [0], [1], [0, 0, 1, 1], [], []>} : vector<288x3xbf16>, vector<3x64xbf16>, vector<288x64xf32> -> vector<288x64xf32>
    %36 = arith.addf %30, %35 : vector<288x64xf32>
    %c0_33 = arith.constant 0 : index
    %c36 = arith.constant 36 : index
    %c0_34 = arith.constant 0 : index
    %37 = vector.load %arg1[%c0_33, %c36, %c0_34] : memref<1x342x3xbf16, #tpu.memory_space<vmem>>, vector<1x288x3xbf16>
    %38 = vector.shape_cast %37 : vector<1x288x3xbf16> to vector<288x3xbf16>
    %c6 = arith.constant 6 : index
    %c0_35 = arith.constant 0 : index
    %c0_36 = arith.constant 0 : index
    %39 = vector.load %arg2[%c6, %c0_35, %c0_36] : memref<9x3x64xbf16, #tpu.memory_space<vmem>>, vector<1x3x64xbf16>
    %40 = vector.shape_cast %39 : vector<1x3x64xbf16> to vector<3x64xbf16>
    %cst_37 = arith.constant dense<0.000000e+00> : vector<288x64xf32>
    %41 = tpu.matmul %38, %40, %cst_37 {dimension_numbers = #tpu.dot_dimension_numbers<[1], [0], [0], [1], [0, 0, 1, 1], [], []>} : vector<288x3xbf16>, vector<3x64xbf16>, vector<288x64xf32> -> vector<288x64xf32>
    %42 = arith.addf %36, %41 : vector<288x64xf32>
    %c0_38 = arith.constant 0 : index
    %c37 = arith.constant 37 : index
    %c0_39 = arith.constant 0 : index
    %43 = vector.load %arg1[%c0_38, %c37, %c0_39] : memref<1x342x3xbf16, #tpu.memory_space<vmem>>, vector<1x288x3xbf16>
    %44 = vector.shape_cast %43 : vector<1x288x3xbf16> to vector<288x3xbf16>
    %c7 = arith.constant 7 : index
    %c0_40 = arith.constant 0 : index
    %c0_41 = arith.constant 0 : index
    %45 = vector.load %arg2[%c7, %c0_40, %c0_41] : memref<9x3x64xbf16, #tpu.memory_space<vmem>>, vector<1x3x64xbf16>
    %46 = vector.shape_cast %45 : vector<1x3x64xbf16> to vector<3x64xbf16>
    %cst_42 = arith.constant dense<0.000000e+00> : vector<288x64xf32>
    %47 = tpu.matmul %44, %46, %cst_42 {dimension_numbers = #tpu.dot_dimension_numbers<[1], [0], [0], [1], [0, 0, 1, 1], [], []>} : vector<288x3xbf16>, vector<3x64xbf16>, vector<288x64xf32> -> vector<288x64xf32>
    %48 = arith.addf %42, %47 : vector<288x64xf32>
    %c0_43 = arith.constant 0 : index
    %c38 = arith.constant 38 : index
    %c0_44 = arith.constant 0 : index
    %49 = vector.load %arg1[%c0_43, %c38, %c0_44] : memref<1x342x3xbf16, #tpu.memory_space<vmem>>, vector<1x288x3xbf16>
    %50 = vector.shape_cast %49 : vector<1x288x3xbf16> to vector<288x3xbf16>
    %c8 = arith.constant 8 : index
    %c0_45 = arith.constant 0 : index
    %c0_46 = arith.constant 0 : index
    %51 = vector.load %arg2[%c8, %c0_45, %c0_46] : memref<9x3x64xbf16, #tpu.memory_space<vmem>>, vector<1x3x64xbf16>
    %52 = vector.shape_cast %51 : vector<1x3x64xbf16> to vector<3x64xbf16>
    %cst_47 = arith.constant dense<0.000000e+00> : vector<288x64xf32>
    %53 = tpu.matmul %50, %52, %cst_47 {dimension_numbers = #tpu.dot_dimension_numbers<[1], [0], [0], [1], [0, 0, 1, 1], [], []>} : vector<288x3xbf16>, vector<3x64xbf16>, vector<288x64xf32> -> vector<288x64xf32>
    %54 = arith.addf %48, %53 : vector<288x64xf32>
    %c0_48 = arith.constant 0 : index
    %c0_49 = arith.constant 0 : index
    %55 = vector.load %arg3[%c0_48, %c0_49] : memref<1x64xf32, #tpu.memory_space<vmem>>, vector<1x64xf32>
    %56 = vector.broadcast %55 : vector<1x64xf32> to vector<288x64xf32>
    %57 = arith.mulf %54, %56 : vector<288x64xf32>
    %c0_50 = arith.constant 0 : index
    %c0_51 = arith.constant 0 : index
    %58 = vector.load %arg4[%c0_50, %c0_51] : memref<1x64xf32, #tpu.memory_space<vmem>>, vector<1x64xf32>
    %59 = vector.broadcast %58 : vector<1x64xf32> to vector<288x64xf32>
    %60 = arith.addf %57, %59 : vector<288x64xf32>
    %cst_52 = arith.constant 0.000000e+00 : f32
    %61 = vector.broadcast %cst_52 : f32 to vector<288x64xf32>
    %62 = arith.maximumf %60, %61 : vector<288x64xf32>
    %63 = arith.truncf %62 : vector<288x64xf32> to vector<288x64xbf16>
    %c0_53 = arith.constant 0 : index
    %c0_54 = arith.constant 0 : index
    %c0_55 = arith.constant 0 : index
    %64 = vector.load %arg5[%c0_53, %c0_54, %c0_55] : memref<1x288x64xbf16, #tpu.memory_space<vmem>>, vector<1x288x64xbf16>
    %65 = vector.shape_cast %64 : vector<1x288x64xbf16> to vector<288x64xbf16>
    %66 = vector.shape_cast %63 : vector<288x64xbf16> to vector<1x288x64xbf16>
    tpu.vector_store %arg5[%c0_53, %c0_54, %c0_55], %66 {strides = array<i32>} : memref<1x288x64xbf16, #tpu.memory_space<vmem>>, vector<1x288x64xbf16>,
    return
  }
  func.func @transform_0(%arg0: i32) -> (i32, i32, i32) {
    %c0_i32 = arith.constant 0 : i32
    %c0_i32_0 = arith.constant 0 : i32
    %c0_i32_1 = arith.constant 0 : i32
    return %arg0, %c0_i32, %c0_i32_0 : i32, i32, i32
  }
  func.func @transform_1(%arg0: i32) -> (i32, i32, i32) {
    %c0_i32 = arith.constant 0 : i32
    %c0_i32_0 = arith.constant 0 : i32
    %c0_i32_1 = arith.constant 0 : i32
    %c0_i32_2 = arith.constant 0 : i32
    return %c0_i32, %c0_i32_0, %c0_i32_1 : i32, i32, i32
  }
  func.func @transform_2(%arg0: i32) -> (i32, i32) {
    %c0_i32 = arith.constant 0 : i32
    %c0_i32_0 = arith.constant 0 : i32
    %c0_i32_1 = arith.constant 0 : i32
    return %c0_i32, %c0_i32_0 : i32, i32
  }
  func.func @transform_3(%arg0: i32) -> (i32, i32) {
    %c0_i32 = arith.constant 0 : i32
    %c0_i32_0 = arith.constant 0 : i32
    %c0_i32_1 = arith.constant 0 : i32
    return %c0_i32, %c0_i32_0 : i32, i32
  }
  func.func @transform_4(%arg0: i32) -> (i32, i32, i32) {
    %c0_i32 = arith.constant 0 : i32
    %c0_i32_0 = arith.constant 0 : i32
    %c0_i32_1 = arith.constant 0 : i32
    return %arg0, %c0_i32, %c0_i32_0 : i32, i32, i32
  }
}

module attributes {stable_mosaic.version = 11 : i64} {
  func.func @_conv3x3_bn_relu_kernel(%arg0: i32, %arg1: memref<1x110x64xbf16, #tpu.memory_space<vmem>>, %arg2: memref<9x64x64xbf16, #tpu.memory_space<vmem>>, %arg3: memref<1x64xf32, #tpu.memory_space<vmem>>, %arg4: memref<1x64xf32, #tpu.memory_space<vmem>>, %arg5: memref<1x80x64xbf16, #tpu.memory_space<vmem>>) attributes {dimension_semantics = [#tpu.dimension_semantics<parallel>], iteration_bounds = array<i64: 2>, scalar_prefetch = 0 : i64, scratch_operands = 0 : i64, tpu.core_type = #tpu.core_type<tc>, window_params = [{transform_indices = @transform_0, window_bounds = array<i64: 1, 110, 64>}, {pipeline_mode = #tpu.pipeline_mode<synchronous>, transform_indices = @transform_1, window_bounds = array<i64: 9, 64, 64>}, {pipeline_mode = #tpu.pipeline_mode<synchronous>, transform_indices = @transform_2, window_bounds = array<i64: 1, 64>}, {pipeline_mode = #tpu.pipeline_mode<synchronous>, transform_indices = @transform_3, window_bounds = array<i64: 1, 64>}, {transform_indices = @transform_4, window_bounds = array<i64: 1, 80, 64>}]} {
    %cst = arith.constant 0.000000e+00 : f32
    %0 = vector.broadcast %cst : f32 to vector<80x64xf32>
    %c0 = arith.constant 0 : index
    %c0_0 = arith.constant 0 : index
    %c0_1 = arith.constant 0 : index
    %1 = vector.load %arg1[%c0, %c0_0, %c0_1] : memref<1x110x64xbf16, #tpu.memory_space<vmem>>, vector<1x80x64xbf16>
    %2 = vector.shape_cast %1 : vector<1x80x64xbf16> to vector<80x64xbf16>
    %c0_2 = arith.constant 0 : index
    %c0_3 = arith.constant 0 : index
    %c0_4 = arith.constant 0 : index
    %3 = vector.load %arg2[%c0_2, %c0_3, %c0_4] : memref<9x64x64xbf16, #tpu.memory_space<vmem>>, vector<1x64x64xbf16>
    %4 = vector.shape_cast %3 : vector<1x64x64xbf16> to vector<64x64xbf16>
    %cst_5 = arith.constant dense<0.000000e+00> : vector<80x64xf32>
    %5 = tpu.matmul %2, %4, %cst_5 {dimension_numbers = #tpu.dot_dimension_numbers<[1], [0], [0], [1], [0, 0, 1, 1], [], []>} : vector<80x64xbf16>, vector<64x64xbf16>, vector<80x64xf32> -> vector<80x64xf32>
    %6 = arith.addf %0, %5 : vector<80x64xf32>
    %c0_6 = arith.constant 0 : index
    %c1 = arith.constant 1 : index
    %c0_7 = arith.constant 0 : index
    %7 = vector.load %arg1[%c0_6, %c1, %c0_7] : memref<1x110x64xbf16, #tpu.memory_space<vmem>>, vector<1x80x64xbf16>
    %8 = vector.shape_cast %7 : vector<1x80x64xbf16> to vector<80x64xbf16>
    %c1_8 = arith.constant 1 : index
    %c0_9 = arith.constant 0 : index
    %c0_10 = arith.constant 0 : index
    %9 = vector.load %arg2[%c1_8, %c0_9, %c0_10] : memref<9x64x64xbf16, #tpu.memory_space<vmem>>, vector<1x64x64xbf16>
    %10 = vector.shape_cast %9 : vector<1x64x64xbf16> to vector<64x64xbf16>
    %cst_11 = arith.constant dense<0.000000e+00> : vector<80x64xf32>
    %11 = tpu.matmul %8, %10, %cst_11 {dimension_numbers = #tpu.dot_dimension_numbers<[1], [0], [0], [1], [0, 0, 1, 1], [], []>} : vector<80x64xbf16>, vector<64x64xbf16>, vector<80x64xf32> -> vector<80x64xf32>
    %12 = arith.addf %6, %11 : vector<80x64xf32>
    %c0_12 = arith.constant 0 : index
    %c2 = arith.constant 2 : index
    %c0_13 = arith.constant 0 : index
    %13 = vector.load %arg1[%c0_12, %c2, %c0_13] : memref<1x110x64xbf16, #tpu.memory_space<vmem>>, vector<1x80x64xbf16>
    %14 = vector.shape_cast %13 : vector<1x80x64xbf16> to vector<80x64xbf16>
    %c2_14 = arith.constant 2 : index
    %c0_15 = arith.constant 0 : index
    %c0_16 = arith.constant 0 : index
    %15 = vector.load %arg2[%c2_14, %c0_15, %c0_16] : memref<9x64x64xbf16, #tpu.memory_space<vmem>>, vector<1x64x64xbf16>
    %16 = vector.shape_cast %15 : vector<1x64x64xbf16> to vector<64x64xbf16>
    %cst_17 = arith.constant dense<0.000000e+00> : vector<80x64xf32>
    %17 = tpu.matmul %14, %16, %cst_17 {dimension_numbers = #tpu.dot_dimension_numbers<[1], [0], [0], [1], [0, 0, 1, 1], [], []>} : vector<80x64xbf16>, vector<64x64xbf16>, vector<80x64xf32> -> vector<80x64xf32>
    %18 = arith.addf %12, %17 : vector<80x64xf32>
    %c0_18 = arith.constant 0 : index
    %c10 = arith.constant 10 : index
    %c0_19 = arith.constant 0 : index
    %19 = vector.load %arg1[%c0_18, %c10, %c0_19] : memref<1x110x64xbf16, #tpu.memory_space<vmem>>, vector<1x80x64xbf16>
    %20 = vector.shape_cast %19 : vector<1x80x64xbf16> to vector<80x64xbf16>
    %c3 = arith.constant 3 : index
    %c0_20 = arith.constant 0 : index
    %c0_21 = arith.constant 0 : index
    %21 = vector.load %arg2[%c3, %c0_20, %c0_21] : memref<9x64x64xbf16, #tpu.memory_space<vmem>>, vector<1x64x64xbf16>
    %22 = vector.shape_cast %21 : vector<1x64x64xbf16> to vector<64x64xbf16>
    %cst_22 = arith.constant dense<0.000000e+00> : vector<80x64xf32>
    %23 = tpu.matmul %20, %22, %cst_22 {dimension_numbers = #tpu.dot_dimension_numbers<[1], [0], [0], [1], [0, 0, 1, 1], [], []>} : vector<80x64xbf16>, vector<64x64xbf16>, vector<80x64xf32> -> vector<80x64xf32>
    %24 = arith.addf %18, %23 : vector<80x64xf32>
    %c0_23 = arith.constant 0 : index
    %c11 = arith.constant 11 : index
    %c0_24 = arith.constant 0 : index
    %25 = vector.load %arg1[%c0_23, %c11, %c0_24] : memref<1x110x64xbf16, #tpu.memory_space<vmem>>, vector<1x80x64xbf16>
    %26 = vector.shape_cast %25 : vector<1x80x64xbf16> to vector<80x64xbf16>
    %c4 = arith.constant 4 : index
    %c0_25 = arith.constant 0 : index
    %c0_26 = arith.constant 0 : index
    %27 = vector.load %arg2[%c4, %c0_25, %c0_26] : memref<9x64x64xbf16, #tpu.memory_space<vmem>>, vector<1x64x64xbf16>
    %28 = vector.shape_cast %27 : vector<1x64x64xbf16> to vector<64x64xbf16>
    %cst_27 = arith.constant dense<0.000000e+00> : vector<80x64xf32>
    %29 = tpu.matmul %26, %28, %cst_27 {dimension_numbers = #tpu.dot_dimension_numbers<[1], [0], [0], [1], [0, 0, 1, 1], [], []>} : vector<80x64xbf16>, vector<64x64xbf16>, vector<80x64xf32> -> vector<80x64xf32>
    %30 = arith.addf %24, %29 : vector<80x64xf32>
    %c0_28 = arith.constant 0 : index
    %c12 = arith.constant 12 : index
    %c0_29 = arith.constant 0 : index
    %31 = vector.load %arg1[%c0_28, %c12, %c0_29] : memref<1x110x64xbf16, #tpu.memory_space<vmem>>, vector<1x80x64xbf16>
    %32 = vector.shape_cast %31 : vector<1x80x64xbf16> to vector<80x64xbf16>
    %c5 = arith.constant 5 : index
    %c0_30 = arith.constant 0 : index
    %c0_31 = arith.constant 0 : index
    %33 = vector.load %arg2[%c5, %c0_30, %c0_31] : memref<9x64x64xbf16, #tpu.memory_space<vmem>>, vector<1x64x64xbf16>
    %34 = vector.shape_cast %33 : vector<1x64x64xbf16> to vector<64x64xbf16>
    %cst_32 = arith.constant dense<0.000000e+00> : vector<80x64xf32>
    %35 = tpu.matmul %32, %34, %cst_32 {dimension_numbers = #tpu.dot_dimension_numbers<[1], [0], [0], [1], [0, 0, 1, 1], [], []>} : vector<80x64xbf16>, vector<64x64xbf16>, vector<80x64xf32> -> vector<80x64xf32>
    %36 = arith.addf %30, %35 : vector<80x64xf32>
    %c0_33 = arith.constant 0 : index
    %c20 = arith.constant 20 : index
    %c0_34 = arith.constant 0 : index
    %37 = vector.load %arg1[%c0_33, %c20, %c0_34] : memref<1x110x64xbf16, #tpu.memory_space<vmem>>, vector<1x80x64xbf16>
    %38 = vector.shape_cast %37 : vector<1x80x64xbf16> to vector<80x64xbf16>
    %c6 = arith.constant 6 : index
    %c0_35 = arith.constant 0 : index
    %c0_36 = arith.constant 0 : index
    %39 = vector.load %arg2[%c6, %c0_35, %c0_36] : memref<9x64x64xbf16, #tpu.memory_space<vmem>>, vector<1x64x64xbf16>
    %40 = vector.shape_cast %39 : vector<1x64x64xbf16> to vector<64x64xbf16>
    %cst_37 = arith.constant dense<0.000000e+00> : vector<80x64xf32>
    %41 = tpu.matmul %38, %40, %cst_37 {dimension_numbers = #tpu.dot_dimension_numbers<[1], [0], [0], [1], [0, 0, 1, 1], [], []>} : vector<80x64xbf16>, vector<64x64xbf16>, vector<80x64xf32> -> vector<80x64xf32>
    %42 = arith.addf %36, %41 : vector<80x64xf32>
    %c0_38 = arith.constant 0 : index
    %c21 = arith.constant 21 : index
    %c0_39 = arith.constant 0 : index
    %43 = vector.load %arg1[%c0_38, %c21, %c0_39] : memref<1x110x64xbf16, #tpu.memory_space<vmem>>, vector<1x80x64xbf16>
    %44 = vector.shape_cast %43 : vector<1x80x64xbf16> to vector<80x64xbf16>
    %c7 = arith.constant 7 : index
    %c0_40 = arith.constant 0 : index
    %c0_41 = arith.constant 0 : index
    %45 = vector.load %arg2[%c7, %c0_40, %c0_41] : memref<9x64x64xbf16, #tpu.memory_space<vmem>>, vector<1x64x64xbf16>
    %46 = vector.shape_cast %45 : vector<1x64x64xbf16> to vector<64x64xbf16>
    %cst_42 = arith.constant dense<0.000000e+00> : vector<80x64xf32>
    %47 = tpu.matmul %44, %46, %cst_42 {dimension_numbers = #tpu.dot_dimension_numbers<[1], [0], [0], [1], [0, 0, 1, 1], [], []>} : vector<80x64xbf16>, vector<64x64xbf16>, vector<80x64xf32> -> vector<80x64xf32>
    %48 = arith.addf %42, %47 : vector<80x64xf32>
    %c0_43 = arith.constant 0 : index
    %c22 = arith.constant 22 : index
    %c0_44 = arith.constant 0 : index
    %49 = vector.load %arg1[%c0_43, %c22, %c0_44] : memref<1x110x64xbf16, #tpu.memory_space<vmem>>, vector<1x80x64xbf16>
    %50 = vector.shape_cast %49 : vector<1x80x64xbf16> to vector<80x64xbf16>
    %c8 = arith.constant 8 : index
    %c0_45 = arith.constant 0 : index
    %c0_46 = arith.constant 0 : index
    %51 = vector.load %arg2[%c8, %c0_45, %c0_46] : memref<9x64x64xbf16, #tpu.memory_space<vmem>>, vector<1x64x64xbf16>
    %52 = vector.shape_cast %51 : vector<1x64x64xbf16> to vector<64x64xbf16>
    %cst_47 = arith.constant dense<0.000000e+00> : vector<80x64xf32>
    %53 = tpu.matmul %50, %52, %cst_47 {dimension_numbers = #tpu.dot_dimension_numbers<[1], [0], [0], [1], [0, 0, 1, 1], [], []>} : vector<80x64xbf16>, vector<64x64xbf16>, vector<80x64xf32> -> vector<80x64xf32>
    %54 = arith.addf %48, %53 : vector<80x64xf32>
    %c0_48 = arith.constant 0 : index
    %c0_49 = arith.constant 0 : index
    %55 = vector.load %arg3[%c0_48, %c0_49] : memref<1x64xf32, #tpu.memory_space<vmem>>, vector<1x64xf32>
    %56 = vector.broadcast %55 : vector<1x64xf32> to vector<80x64xf32>
    %57 = arith.mulf %54, %56 : vector<80x64xf32>
    %c0_50 = arith.constant 0 : index
    %c0_51 = arith.constant 0 : index
    %58 = vector.load %arg4[%c0_50, %c0_51] : memref<1x64xf32, #tpu.memory_space<vmem>>, vector<1x64xf32>
    %59 = vector.broadcast %58 : vector<1x64xf32> to vector<80x64xf32>
    %60 = arith.addf %57, %59 : vector<80x64xf32>
    %cst_52 = arith.constant 0.000000e+00 : f32
    %61 = vector.broadcast %cst_52 : f32 to vector<80x64xf32>
    %62 = arith.maximumf %60, %61 : vector<80x64xf32>
    %63 = arith.truncf %62 : vector<80x64xf32> to vector<80x64xbf16>
    %c0_53 = arith.constant 0 : index
    %c0_54 = arith.constant 0 : index
    %c0_55 = arith.constant 0 : index
    %64 = vector.load %arg5[%c0_53, %c0_54, %c0_55] : memref<1x80x64xbf16, #tpu.memory_space<vmem>>, vector<1x80x64xbf16>
    %65 = vector.shape_cast %64 : vector<1x80x64xbf16> to vector<80x64xbf16>
    %66 = vector.shape_cast %63 : vector<80x64xbf16> to vector<1x80x64xbf16>
    tpu.vector_store %arg5[%c0_53, %c0_54, %c0_55], %66 {strides = array<i32>} : memref<1x80x64xbf16, #tpu.memory_space<vmem>>, vector<1x80x64xbf16>,
    return
  }
  func.func @transform_0(%arg0: i32) -> (i32, i32, i32) {
    %c0_i32 = arith.constant 0 : i32
    %c0_i32_0 = arith.constant 0 : i32
    %c0_i32_1 = arith.constant 0 : i32
    return %arg0, %c0_i32, %c0_i32_0 : i32, i32, i32
  }
  func.func @transform_1(%arg0: i32) -> (i32, i32, i32) {
    %c0_i32 = arith.constant 0 : i32
    %c0_i32_0 = arith.constant 0 : i32
    %c0_i32_1 = arith.constant 0 : i32
    %c0_i32_2 = arith.constant 0 : i32
    return %c0_i32, %c0_i32_0, %c0_i32_1 : i32, i32, i32
  }
  func.func @transform_2(%arg0: i32) -> (i32, i32) {
    %c0_i32 = arith.constant 0 : i32
    %c0_i32_0 = arith.constant 0 : i32
    %c0_i32_1 = arith.constant 0 : i32
    return %c0_i32, %c0_i32_0 : i32, i32
  }
  func.func @transform_3(%arg0: i32) -> (i32, i32) {
    %c0_i32 = arith.constant 0 : i32
    %c0_i32_0 = arith.constant 0 : i32
    %c0_i32_1 = arith.constant 0 : i32
    return %c0_i32, %c0_i32_0 : i32, i32
  }
  func.func @transform_4(%arg0: i32) -> (i32, i32, i32) {
    %c0_i32 = arith.constant 0 : i32
    %c0_i32_0 = arith.constant 0 : i32
    %c0_i32_1 = arith.constant 0 : i32
    return %arg0, %c0_i32, %c0_i32_0 : i32, i32, i32
  }
}

module attributes {stable_mosaic.version = 11 : i64} {
  func.func @_conv3x3_bn_relu_kernel(%arg0: i32, %arg1: memref<1x42x64xbf16, #tpu.memory_space<vmem>>, %arg2: memref<9x64x64xbf16, #tpu.memory_space<vmem>>, %arg3: memref<1x64xf32, #tpu.memory_space<vmem>>, %arg4: memref<1x64xf32, #tpu.memory_space<vmem>>, %arg5: memref<1x24x64xbf16, #tpu.memory_space<vmem>>) attributes {dimension_semantics = [#tpu.dimension_semantics<parallel>], iteration_bounds = array<i64: 2>, scalar_prefetch = 0 : i64, scratch_operands = 0 : i64, tpu.core_type = #tpu.core_type<tc>, window_params = [{transform_indices = @transform_0, window_bounds = array<i64: 1, 42, 64>}, {pipeline_mode = #tpu.pipeline_mode<synchronous>, transform_indices = @transform_1, window_bounds = array<i64: 9, 64, 64>}, {pipeline_mode = #tpu.pipeline_mode<synchronous>, transform_indices = @transform_2, window_bounds = array<i64: 1, 64>}, {pipeline_mode = #tpu.pipeline_mode<synchronous>, transform_indices = @transform_3, window_bounds = array<i64: 1, 64>}, {transform_indices = @transform_4, window_bounds = array<i64: 1, 24, 64>}]} {
    %cst = arith.constant 0.000000e+00 : f32
    %0 = vector.broadcast %cst : f32 to vector<24x64xf32>
    %c0 = arith.constant 0 : index
    %c0_0 = arith.constant 0 : index
    %c0_1 = arith.constant 0 : index
    %1 = vector.load %arg1[%c0, %c0_0, %c0_1] : memref<1x42x64xbf16, #tpu.memory_space<vmem>>, vector<1x24x64xbf16>
    %2 = vector.shape_cast %1 : vector<1x24x64xbf16> to vector<24x64xbf16>
    %c0_2 = arith.constant 0 : index
    %c0_3 = arith.constant 0 : index
    %c0_4 = arith.constant 0 : index
    %3 = vector.load %arg2[%c0_2, %c0_3, %c0_4] : memref<9x64x64xbf16, #tpu.memory_space<vmem>>, vector<1x64x64xbf16>
    %4 = vector.shape_cast %3 : vector<1x64x64xbf16> to vector<64x64xbf16>
    %cst_5 = arith.constant dense<0.000000e+00> : vector<24x64xf32>
    %5 = tpu.matmul %2, %4, %cst_5 {dimension_numbers = #tpu.dot_dimension_numbers<[1], [0], [0], [1], [0, 0, 1, 1], [], []>} : vector<24x64xbf16>, vector<64x64xbf16>, vector<24x64xf32> -> vector<24x64xf32>
    %6 = arith.addf %0, %5 : vector<24x64xf32>
    %c0_6 = arith.constant 0 : index
    %c1 = arith.constant 1 : index
    %c0_7 = arith.constant 0 : index
    %7 = vector.load %arg1[%c0_6, %c1, %c0_7] : memref<1x42x64xbf16, #tpu.memory_space<vmem>>, vector<1x24x64xbf16>
    %8 = vector.shape_cast %7 : vector<1x24x64xbf16> to vector<24x64xbf16>
    %c1_8 = arith.constant 1 : index
    %c0_9 = arith.constant 0 : index
    %c0_10 = arith.constant 0 : index
    %9 = vector.load %arg2[%c1_8, %c0_9, %c0_10] : memref<9x64x64xbf16, #tpu.memory_space<vmem>>, vector<1x64x64xbf16>
    %10 = vector.shape_cast %9 : vector<1x64x64xbf16> to vector<64x64xbf16>
    %cst_11 = arith.constant dense<0.000000e+00> : vector<24x64xf32>
    %11 = tpu.matmul %8, %10, %cst_11 {dimension_numbers = #tpu.dot_dimension_numbers<[1], [0], [0], [1], [0, 0, 1, 1], [], []>} : vector<24x64xbf16>, vector<64x64xbf16>, vector<24x64xf32> -> vector<24x64xf32>
    %12 = arith.addf %6, %11 : vector<24x64xf32>
    %c0_12 = arith.constant 0 : index
    %c2 = arith.constant 2 : index
    %c0_13 = arith.constant 0 : index
    %13 = vector.load %arg1[%c0_12, %c2, %c0_13] : memref<1x42x64xbf16, #tpu.memory_space<vmem>>, vector<1x24x64xbf16>
    %14 = vector.shape_cast %13 : vector<1x24x64xbf16> to vector<24x64xbf16>
    %c2_14 = arith.constant 2 : index
    %c0_15 = arith.constant 0 : index
    %c0_16 = arith.constant 0 : index
    %15 = vector.load %arg2[%c2_14, %c0_15, %c0_16] : memref<9x64x64xbf16, #tpu.memory_space<vmem>>, vector<1x64x64xbf16>
    %16 = vector.shape_cast %15 : vector<1x64x64xbf16> to vector<64x64xbf16>
    %cst_17 = arith.constant dense<0.000000e+00> : vector<24x64xf32>
    %17 = tpu.matmul %14, %16, %cst_17 {dimension_numbers = #tpu.dot_dimension_numbers<[1], [0], [0], [1], [0, 0, 1, 1], [], []>} : vector<24x64xbf16>, vector<64x64xbf16>, vector<24x64xf32> -> vector<24x64xf32>
    %18 = arith.addf %12, %17 : vector<24x64xf32>
    %c0_18 = arith.constant 0 : index
    %c6 = arith.constant 6 : index
    %c0_19 = arith.constant 0 : index
    %19 = vector.load %arg1[%c0_18, %c6, %c0_19] : memref<1x42x64xbf16, #tpu.memory_space<vmem>>, vector<1x24x64xbf16>
    %20 = vector.shape_cast %19 : vector<1x24x64xbf16> to vector<24x64xbf16>
    %c3 = arith.constant 3 : index
    %c0_20 = arith.constant 0 : index
    %c0_21 = arith.constant 0 : index
    %21 = vector.load %arg2[%c3, %c0_20, %c0_21] : memref<9x64x64xbf16, #tpu.memory_space<vmem>>, vector<1x64x64xbf16>
    %22 = vector.shape_cast %21 : vector<1x64x64xbf16> to vector<64x64xbf16>
    %cst_22 = arith.constant dense<0.000000e+00> : vector<24x64xf32>
    %23 = tpu.matmul %20, %22, %cst_22 {dimension_numbers = #tpu.dot_dimension_numbers<[1], [0], [0], [1], [0, 0, 1, 1], [], []>} : vector<24x64xbf16>, vector<64x64xbf16>, vector<24x64xf32> -> vector<24x64xf32>
    %24 = arith.addf %18, %23 : vector<24x64xf32>
    %c0_23 = arith.constant 0 : index
    %c7 = arith.constant 7 : index
    %c0_24 = arith.constant 0 : index
    %25 = vector.load %arg1[%c0_23, %c7, %c0_24] : memref<1x42x64xbf16, #tpu.memory_space<vmem>>, vector<1x24x64xbf16>
    %26 = vector.shape_cast %25 : vector<1x24x64xbf16> to vector<24x64xbf16>
    %c4 = arith.constant 4 : index
    %c0_25 = arith.constant 0 : index
    %c0_26 = arith.constant 0 : index
    %27 = vector.load %arg2[%c4, %c0_25, %c0_26] : memref<9x64x64xbf16, #tpu.memory_space<vmem>>, vector<1x64x64xbf16>
    %28 = vector.shape_cast %27 : vector<1x64x64xbf16> to vector<64x64xbf16>
    %cst_27 = arith.constant dense<0.000000e+00> : vector<24x64xf32>
    %29 = tpu.matmul %26, %28, %cst_27 {dimension_numbers = #tpu.dot_dimension_numbers<[1], [0], [0], [1], [0, 0, 1, 1], [], []>} : vector<24x64xbf16>, vector<64x64xbf16>, vector<24x64xf32> -> vector<24x64xf32>
    %30 = arith.addf %24, %29 : vector<24x64xf32>
    %c0_28 = arith.constant 0 : index
    %c8 = arith.constant 8 : index
    %c0_29 = arith.constant 0 : index
    %31 = vector.load %arg1[%c0_28, %c8, %c0_29] : memref<1x42x64xbf16, #tpu.memory_space<vmem>>, vector<1x24x64xbf16>
    %32 = vector.shape_cast %31 : vector<1x24x64xbf16> to vector<24x64xbf16>
    %c5 = arith.constant 5 : index
    %c0_30 = arith.constant 0 : index
    %c0_31 = arith.constant 0 : index
    %33 = vector.load %arg2[%c5, %c0_30, %c0_31] : memref<9x64x64xbf16, #tpu.memory_space<vmem>>, vector<1x64x64xbf16>
    %34 = vector.shape_cast %33 : vector<1x64x64xbf16> to vector<64x64xbf16>
    %cst_32 = arith.constant dense<0.000000e+00> : vector<24x64xf32>
    %35 = tpu.matmul %32, %34, %cst_32 {dimension_numbers = #tpu.dot_dimension_numbers<[1], [0], [0], [1], [0, 0, 1, 1], [], []>} : vector<24x64xbf16>, vector<64x64xbf16>, vector<24x64xf32> -> vector<24x64xf32>
    %36 = arith.addf %30, %35 : vector<24x64xf32>
    %c0_33 = arith.constant 0 : index
    %c12 = arith.constant 12 : index
    %c0_34 = arith.constant 0 : index
    %37 = vector.load %arg1[%c0_33, %c12, %c0_34] : memref<1x42x64xbf16, #tpu.memory_space<vmem>>, vector<1x24x64xbf16>
    %38 = vector.shape_cast %37 : vector<1x24x64xbf16> to vector<24x64xbf16>
    %c6_35 = arith.constant 6 : index
    %c0_36 = arith.constant 0 : index
    %c0_37 = arith.constant 0 : index
    %39 = vector.load %arg2[%c6_35, %c0_36, %c0_37] : memref<9x64x64xbf16, #tpu.memory_space<vmem>>, vector<1x64x64xbf16>
    %40 = vector.shape_cast %39 : vector<1x64x64xbf16> to vector<64x64xbf16>
    %cst_38 = arith.constant dense<0.000000e+00> : vector<24x64xf32>
    %41 = tpu.matmul %38, %40, %cst_38 {dimension_numbers = #tpu.dot_dimension_numbers<[1], [0], [0], [1], [0, 0, 1, 1], [], []>} : vector<24x64xbf16>, vector<64x64xbf16>, vector<24x64xf32> -> vector<24x64xf32>
    %42 = arith.addf %36, %41 : vector<24x64xf32>
    %c0_39 = arith.constant 0 : index
    %c13 = arith.constant 13 : index
    %c0_40 = arith.constant 0 : index
    %43 = vector.load %arg1[%c0_39, %c13, %c0_40] : memref<1x42x64xbf16, #tpu.memory_space<vmem>>, vector<1x24x64xbf16>
    %44 = vector.shape_cast %43 : vector<1x24x64xbf16> to vector<24x64xbf16>
    %c7_41 = arith.constant 7 : index
    %c0_42 = arith.constant 0 : index
    %c0_43 = arith.constant 0 : index
    %45 = vector.load %arg2[%c7_41, %c0_42, %c0_43] : memref<9x64x64xbf16, #tpu.memory_space<vmem>>, vector<1x64x64xbf16>
    %46 = vector.shape_cast %45 : vector<1x64x64xbf16> to vector<64x64xbf16>
    %cst_44 = arith.constant dense<0.000000e+00> : vector<24x64xf32>
    %47 = tpu.matmul %44, %46, %cst_44 {dimension_numbers = #tpu.dot_dimension_numbers<[1], [0], [0], [1], [0, 0, 1, 1], [], []>} : vector<24x64xbf16>, vector<64x64xbf16>, vector<24x64xf32> -> vector<24x64xf32>
    %48 = arith.addf %42, %47 : vector<24x64xf32>
    %c0_45 = arith.constant 0 : index
    %c14 = arith.constant 14 : index
    %c0_46 = arith.constant 0 : index
    %49 = vector.load %arg1[%c0_45, %c14, %c0_46] : memref<1x42x64xbf16, #tpu.memory_space<vmem>>, vector<1x24x64xbf16>
    %50 = vector.shape_cast %49 : vector<1x24x64xbf16> to vector<24x64xbf16>
    %c8_47 = arith.constant 8 : index
    %c0_48 = arith.constant 0 : index
    %c0_49 = arith.constant 0 : index
    %51 = vector.load %arg2[%c8_47, %c0_48, %c0_49] : memref<9x64x64xbf16, #tpu.memory_space<vmem>>, vector<1x64x64xbf16>
    %52 = vector.shape_cast %51 : vector<1x64x64xbf16> to vector<64x64xbf16>
    %cst_50 = arith.constant dense<0.000000e+00> : vector<24x64xf32>
    %53 = tpu.matmul %50, %52, %cst_50 {dimension_numbers = #tpu.dot_dimension_numbers<[1], [0], [0], [1], [0, 0, 1, 1], [], []>} : vector<24x64xbf16>, vector<64x64xbf16>, vector<24x64xf32> -> vector<24x64xf32>
    %54 = arith.addf %48, %53 : vector<24x64xf32>
    %c0_51 = arith.constant 0 : index
    %c0_52 = arith.constant 0 : index
    %55 = vector.load %arg3[%c0_51, %c0_52] : memref<1x64xf32, #tpu.memory_space<vmem>>, vector<1x64xf32>
    %56 = vector.broadcast %55 : vector<1x64xf32> to vector<24x64xf32>
    %57 = arith.mulf %54, %56 : vector<24x64xf32>
    %c0_53 = arith.constant 0 : index
    %c0_54 = arith.constant 0 : index
    %58 = vector.load %arg4[%c0_53, %c0_54] : memref<1x64xf32, #tpu.memory_space<vmem>>, vector<1x64xf32>
    %59 = vector.broadcast %58 : vector<1x64xf32> to vector<24x64xf32>
    %60 = arith.addf %57, %59 : vector<24x64xf32>
    %cst_55 = arith.constant 0.000000e+00 : f32
    %61 = vector.broadcast %cst_55 : f32 to vector<24x64xf32>
    %62 = arith.maximumf %60, %61 : vector<24x64xf32>
    %63 = arith.truncf %62 : vector<24x64xf32> to vector<24x64xbf16>
    %c0_56 = arith.constant 0 : index
    %c0_57 = arith.constant 0 : index
    %c0_58 = arith.constant 0 : index
    %64 = vector.load %arg5[%c0_56, %c0_57, %c0_58] : memref<1x24x64xbf16, #tpu.memory_space<vmem>>, vector<1x24x64xbf16>
    %65 = vector.shape_cast %64 : vector<1x24x64xbf16> to vector<24x64xbf16>
    %66 = vector.shape_cast %63 : vector<24x64xbf16> to vector<1x24x64xbf16>
    tpu.vector_store %arg5[%c0_56, %c0_57, %c0_58], %66 {strides = array<i32>} : memref<1x24x64xbf16, #tpu.memory_space<vmem>>, vector<1x24x64xbf16>,
    return
  }
  func.func @transform_0(%arg0: i32) -> (i32, i32, i32) {
    %c0_i32 = arith.constant 0 : i32
    %c0_i32_0 = arith.constant 0 : i32
    %c0_i32_1 = arith.constant 0 : i32
    return %arg0, %c0_i32, %c0_i32_0 : i32, i32, i32
  }
  func.func @transform_1(%arg0: i32) -> (i32, i32, i32) {
    %c0_i32 = arith.constant 0 : i32
    %c0_i32_0 = arith.constant 0 : i32
    %c0_i32_1 = arith.constant 0 : i32
    %c0_i32_2 = arith.constant 0 : i32
    return %c0_i32, %c0_i32_0, %c0_i32_1 : i32, i32, i32
  }
  func.func @transform_2(%arg0: i32) -> (i32, i32) {
    %c0_i32 = arith.constant 0 : i32
    %c0_i32_0 = arith.constant 0 : i32
    %c0_i32_1 = arith.constant 0 : i32
    return %c0_i32, %c0_i32_0 : i32, i32
  }
  func.func @transform_3(%arg0: i32) -> (i32, i32) {
    %c0_i32 = arith.constant 0 : i32
    %c0_i32_0 = arith.constant 0 : i32
    %c0_i32_1 = arith.constant 0 : i32
    return %c0_i32, %c0_i32_0 : i32, i32
  }
  func.func @transform_4(%arg0: i32) -> (i32, i32, i32) {
    %c0_i32 = arith.constant 0 : i32
    %c0_i32_0 = arith.constant 0 : i32
    %c0_i32_1 = arith.constant 0 : i32
    return %arg0, %c0_i32, %c0_i32_0 : i32, i32, i32
  }
}

module attributes {stable_mosaic.version = 11 : i64} {
  func.func @_cross_relation_kernel(%arg0: i32, %arg1: i32, %arg2: memref<1x16x64xbf16, #tpu.memory_space<vmem>>, %arg3: memref<32x64xbf16, #tpu.memory_space<vmem>>, %arg4: memref<1x1x32xf32, #tpu.memory_space<vmem>>) attributes {dimension_semantics = [#tpu.dimension_semantics<parallel>, #tpu.dimension_semantics<parallel>], iteration_bounds = array<i64: 2, 1>, scalar_prefetch = 0 : i64, scratch_operands = 0 : i64, tpu.core_type = #tpu.core_type<tc>, window_params = [{transform_indices = @transform_0, window_bounds = array<i64: 1, 16, 64>}, {transform_indices = @transform_1, window_bounds = array<i64: 32, 64>}, {transform_indices = @transform_2, window_bounds = array<i64: 1, 1, 32>}]} {
    %c0 = arith.constant 0 : index
    %c0_0 = arith.constant 0 : index
    %c0_1 = arith.constant 0 : index
    %0 = vector.load %arg2[%c0, %c0_0, %c0_1] : memref<1x16x64xbf16, #tpu.memory_space<vmem>>, vector<1x16x64xbf16>
    %1 = vector.shape_cast %0 : vector<1x16x64xbf16> to vector<16x64xbf16>
    %c0_2 = arith.constant 0 : index
    %c0_3 = arith.constant 0 : index
    %2 = vector.load %arg3[%c0_2, %c0_3] : memref<32x64xbf16, #tpu.memory_space<vmem>>, vector<32x64xbf16>
    %cst = arith.constant dense<0.000000e+00> : vector<16x32xf32>
    %3 = tpu.matmul %1, %2, %cst {dimension_numbers = #tpu.dot_dimension_numbers<[1], [1], [0], [0], [0, 0, 1, 0], [], []>} : vector<16x64xbf16>, vector<32x64xbf16>, vector<16x32xf32> -> vector<16x32xf32>
    %cst_4 = arith.constant 0.000000e+00 : f32
    %4 = vector.broadcast %cst_4 : f32 to vector<1x32xf32>
    %cst_5 = arith.constant dense<0xFF800000> : vector<32xf32>
    %5 = vector.multi_reduction <maximumf>, %3, %cst_5 [0] : vector<16x32xf32> to vector<32xf32>
    %6 = vector.shape_cast %5 : vector<32xf32> to vector<1x32xf32>
    %7 = arith.addf %4, %6 : vector<1x32xf32>
    %8 = vector.broadcast %6 : vector<1x32xf32> to vector<16x32xf32>
    %9 = arith.cmpf oge, %3, %8 : vector<16x32xf32>
    %cst_6 = arith.constant 0xFF800000 : f32
    %10 = vector.broadcast %cst_6 : f32 to vector<16x32xf32>
    %11 = arith.select %9, %10, %3 : vector<16x32xi1>, vector<16x32xf32>
    %cst_7 = arith.constant dense<0xFF800000> : vector<32xf32>
    %12 = vector.multi_reduction <maximumf>, %11, %cst_7 [0] : vector<16x32xf32> to vector<32xf32>
    %13 = vector.shape_cast %12 : vector<32xf32> to vector<1x32xf32>
    %14 = arith.addf %7, %13 : vector<1x32xf32>
    %15 = vector.broadcast %13 : vector<1x32xf32> to vector<16x32xf32>
    %16 = arith.cmpf oge, %11, %15 : vector<16x32xf32>
    %cst_8 = arith.constant 0xFF800000 : f32
    %17 = vector.broadcast %cst_8 : f32 to vector<16x32xf32>
    %18 = arith.select %16, %17, %11 : vector<16x32xi1>, vector<16x32xf32>
    %cst_9 = arith.constant dense<0xFF800000> : vector<32xf32>
    %19 = vector.multi_reduction <maximumf>, %18, %cst_9 [0] : vector<16x32xf32> to vector<32xf32>
    %20 = vector.shape_cast %19 : vector<32xf32> to vector<1x32xf32>
    %21 = arith.addf %14, %20 : vector<1x32xf32>
    %c0_10 = arith.constant 0 : index
    %c0_11 = arith.constant 0 : index
    %c0_12 = arith.constant 0 : index
    %22 = vector.load %arg4[%c0_10, %c0_11, %c0_12] : memref<1x1x32xf32, #tpu.memory_space<vmem>>, vector<1x1x32xf32>
    %23 = vector.shape_cast %22 : vector<1x1x32xf32> to vector<1x32xf32>
    %24 = vector.shape_cast %21 : vector<1x32xf32> to vector<1x1x32xf32>
    tpu.vector_store %arg4[%c0_10, %c0_11, %c0_12], %24 {strides = array<i32>} : memref<1x1x32xf32, #tpu.memory_space<vmem>>, vector<1x1x32xf32>,
    return
  }
  func.func @transform_0(%arg0: i32, %arg1: i32) -> (i32, i32, i32) {
    %c0_i32 = arith.constant 0 : i32
    %c0_i32_0 = arith.constant 0 : i32
    %c0_i32_1 = arith.constant 0 : i32
    return %arg0, %c0_i32, %c0_i32_0 : i32, i32, i32
  }
  func.func @transform_1(%arg0: i32, %arg1: i32) -> (i32, i32) {
    %c0_i32 = arith.constant 0 : i32
    %c0_i32_0 = arith.constant 0 : i32
    return %arg1, %c0_i32 : i32, i32
  }
  func.func @transform_2(%arg0: i32, %arg1: i32) -> (i32, i32, i32) {
    %c0_i32 = arith.constant 0 : i32
    %c0_i32_0 = arith.constant 0 : i32
    return %arg0, %c0_i32, %arg1 : i32, i32, i32
  }
}

</mosaic_0001>

<bundles_post_ra>
// kernel: cross_relation_net.10
= control target key start
LH: loop header
LB: loop body
LE: loop exit
PB: predicated region body
PF: predicated region fallthrough
CT: control target
= control target key end

     0   :  { %s2497_s15 = smov 0   ;;  %s3100_s0 = inlined_call_operand.vmem [shape: bf16[2,110,64], index: 0, kind: input, shape index: {}]   ;;  %s3101_s1 = inlined_call_operand.vmem [shape: bf16[9,64,64], index: 1, kind: input, shape index: {}]   ;;  %s3102_s2 = inlined_call_operand.vmem [shape: f32[1,64], index: 2, kind: input, shape index: {}]   ;;  %s3103_s3 = inlined_call_operand.vmem [shape: f32[1,64], index: 3, kind: input, shape index: {}]   ;;  %s3104_s4 = inlined_call_operand.vmem [shape: bf16[2,80,64], index: 4, kind: output, shape index: {}]  }
   0x1 LB: > { %s1851_s16 = sadd.s32 4294967295, %s2468_s15   ;;  %p1855_p0 = scmp.ge.s32.totalorder %s2468_s15, 1  ;;  %s2468_s15 = sphi %s2497_s15, %s14_s15  }
   0x2   : > { %p162_p1 = scmp.lt.s32.totalorder %s2468_s15, 3 }
   0x4   : > { %p163_p2 = pnand %p1855_p0, %p162_p1 }
   0x5   : > { %p188_p3 = scmp.lt.s32.totalorder (!%p163_p2), %s1851_s16, 1 }
   0x6   : > { %166 = sbr.rel (%p163_p2) target bundleno = 414 (0x19e), region = 36 }
   0xb   : > { %v2403_v0 = vld [vmem:[%s3101_s1 + $0x38] sm:$0xff]   ;;  %v2470_v1 = vmov 0.0   ;;  %v2404_v2 = vld [vmem:[%s3101_s1 + $0x30] sm:$0xff]   ;;  %vm2471_vm0 = vmmov 0   ;;  %s3106_s16 = smov (!%p188_p3, %s1851_s16), 1  ;;  %v2405_v3 = vld [vmem:[%s3101_s1 + $0x28] sm:$0xff]  }
   0xc   : > { %2383 = vmatprep.subr.bf16.mxu1 %v2470_v1  ;;  %2131 = vmatprep.subr.bf16.mxu0 %v2470_v1  ;;  %s2391_s23 = smul.u32 56, %s3106_s16  ;;  %v2406_v4 = vld [vmem:[%s3101_s1 + $0x20] sm:$0xff]   ;;  %vm255_vm1 = vsmask.f32 7424  ;;  %vm324_vm2 = vcmask 523264   ;;  %v2409_v19 = vld [vmem:[%s3101_s1 + $0x18] sm:$0xff]  }
   0xd   : > { %2387 = vmatpush3.bf16.msra.mxu1 %v2403_v0  ;;  %2132 = vmatpush3.bf16.msra.mxu0 %v2403_v0  ;;  %v2412_v26 = vld [vmem:[%s3101_s1 + $0x58] sm:$0xff]   ;;  %v2413_v32 = vld [vmem:[%s3101_s1 + $0x10] sm:$0xff]   ;;  %v2416_v37 = vld [vmem:[%s3101_s1 + $0x8] sm:$0xff]   ;;  %vm533_vm3 = vcmask 1046528   ;;  %vm861_vm4 = vsmask.f32 6400 }
   0xe   : > { %2384 = vmatprep.subr.bf16.mxu1 %v2470_v1  ;;  %2133 = vmatprep.subr.bf16.mxu0 %v2470_v1  ;;  %s2533_s28 = scalar_lea.vmem %s3100_s0, %s2391_s23  ;;  %v2415_v35 = vld [vmem:[%s3101_s1 + $0x50] sm:$0xff]   ;;  %v2417_v43 = vld [vmem:[%s3101_s1 + $0x48] sm:$0xff]   ;;  %v2420_v47 = vld [vmem:[%s3101_s1] sm:$0xff]   ;;  %vm1050_vm5 = vcmask 1045504   ;;  %vm1567_vm6 = vcmask 1044480   ;;  %s2392_s26 = smul.u32 40, %s3106_s16 }
   0xf   : > { %2147 = vmatprep.mubr.msk.bf16.mxu1 %vm2471_vm0, %v2470_v1  ;;  %2139 = vmatprep.mubr.msk.bf16.mxu0 %vm2471_vm0, %v2470_v1  ;;  %v2536_v5 = vld [vmem:[%s2533_s28 + $0x10] sm:$0xff]   ;;  %v2539_v6 = vld [vmem:[%s2533_s28 + $0x18] sm:$0xff]   ;;  %v199_v7 = vld [vmem:[%s2533_s28] sm:$0xf]  ;;  %vm1378_vm7 = vsmask.f32 5376 }
  0x10   : > { %v2545_v8 = vld [vmem:[%s2533_s28 + $0x4] sm:$0xf]  ;;  %v272_v9 = vshll.u32 %v2536_v5, 16  ;;  %v276_v10 = vshrl.u32 %v2536_v5, 16  ;;  %v280_v11 = vshll.u32 %v2539_v6, 16  ;;  %v2554_v13 = vld [vmem:[%s2533_s28 + $0x8] sm:$0xff]   ;;  %s3041_s16 = scalar_lea.vmem %s3104_s4, %s2392_s26 }
  0x11   : > { %2388 = vmatpush3.bf16.msra.mxu1 %v2404_v2  ;;  %2134 = vmatpush3.bf16.msra.mxu0 %v2404_v2  ;;  %v2551_v12 = vcombine.low %v199_v7, %v2545_v8  ;;  %v2557_v14 = vld [vmem:[%s2533_s28 + $0x20] sm:$0xff]   ;;  %v264_v20 = vshll.u32 %v2554_v13, 16  ;;  %v284_v21 = vshrl.u32 %v2539_v6, 16  ;;  %v268_v27 = vshrl.u32 %v2554_v13, 16  ;;  %v2423_v53 = vld [vmem:[%s3101_s1 + $0x98] sm:$0xff]   ;;  %v2425_v55 = vld [vmem:[%s3101_s1 + $0x90] sm:$0xff]  }
  0x12   : > { %2385 = vmatprep.subr.bf16.mxu1 %v2470_v1  ;;  %2135 = vmatprep.subr.bf16.mxu0 %v2470_v1  ;;  %v274_v15 = vrot.slane %v272_v9, 1  ;;  %v282_v16 = vrot.slane %v280_v11, 1  ;;  %v288_v24 = vshll.u32 %v2557_v14, 16  ;;  %v2576_v30 = vld [vmem:[%s2533_s28 + $0x28] ss:$0 sps:$4 sm:$0x11]  }
  0x13   : > { %v257_v17 = vshrl.u32 %v2551_v12, 16  ;;  %v259_v18 = vshll.u32 %v2551_v12, 16  ;;  %v266_v25 = vrot.slane %v264_v20, 1  ;;  %v520_v38 = vld [vmem:[%s2533_s28] sm:$0xe]  ;;  %v292_v40 = vshrl.u32 %v2557_v14, 16 }
  0x14   : > { %v278_v22 = vor.u32 %v276_v10, %v274_v15  ;;  %v286_v33 = vor.u32 %v284_v21, %v282_v16  ;;  %v290_v34 = vrot.slane %v288_v24, 1  ;;  %v296_v41 = vshll.u32 %v2576_v30, 16  ;;  %v2419_v48 = vld [vmem:[%s3101_s1 + $0x40] sm:$0xff]   ;;  %v2422_v58 = vld [vmem:[%s3101_s1 + $0x78] sm:$0xff]   ;;  %v2427_v62 = vld [vmem:[%s3101_s1 + $0x88] sm:$0xff]  }
  0x15   : > { %2389 = vmatpush3.bf16.msra.mxu1 %v2405_v3  ;;  %2136 = vmatpush3.bf16.msra.mxu0 %v2405_v3  ;;  %v261_v23 = vrot.slane %v259_v18, 1  ;;  %v270_v36 = vor.u32 %v268_v27, %v266_v25  ;;  %v1898_v44 = vcombine.low %v520_v38, %v2545_v8  ;;  %v535_v50 = vrot.slane %v2554_v13, 1  ;;  %v2639_v56 = vld [vmem:[%s2533_s28 + $0x1c] sm:$0xff]   ;;  %v2643_v57 = vld [vmem:[%s2533_s28 + $0x24] sm:$0xff]   ;;  %v2424_v0 = vld [vmem:[%s3101_s1 + $0x70] sm:$0xff]  }
  0x16   : > { %2386 = vmatprep.subr.bf16.mxu1 %v2470_v1  ;;  %2137 = vmatprep.subr.bf16.mxu0 %v2470_v1  ;;  %v283_v28 = vsel %vm255_vm1, %v278_v22, %v282_v16  ;;  %v291_v39 = vsel %vm255_vm1, %v286_v33, %v290_v34  ;;  %v294_v45 = vor.u32 %v292_v40, %v290_v34  ;;  %v298_v46 = vrot.slane %v296_v41, 1  ;;  %v2443_v2 = vld [vmem:[%s2533_s28 + $0x2c] ss:$0 sps:$4 sm:$0x11]   ;;  %v2428_v11 = vld [vmem:[%s3101_s1 + $0x60] sm:$0xff]  }
  0x17   : > { %v262_v29 = vor.u32 %v261_v23, %v257_v17  ;;  %v275_v42 = vsel %vm255_vm1, %v270_v36, %v274_v15  ;;  %v534_v49 = vrot.slane %v1898_v44, 1  ;;  %v537_v54 = vrot.slane %v2536_v5, 1  ;;  %v2426_v8 = vld [vmem:[%s3101_s1 + $0x68] sm:$0xff]  }
  0x18   : > { %v299_v51 = vsel %vm255_vm1, %v294_v45, %v298_v46  ;;  %v720_v59 = vrot.slane %v2639_v56, 1  ;;  %v722_v60 = vrot.slane %v2643_v57, 1  ;;  %v539_v3 = vrot.slane %v2539_v6, 1  ;;  %v2700_v15 = vld [vmem:[%s2533_s28 + $0x8] sm:$0xf]  ;;  %v2706_v18 = vld [vmem:[%s2533_s28 + $0xc] sm:$0xff]  }
  0x19   : > { %2390 = vmatpush3.bf16.msra.mxu1 %v2406_v4  ;;  %2138 = vmatpush3.bf16.msra.mxu0 %v2406_v4  ;;  %v267_v31 = vsel %vm255_vm1, %v262_v29, %v266_v25  ;;  %v536_v52 = vsel %vm533_vm3, %v534_v49, %v535_v50  ;;  %v538_v61 = vsel %vm533_vm3, %v535_v50, %v537_v54  ;;  %v2429_v4 = vld [vmem:[%s3101_s1 + $0x80] sm:$0xff]   ;;  %v724_v7 = vrot.slane %v2443_v2, 1  ;;  %v2440_v46 = vld [vmem:[%s3101_s1 + $0xc8] sm:$0xff]  }
  0x1a   : > { %2159 = vmatprep.subr.bf16.mxu1 %v2470_v1  ;;  %2187 = vmatprep.subr.bf16.mxu0 %v2470_v1  ;;  %v2660_v63 = vsel %vm533_vm3, %v720_v59, %v722_v60  ;;  %v540_v10 = vsel %vm533_vm3, %v537_v54, %v539_v3  ;;  %v871_v22 = vshrl.u32 %v2706_v18, 16  ;;  %v874_v23 = vshll.u32 %v2706_v18, 16  ;;  %v2439_v54 = vld [vmem:[%s3101_s1 + $0xa8] sm:$0xff]  }
  0x1b   : > { %v2681_v9 = vsel %vm533_vm3, %v722_v60, %v724_v7  ;;  %v892_v40 = vshll.u32 %v2639_v56, 16  ;;  %v898_v50 = vshrl.u32 %v2643_v57, 16  ;;  %vm1785_vm8 = vcmask 519168  }
  0x1c   : > { %2148 = vmatmul.mubr.msk.bf16.vlgmr.msra.gmra.mxu1 %vm324_vm2, %v283_v28  ;;  %2140 = vmatmul.mubr.msk.bf16.vlgmr.msra.gmra.mxu0 %vm324_vm2, %v267_v31  ;;  %v876_v27 = vrot.slane %v874_v23, 2  ;;  %v2720_v28 = vld [vmem:[%s2533_s28 + $0x14] sm:$0xff]  }
  0x1d   : > { %2160 = vmatpush3.bf16.msra.mxu1 %v2409_v19  ;;  %2151 = vmatprep.mubr.msk.bf16.mxu1 %vm2471_vm0, %v2470_v1  ;;  %v543_v19 = vrot.slane %v2576_v30, 1  ;;  %v880_v31 = vshrl.u32 %v2720_v28, 16  ;;  %v894_v45 = vrot.slane %v892_v40, 2 }
  0x1e   : > { %2161 = vmatprep.subr.bf16.mxu1 %v2470_v1  ;;  %2188 = vmatpush3.bf16.msra.mxu0 %v2412_v26  ;;  %v873_v26 = vrot.slane %v871_v22, 1 }
  0x1f   : > { %2143 = vmatprep.mubr.msk.bf16.mxu0 %vm2471_vm0, %v2470_v1  ;;  %2189 = vmatprep.subr.bf16.mxu0 %v2470_v1  ;;  %v882_v34 = vrot.slane %v880_v31, 1  ;;  %v1054_v31 = vrot.slane %v2720_v28, 2 }
  0x20   : > { %v877_v30 = vor.u32 %v876_v27, %v873_v26  ;;  %v2453_v26 = vld [vmem:[%s3101_s1 + $0x110] sm:$0xff]  }
  0x21   : > { %2162 = vmatpush3.bf16.msra.mxu1 %v2413_v32  ;;  %v883_v32 = vshll.u32 %v2720_v28, 16 }
  0x22   : > { %2163 = vmatprep.subr.bf16.mxu1 %v2470_v1  ;;  %2190 = vmatpush3.bf16.msra.mxu0 %v2415_v35 }
  0x23   : > { %2191 = vmatprep.subr.bf16.mxu0 %v2470_v1  ;;  %v885_v35 = vrot.slane %v883_v32, 2  ;;  %v2451_v32 = vld [vmem:[%s3101_s1 + $0xf0] sm:$0xff]  }
  0x24   : > { %2152 = vmatmul.mubr.msk.bf16.gmra.mxu1 %vm324_vm2, %v291_v39  ;;  %2144 = vmatmul.mubr.msk.bf16.gmra.mxu0 %vm324_vm2, %v275_v42  ;;  %v889_v39 = vshrl.u32 %v2639_v56, 16  ;;  %v2432_v42 = vld [vmem:[%s3101_s1 + $0xb8] sm:$0xff]  }
  0x25   : > { %2164 = vmatpush3.bf16.msra.mxu1 %v2416_v37  ;;  %2155 = vmatprep.mubr.msk.bf16.mxu1 %vm2471_vm0, %v2470_v1  ;;  %v716_v37 = vrot.slane %v2706_v18, 1  ;;  %v886_v38 = vor.u32 %v885_v35, %v882_v34  ;;  %v2455_v34 = vld [vmem:[%s3101_s1 + $0xe8] sm:$0xff]  }
  0x26   : > { %2165 = vmatprep.subr.bf16.mxu1 %v2470_v1  ;;  %2192 = vmatpush3.bf16.msra.mxu0 %v2417_v43  ;;  %v891_v44 = vrot.slane %v889_v39, 1 }
  0x27   : > { %2195 = vmatprep.mubr.msk.bf16.mxu0 %vm2471_vm0, %v2470_v1  ;;  %2193 = vmatprep.subr.bf16.mxu0 %v2470_v1  ;;  %v887_v43 = vsel %vm861_vm4, %v877_v30, %v886_v38 }
  0x28   : > { %v895_v49 = vor.u32 %v894_v45, %v891_v44 }
  0x29   : > { %2166 = vmatpush3.bf16.msra.mxu1 %v2420_v47  ;;  %v718_v47 = vrot.slane %v2720_v28, 1 }
  0x2a   : > { %2215 = vmatprep.subr.bf16.mxu1 %v2470_v1  ;;  %2194 = vmatpush3.bf16.msra.mxu0 %v2419_v48  ;;  %v2435_v48 = vld [vmem:[%s3101_s1 + $0xb0] sm:$0xff]  }
  0x2b   : > { %2243 = vmatprep.subr.bf16.mxu0 %v2470_v1 }
  0x2c   : > { %2156 = vmatmul.mubr.msk.bf16.gmra.mxu1 %vm324_vm2, %v299_v51  ;;  %v901_v51 = vshll.u32 %v2643_v57, 16 }
  0x2d   : > { %2167 = vmatprep.mubr.msk.bf16.mxu1 %vm2471_vm0, %v2470_v1  ;;  %2196 = vmatmul.mubr.msk.bf16.vlgmr.msra.gmra.mxu0 %vm324_vm2, %v536_v52  ;;  %v2444_v52 = vld [vmem:[%s3101_s1 + $0xc0] sm:$0xff]  }
  0x2e   : > { %2244 = vmatpush3.bf16.msra.mxu0 %v2423_v53  ;;  %2199 = vmatprep.mubr.msk.bf16.mxu0 %vm2471_vm0, %v2470_v1  ;;  %v719_v53 = vsel %vm533_vm3, %v716_v37, %v718_v47  ;;  %v903_v60 = vrot.slane %v901_v51, 2 }
  0x2f   : > { %2245 = vmatprep.subr.bf16.mxu0 %v2470_v1 }
  0x32   : > { %2246 = vmatpush3.bf16.msra.mxu0 %v2425_v55  ;;  %v896_v55 = vsel %vm861_vm4, %v886_v38, %v895_v49  ;;  %v2458_v38 = vld [vmem:[%s3101_s1 + $0xe0] sm:$0xff]  }
  0x33   : > { %2247 = vmatprep.subr.bf16.mxu0 %v2470_v1 }
  0x34   : > { %2168 = vmatmul.mubr.msk.bf16.vlgmr.msra.gmra.mxu1 %vm324_vm2, %v2551_v12  ;;  %v541_v12 = vrot.slane %v2557_v14, 1 }
  0x35   : > { %2216 = vmatpush3.bf16.msra.mxu1 %v2422_v58  ;;  %2171 = vmatprep.mubr.msk.bf16.mxu1 %vm2471_vm0, %v2470_v1  ;;  %v900_v58 = vrot.slane %v898_v50, 1 }
  0x36   : > { %2200 = vmatmul.mubr.msk.bf16.gmra.mxu0 %vm324_vm2, %v538_v61  ;;  %2217 = vmatprep.subr.bf16.mxu1 %v2470_v1  ;;  %v542_v16 = vsel %vm533_vm3, %v539_v3, %v541_v12  ;;  %v544_v24 = vsel %vm533_vm3, %v541_v12, %v543_v19  ;;  %v2782_v61 = vld [vmem:[%s2533_s28 + $0x2c] ss:$0 sps:$4 sm:$0x33]   ;;  %v1037_v19 = vld [vmem:[%s2533_s28 + $0x4] sm:$0xc] }
  0x37   : > { %2203 = vmatprep.mubr.msk.bf16.mxu0 %vm2471_vm0, %v2470_v1  ;;  %2248 = vmatpush3.bf16.msra.mxu0 %v2427_v62  ;;  %v2442_v62 = vld [vmem:[%s3101_s1 + $0xa0] sm:$0xff]   ;;  %v907_v2 = vshrl.u32 %v2782_v61, 16  ;;  %v910_v3 = vshll.u32 %v2782_v61, 16  ;;  %v2810_v12 = vld [vmem:[%s2533_s28 + $0xc] sm:$0xf]  ;;  %v1957_v22 = vcombine.low %v1037_v19, %v2700_v15 }
  0x38   : > { %2249 = vmatprep.subr.bf16.mxu0 %v2470_v1 }
  0x39   : > { %2218 = vmatpush3.bf16.msra.mxu1 %v2424_v0  ;;  %v904_v0 = vor.u32 %v903_v60, %v900_v58 }
  0x3a   : > { %2219 = vmatprep.subr.bf16.mxu1 %v2470_v1 }
  0x3b   : > { %2250 = vmatpush3.bf16.msra.mxu0 %v2429_v4  ;;  %v721_v4 = vsel %vm533_vm3, %v718_v47, %v720_v59  ;;  %v905_v7 = vsel %vm861_vm4, %v895_v49, %v904_v0  ;;  %v1184_v59 = vld [vmem:[%s2533_s28 + $0x8] sm:$0xc]  ;;  %v1060_v47 = vrot.slane %v2782_v61, 2 }
  0x3c   : > { %2172 = vmatmul.mubr.msk.bf16.gmra.mxu1 %vm324_vm2, %v2554_v13  ;;  %2299 = vmatprep.subr.bf16.mxu0 %v2470_v1  ;;  %v667_v13 = vld [vmem:[%s2533_s28 + $0x4] sm:$0xe] }
  0x3d   : > { %2175 = vmatprep.mubr.msk.bf16.mxu1 %vm2471_vm0, %v2470_v1  ;;  %2220 = vmatpush3.bf16.msra.mxu1 %v2426_v8  ;;  %v1916_v17 = vcombine.low %v667_v13, %v2700_v15  ;;  %v909_v8 = vrot.slane %v907_v2, 1 }
  0x3e   : > { %2204 = vmatmul.mubr.msk.bf16.gmra.mxu0 %vm324_vm2, %v540_v10  ;;  %2221 = vmatprep.subr.bf16.mxu1 %v2470_v1  ;;  %v912_v10 = vrot.slane %v910_v3, 2 }
  0x3f   : > { %2207 = vmatprep.mubr.msk.bf16.mxu0 %vm2471_vm0, %v2470_v1  ;;  %v863_v20 = vshrl.u32 %v1916_v17, 16  ;;  %v866_v21 = vshll.u32 %v1916_v17, 16  ;;  %v715_v36 = vrot.slane %v1916_v17, 1  ;;  %v2817_v17 = vld [vmem:[%s2533_s28 + $0x10] sm:$0xff]  }
  0x40   : > { %v1388_v49 = vshrl.u32 %v2817_v17, 16  ;;  %v1391_v50 = vshll.u32 %v2817_v17, 16 }
  0x41   : > { %2222 = vmatpush3.bf16.msra.mxu1 %v2428_v11  ;;  %v865_v25 = vrot.slane %v863_v20, 1  ;;  %v717_v41 = vsel %vm533_vm3, %v715_v36, %v716_v37  ;;  %v913_v11 = vor.u32 %v912_v10, %v909_v8  ;;  %v2885_v36 = vld [vmem:[%s2533_s28 + $0x28] sm:$0xff]   ;;  %v1056_v37 = vrot.slane %v2639_v56, 2 }
  0x42   : > { %2271 = vmatprep.subr.bf16.mxu1 %v2470_v1  ;;  %v1239_v39 = vrot.slane %v2885_v36, 2  ;;  %v1390_v58 = vrot.slane %v1388_v49, 2  ;;  %v1393_v60 = vrot.slane %v1391_v50, 3 }
  0x43   : > { %v914_v13 = vsel %vm861_vm4, %v904_v0, %v913_v11  ;;  %v1057_v40 = vsel %vm1050_vm5, %v1054_v31, %v1056_v37 }
  0x44   : > { %2176 = vmatmul.mubr.msk.bf16.gmra.mxu1 %vm324_vm2, %v2536_v5  ;;  %v868_v5 = vrot.slane %v866_v21, 2  ;;  %v1233_v21 = vrot.slane %v2817_v17, 2  ;;  %v1394_v0 = vor.u32 %v1393_v60, %v1390_v58 }
  0x45   : > { %2179 = vmatprep.mubr.msk.bf16.mxu1 %vm2471_vm0, %v2470_v1 }
  0x46   : > { %2208 = vmatmul.mubr.msk.bf16.gmra.mxu0 %vm324_vm2, %v542_v16  ;;  %v869_v29 = vor.u32 %v868_v5, %v865_v25  ;;  %v2814_v16 = vcombine.low %v1184_v59, %v2810_v12  ;;  %v1051_v25 = vrot.slane %v1957_v22, 2  ;;  %v1052_v5 = vrot.slane %v2706_v18, 2  ;;  %v2448_v18 = vld [vmem:[%s3101_s1 + $0xf8] sm:$0xff]  }
  0x47   : > { %2211 = vmatprep.mubr.msk.bf16.mxu0 %vm2471_vm0, %v2470_v1 }
  0x48   : > { %v878_v33 = vsel %vm861_vm4, %v869_v29, %v877_v30  ;;  %v1232_v20 = vrot.slane %v2814_v16, 2  ;;  %v2856_v29 = vld [vmem:[%s2533_s28 + $0x20] sm:$0xff]   ;;  %v2456_v30 = vld [vmem:[%s3101_s1 + $0x108] sm:$0xff]   ;;  %v1055_v28 = vsel %vm1050_vm5, %v1052_v5, %v1054_v31 }
  0x4a   : > { %v1234_v23 = vsel %vm1050_vm5, %v1232_v20, %v1233_v21 }
  0x4c   : > { %2180 = vmatmul.mubr.msk.bf16.gmra.mxu1 %vm324_vm2, %v2539_v6  ;;  %v2433_v6 = vld [vmem:[%s3101_s1 + $0xd8] sm:$0xff]  }
  0x4d   : > { %2183 = vmatprep.mubr.msk.bf16.mxu1 %vm2471_vm0, %v2470_v1 }
  0x4e   : > { %2212 = vmatmul.mubr.msk.bf16.gmra.mxu0 %vm324_vm2, %v544_v24  ;;  %v2835_v24 = vld [vmem:[%s2533_s28 + $0x18] sm:$0xff]  }
  0x4f   : > { %2251 = vmatprep.mubr.msk.bf16.mxu0 %vm2471_vm0, %v2470_v1  ;;  %v1235_v15 = vrot.slane %v2835_v24, 2  ;;  %v1397_v2 = vshrl.u32 %v2835_v24, 16  ;;  %v1400_v3 = vshll.u32 %v2835_v24, 16 }
  0x51   : > { %v1236_v27 = vsel %vm1050_vm5, %v1233_v21, %v1235_v15  ;;  %v1399_v8 = vrot.slane %v1397_v2, 2  ;;  %v1402_v10 = vrot.slane %v1400_v3, 3 }
  0x53   : > { %v1403_v59 = vor.u32 %v1402_v10, %v1399_v8 }
  0x54   : > { %2184 = vmatmul.mubr.msk.bf16.gmra.mxu1 %vm324_vm2, %v2557_v14  ;;  %v2437_v14 = vld [vmem:[%s3101_s1 + $0xd0] sm:$0xff]  }
  0x55   : > { %2223 = vmatprep.mubr.msk.bf16.mxu1 %vm2471_vm0, %v2470_v1 }
  0x56   : > { %2252 = vmatmul.mubr.msk.bf16.vlgmr.msra.gmra.mxu0 %vm324_vm2, %v878_v33  ;;  %v1237_v33 = vrot.slane %v2856_v29, 2 }
  0x57   : > { %2300 = vmatpush3.bf16.msra.mxu0 %v2433_v6  ;;  %2255 = vmatprep.mubr.msk.bf16.mxu0 %vm2471_vm0, %v2470_v1  ;;  %v2459_v6 = vld [vmem:[%s3101_s1 + $0x100] sm:$0xff]  }
  0x58   : > { %2301 = vmatprep.subr.bf16.mxu0 %v2470_v1  ;;  %v1238_v35 = vsel %vm1050_vm5, %v1235_v15, %v1237_v33  ;;  %v1240_v56 = vsel %vm1050_vm5, %v1237_v33, %v1239_v39 }
  0x5b   : > { %2302 = vmatpush3.bf16.msra.mxu0 %v2437_v14  ;;  %v2457_v14 = vld [vmem:[%s2533_s28 + $0x30] ss:$0 sps:$4 sm:$0x33]  }
  0x5c   : > { %2224 = vmatmul.mubr.msk.bf16.vlgmr.msra.gmra.mxu1 %vm324_vm2, %v717_v41  ;;  %2303 = vmatprep.subr.bf16.mxu0 %v2470_v1  ;;  %v1058_v41 = vrot.slane %v2643_v57, 2  ;;  %v1380_v57 = vshrl.u32 %v2814_v16, 16 }
  0x5d   : > { %2272 = vmatpush3.bf16.msra.mxu1 %v2432_v42  ;;  %2227 = vmatprep.mubr.msk.bf16.mxu1 %vm2471_vm0, %v2470_v1  ;;  %v1241_v42 = vrot.slane %v2457_v14, 2 }
  0x5e   : > { %2256 = vmatmul.mubr.msk.bf16.gmra.mxu0 %vm324_vm2, %v887_v43  ;;  %2273 = vmatprep.subr.bf16.mxu1 %v2470_v1  ;;  %v1554_v43 = vld [vmem:[%s2533_s28 + $0x8] sm:$0x8]  ;;  %v1059_v44 = vsel %vm1050_vm5, %v1056_v37, %v1058_v41 }
  0x5f   : > { %2259 = vmatprep.mubr.msk.bf16.mxu0 %vm2471_vm0, %v2470_v1  ;;  %2304 = vmatpush3.bf16.msra.mxu0 %v2440_v46  ;;  %v1242_v45 = vsel %vm1050_vm5, %v1239_v39, %v1241_v42  ;;  %v2016_v46 = vcombine.low %v1554_v43, %v2810_v12  ;;  %v1406_v12 = vshrl.u32 %v2856_v29, 16 }
  0x60   : > { %2305 = vmatprep.subr.bf16.mxu0 %v2470_v1 }
  0x61   : > { %2274 = vmatpush3.bf16.msra.mxu1 %v2435_v48  ;;  %v1383_v48 = vshll.u32 %v2814_v16, 16  ;;  %v1568_v51 = vrot.slane %v2016_v46, 3  ;;  %v1573_v16 = vrot.slane %v2856_v29, 3  ;;  %v1408_v19 = vrot.slane %v1406_v12, 2 }
  0x62   : > { %2275 = vmatprep.subr.bf16.mxu1 %v2470_v1 }
  0x63   : > { %2306 = vmatpush3.bf16.msra.mxu0 %v2444_v52  ;;  %v1569_v52 = vrot.slane %v2817_v17, 3  ;;  %v1404_v17 = vsel %vm1378_vm7, %v1394_v0, %v1403_v59 }
  0x64   : > { %2228 = vmatmul.mubr.msk.bf16.gmra.mxu1 %vm324_vm2, %v719_v53  ;;  %2355 = vmatprep.subr.bf16.mxu0 %v2470_v1  ;;  %v1061_v53 = vsel %vm1050_vm5, %v1058_v41, %v1060_v47 }
  0x65   : > { %2231 = vmatprep.mubr.msk.bf16.mxu1 %vm2471_vm0, %v2470_v1  ;;  %2276 = vmatpush3.bf16.msra.mxu1 %v2439_v54  ;;  %v1382_v54 = vrot.slane %v1380_v57, 2  ;;  %v1570_v61 = vsel %vm1567_vm6, %v1568_v51, %v1569_v52 }
  0x66   : > { %2260 = vmatmul.mubr.msk.bf16.gmra.mxu0 %vm324_vm2, %v896_v55  ;;  %2277 = vmatprep.subr.bf16.mxu1 %v2470_v1  ;;  %v1385_v55 = vrot.slane %v1383_v48, 3 }
  0x67   : > { %2263 = vmatprep.mubr.msk.bf16.mxu0 %vm2471_vm0, %v2470_v1 }
  0x69   : > { %2278 = vmatpush3.bf16.msra.mxu1 %v2442_v62  ;;  %v1386_v62 = vor.u32 %v1385_v55, %v1382_v54 }
  0x6a   : > { %2327 = vmatprep.subr.bf16.mxu1 %v2470_v1 }
  0x6c   : > { %2232 = vmatmul.mubr.msk.bf16.gmra.mxu1 %vm324_vm2, %v721_v4  ;;  %v1571_v4 = vrot.slane %v2835_v24, 3  ;;  %v1575_v24 = vrot.slane %v2885_v36, 3 }
  0x6d   : > { %2235 = vmatprep.mubr.msk.bf16.mxu1 %vm2471_vm0, %v2470_v1 }
  0x6e   : > { %2264 = vmatmul.mubr.msk.bf16.gmra.mxu0 %vm324_vm2, %v905_v7  ;;  %v1395_v7 = vsel %vm1378_vm7, %v1386_v62, %v1394_v0  ;;  %v1572_v11 = vsel %vm1567_vm6, %v1569_v52, %v1571_v4  ;;  %v1574_v21 = vsel %vm1567_vm6, %v1571_v4, %v1573_v16 }
  0x6f   : > { %2267 = vmatprep.mubr.msk.bf16.mxu0 %vm2471_vm0, %v2470_v1 }
  0x74   : > { %2236 = vmatmul.mubr.msk.bf16.gmra.mxu1 %vm324_vm2, %v2660_v63  ;;  %v2449_v63 = vld [vmem:[%s3101_s1 + $0x118] sm:$0xff]  }
  0x75   : > { %2239 = vmatprep.mubr.msk.bf16.mxu1 %vm2471_vm0, %v2470_v1 }
  0x76   : > { %2268 = vmatmul.mubr.msk.bf16.gmra.mxu0 %vm324_vm2, %v914_v13  ;;  %v1409_v13 = vshll.u32 %v2856_v29, 16 }
  0x77   : > { %2307 = vmatprep.mubr.msk.bf16.mxu0 %vm2471_vm0, %v2470_v1 }
  0x78   : > { %v1411_v20 = vrot.slane %v1409_v13, 3 }
  0x7a   : > { %v1412_v22 = vor.u32 %v1411_v20, %v1408_v19 }
  0x7c   : > { %2240 = vmatmul.mubr.msk.bf16.gmra.mxu1 %vm324_vm2, %v2681_v9  ;;  %v1053_v9 = vsel %vm1050_vm5, %v1051_v25, %v1052_v5  ;;  %v1413_v25 = vsel %vm1378_vm7, %v1403_v59, %v1412_v22 }
  0x7d   : > { %2279 = vmatprep.mubr.msk.bf16.mxu1 %vm2471_vm0, %v2470_v1 }
  0x7e   : > { %2308 = vmatmul.mubr.msk.bf16.vlgmr.msra.gmra.mxu0 %vm324_vm2, %v1234_v23  ;;  %v1415_v23 = vshrl.u32 %v2885_v36, 16 }
  0x7f   : > { %2356 = vmatpush3.bf16.msra.mxu0 %v2449_v63  ;;  %2311 = vmatprep.mubr.msk.bf16.mxu0 %vm2471_vm0, %v2470_v1  ;;  %v1418_v63 = vshll.u32 %v2885_v36, 16 }
  0x80   : > { %2357 = vmatprep.subr.bf16.mxu0 %v2470_v1  ;;  %v1417_v5 = vrot.slane %v1415_v23, 2 }
  0x81   : > { %v1420_v15 = vrot.slane %v1418_v63, 3 }
  0x83   : > { %2358 = vmatpush3.bf16.msra.mxu0 %v2453_v26  ;;  %v2461_v26 = vld [vmem:[%s2533_s28 + $0x30] ss:$0 sps:$4 sm:$0x77]  }
  0x84   : > { %2280 = vmatmul.mubr.msk.bf16.vlgmr.msra.gmra.mxu1 %vm324_vm2, %v1053_v9  ;;  %2359 = vmatprep.subr.bf16.mxu0 %v2470_v1  ;;  %v1576_v9 = vsel %vm1567_vm6, %v1573_v16, %v1575_v24  ;;  %v1427_v29 = vshll.u32 %v2461_v26, 16 }
  0x85   : > { %2328 = vmatpush3.bf16.msra.mxu1 %v2448_v18  ;;  %2283 = vmatprep.mubr.msk.bf16.mxu1 %vm2471_vm0, %v2470_v1  ;;  %v1421_v18 = vor.u32 %v1420_v15, %v1417_v5 }
  0x86   : > { %2312 = vmatmul.mubr.msk.bf16.gmra.mxu0 %vm324_vm2, %v1236_v27  ;;  %2329 = vmatprep.subr.bf16.mxu1 %v2470_v1  ;;  %v1424_v27 = vshrl.u32 %v2461_v26, 16  ;;  %v1429_v33 = vrot.slane %v1427_v29, 3 }
  0x87   : > { %2315 = vmatprep.mubr.msk.bf16.mxu0 %vm2471_vm0, %v2470_v1  ;;  %2360 = vmatpush3.bf16.msra.mxu0 %v2456_v30  ;;  %v1577_v30 = vrot.slane %v2461_v26, 3  ;;  %v1422_v31 = vsel %vm1378_vm7, %v1412_v22, %v1421_v18 }
  0x88   : > { %2361 = vmatprep.subr.bf16.mxu0 %v2470_v1 }
  0x89   : > { %2330 = vmatpush3.bf16.msra.mxu1 %v2451_v32  ;;  %v1426_v32 = vrot.slane %v1424_v27, 2 }
  0x8a   : > { %2331 = vmatprep.subr.bf16.mxu1 %v2470_v1 }
  0x8b   : > { %2362 = vmatpush3.bf16.msra.mxu0 %v2459_v6  ;;  %v1578_v6 = vsel %vm1567_vm6, %v1575_v24, %v1577_v30 }
  0x8c   : > { %2284 = vmatmul.mubr.msk.bf16.gmra.mxu1 %vm324_vm2, %v1055_v28  ;;  %v1430_v28 = vor.u32 %v1429_v33, %v1426_v32 }
  0x8d   : > { %2287 = vmatprep.mubr.msk.bf16.mxu1 %vm2471_vm0, %v2470_v1  ;;  %2332 = vmatpush3.bf16.msra.mxu1 %v2455_v34 }
  0x8e   : > { %2316 = vmatmul.mubr.msk.bf16.gmra.mxu0 %vm324_vm2, %v1238_v35  ;;  %2333 = vmatprep.subr.bf16.mxu1 %v2470_v1  ;;  %v1431_v34 = vsel %vm1378_vm7, %v1421_v18, %v1430_v28 }
  0x8f   : > { %2319 = vmatprep.mubr.msk.bf16.mxu0 %vm2471_vm0, %v2470_v1 }
  0x91   : > { %2334 = vmatpush3.bf16.msra.mxu1 %v2458_v38 }
  0x94   : > { %2288 = vmatmul.mubr.msk.bf16.gmra.mxu1 %vm324_vm2, %v1057_v40 }
  0x95   : > { %2291 = vmatprep.mubr.msk.bf16.mxu1 %vm2471_vm0, %v2470_v1 }
  0x96   : > { %2320 = vmatmul.mubr.msk.bf16.gmra.mxu0 %vm324_vm2, %v1240_v56 }
  0x97   : > { %2323 = vmatprep.mubr.msk.bf16.mxu0 %vm2471_vm0, %v2470_v1 }
  0x9c   : > { %2292 = vmatmul.mubr.msk.bf16.gmra.mxu1 %vm324_vm2, %v1059_v44 }
  0x9d   : > { %2295 = vmatprep.mubr.msk.bf16.mxu1 %vm2471_vm0, %v2470_v1 }
  0x9e   : > { %2324 = vmatmul.mubr.msk.bf16.gmra.mxu0 %vm324_vm2, %v1242_v45 }
  0x9f   : > { %2363 = vmatprep.mubr.msk.bf16.mxu0 %vm2471_vm0, %v2470_v1 }
  0xa4   : > { %2296 = vmatmul.mubr.msk.bf16.gmra.mxu1 %vm324_vm2, %v1061_v53 }
  0xa5   : > { %2335 = vmatprep.mubr.msk.bf16.mxu1 %vm2471_vm0, %v2470_v1 }
  0xa6   : > { %2364 = vmatmul.mubr.msk.bf16.vlgmr.msra.gmra.mxu0 %vm324_vm2, %v1570_v61 }
  0xa7   : > { %2367 = vmatprep.mubr.msk.bf16.mxu0 %vm2471_vm0, %v2470_v1 }
  0xac   : > { %2336 = vmatmul.mubr.msk.bf16.vlgmr.msra.gmra.mxu1 %vm324_vm2, %v1395_v7 }
  0xad   : > { %2339 = vmatprep.mubr.msk.bf16.mxu1 %vm2471_vm0, %v2470_v1 }
  0xae   : > { %2368 = vmatmul.mubr.msk.bf16.gmra.mxu0 %vm324_vm2, %v1572_v11 }
  0xaf   : > { %2371 = vmatprep.mubr.msk.bf16.mxu0 %vm2471_vm0, %v2470_v1 }
  0xb4   : > { %2340 = vmatmul.mubr.msk.bf16.gmra.mxu1 %vm324_vm2, %v1404_v17 }
  0xb5   : > { %2343 = vmatprep.mubr.msk.bf16.mxu1 %vm2471_vm0, %v2470_v1 }
  0xb6   : > { %2372 = vmatmul.mubr.msk.bf16.gmra.mxu0 %vm324_vm2, %v1574_v21 }
  0xb7   : > { %2375 = vmatprep.mubr.msk.bf16.mxu0 %vm2471_vm0, %v2470_v1 }
  0xbc   : > { %2344 = vmatmul.mubr.msk.bf16.gmra.mxu1 %vm324_vm2, %v1413_v25 }
  0xbd   : > { %2347 = vmatprep.mubr.msk.bf16.mxu1 %vm2471_vm0, %v2470_v1 }
  0xbe   : > { %2376 = vmatmul.mubr.msk.bf16.gmra.mxu0 %vm324_vm2, %v1576_v9 }
  0xbf   : > { %2379 = vmatprep.mubr.msk.bf16.mxu0 %vm2471_vm0, %v2470_v1 }
  0xc4   : > { %2348 = vmatmul.mubr.msk.bf16.gmra.mxu1 %vm324_vm2, %v1422_v31 }
  0xc5   : > { %2351 = vmatprep.mubr.msk.bf16.mxu1 %vm2471_vm0, %v2470_v1 }
  0xc6   : > { %2380 = vmatmul.mubr.msk.bf16.gmra.mxu0 %vm324_vm2, %v1578_v6 }
  0xcc   : > { %2352 = vmatmul.mubr.msk.bf16.gmra.mxu1 %vm324_vm2, %v1431_v34 }
  0xdc   : > { %v390_v35 = vpop.f32.mrf.mxu1  ;;  %v374_v37 = vpop.f32.mrf.mxu0 }
  0xde   : > { %v2149_v36 = vpop.f32.mrf.mxu1  ;;  %v2141_v39 = vpop.f32.mrf.mxu0 }
  0xe0   : > { %v393_v38 = vpop.f32.mrf.mxu1  ;;  %v377_v56 = vpop.f32.mrf.mxu0 }
  0xe2   : > { %v2150_v40 = vpop.f32.mrf.mxu1  ;;  %v2142_v41 = vpop.f32.mrf.mxu0 }
  0xe4   : > { %v398_v14 = vpop.f32.mrf.mxu1  ;;  %v382_v43 = vpop.f32.mrf.mxu0 }
  0xe6   : > { %v2153_v42 = vpop.f32.mrf.mxu1  ;;  %v2145_v1 = vpop.f32.mrf.mxu0 }
  0xe8   : > { %v401_v44 = vpop.f32.mrf.mxu1  ;;  %v385_v46 = vpop.f32.mrf.mxu0 }
  0xea   : > { %v2154_v45 = vpop.f32.mrf.mxu1  ;;  %v2146_v57 = vpop.f32.mrf.mxu0 }
  0xec   : > { %v406_v47 = vpop.f32.mrf.mxu1 }
  0xed   : > { %v618_v49 = vpop.f32.mrf.mxu0 }
  0xee   : > { %v2157_v48 = vpop.f32.mrf.mxu1 }
  0xef   : > { %v2197_v51 = vpop.f32.mrf.mxu0 }
  0xf0   : > { %v409_v50 = vpop.f32.mrf.mxu1 }
  0xf1   : > { %v621_v53 = vpop.f32.mrf.mxu0 }
  0xf2   : > { %v2158_v52 = vpop.f32.mrf.mxu1 }
  0xf3   : > { %v2198_v55 = vpop.f32.mrf.mxu0 }
  0xf4   : > { %v481_v54 = vpop.f32.mrf.mxu1 }
  0xf5   : > { %v482_v58 = vadd.f32 %v481_v54, %v374_v37 }
  0xf6   : > { %v2169_v60 = vpop.f32.mrf.mxu1  ;;  %v626_v61 = vpop.f32.mrf.mxu0 }
  0xf7   : > { %v657_v62 = vadd.f32 %v618_v49, %v482_v58 }
  0xf8   : > { %v484_v0 = vpop.f32.mrf.mxu1  ;;  %v2201_v2 = vpop.f32.mrf.mxu0 }
  0xf9   : > { %v485_v3 = vadd.f32 %v484_v0, %v377_v56 }
  0xfa   : > { %v2170_v4 = vpop.f32.mrf.mxu1  ;;  %v629_v7 = vpop.f32.mrf.mxu0 }
  0xfb   : > { %v658_v8 = vadd.f32 %v621_v53, %v485_v3 }
  0xfc   : > { %v489_v10 = vpop.f32.mrf.mxu1  ;;  %v2202_v11 = vpop.f32.mrf.mxu0 }
  0xfd   : > { %v490_v59 = vadd.f32 %v489_v10, %v382_v43 }
  0xfe   : > { %v2173_v12 = vpop.f32.mrf.mxu1  ;;  %v634_v13 = vpop.f32.mrf.mxu0 }
  0xff   : > { %v659_v16 = vadd.f32 %v626_v61, %v490_v59 }
 0x100   : > { %v492_v17 = vpop.f32.mrf.mxu1  ;;  %v2205_v19 = vpop.f32.mrf.mxu0 }
 0x101   : > { %v493_v20 = vadd.f32 %v492_v17, %v385_v46 }
 0x102   : > { %v2174_v21 = vpop.f32.mrf.mxu1  ;;  %v637_v22 = vpop.f32.mrf.mxu0 }
 0x103   : > { %v660_v23 = vadd.f32 %v629_v7, %v493_v20 }
 0x104   : > { %v497_v63 = vpop.f32.mrf.mxu1  ;;  %v2206_v24 = vpop.f32.mrf.mxu0 }
 0x105   : > { %v498_v25 = vadd.f32 %v497_v63, %v390_v35 }
 0x106   : > { %v2177_v5 = vpop.f32.mrf.mxu1  ;;  %v642_v15 = vpop.f32.mrf.mxu0 }
 0x107   : > { %v661_v26 = vadd.f32 %v634_v13, %v498_v25 }
 0x108   : > { %v500_v9 = vpop.f32.mrf.mxu1  ;;  %v2209_v18 = vpop.f32.mrf.mxu0 }
 0x109   : > { %v501_v27 = vadd.f32 %v500_v9, %v393_v38 }
 0x10a   : > { %v2178_v29 = vpop.f32.mrf.mxu1  ;;  %v645_v30 = vpop.f32.mrf.mxu0 }
 0x10b   : > { %v662_v31 = vadd.f32 %v637_v22, %v501_v27 }
 0x10c   : > { %v505_v32 = vpop.f32.mrf.mxu1  ;;  %v2210_v33 = vpop.f32.mrf.mxu0 }
 0x10d   : > { %v506_v6 = vadd.f32 %v505_v32, %v398_v14 }
 0x10e   : > { %v2181_v28 = vpop.f32.mrf.mxu1  ;;  %v650_v34 = vpop.f32.mrf.mxu0 }
 0x10f   : > { %v663_v36 = vadd.f32 %v642_v15, %v506_v6 }
 0x110   : > { %v508_v37 = vpop.f32.mrf.mxu1  ;;  %v2213_v39 = vpop.f32.mrf.mxu0 }
 0x111   : > { %v509_v40 = vadd.f32 %v508_v37, %v401_v44 }
 0x112   : > { %v2182_v56 = vpop.f32.mrf.mxu1  ;;  %v653_v35 = vpop.f32.mrf.mxu0 }
 0x113   : > { %v664_v41 = vadd.f32 %v645_v30, %v509_v40 }
 0x114   : > { %v513_v42 = vpop.f32.mrf.mxu1  ;;  %v2214_v43 = vpop.f32.mrf.mxu0 }
 0x115   : > { %v514_v1 = vadd.f32 %v513_v42, %v406_v47 }
 0x116   : > { %v2185_v45 = vpop.f32.mrf.mxu1  ;;  %v988_v38 = vpop.f32.mrf.mxu0 }
 0x117   : > { %v665_v46 = vadd.f32 %v650_v34, %v514_v1 }
 0x118   : > { %v516_v57 = vpop.f32.mrf.mxu1  ;;  %v2253_v48 = vpop.f32.mrf.mxu0 }
 0x119   : > { %v517_v49 = vadd.f32 %v516_v57, %v409_v50 }
 0x11a   : > { %v2186_v51 = vpop.f32.mrf.mxu1  ;;  %v991_v14 = vpop.f32.mrf.mxu0 }
 0x11b   : > { %v666_v52 = vadd.f32 %v653_v35, %v517_v49 }
 0x11c   : > { %v799_v53 = vpop.f32.mrf.mxu1  ;;  %v2254_v54 = vpop.f32.mrf.mxu0 }
 0x11d   : > { %v838_v55 = vadd.f32 %v799_v53, %v657_v62 }
 0x11e   : > { %v2225_v58 = vpop.f32.mrf.mxu1  ;;  %v996_v44 = vpop.f32.mrf.mxu0 }
 0x11f   : > { %v2975_v60 = vadd.f32 %v988_v38, %v838_v55 }
 0x120   : > { %v802_v61 = vpop.f32.mrf.mxu1  ;;  %v2257_v0 = vpop.f32.mrf.mxu0 }
 0x121   : > { %v839_v2 = vadd.f32 %v802_v61, %v658_v8 }
 0x122   : > { %v2226_v47 = vpop.f32.mrf.mxu1  ;;  %v999_v3 = vpop.f32.mrf.mxu0 }
 0x123   : > { %v2977_v4 = vadd.f32 %v991_v14, %v839_v2 }
 0x124   : > { %v807_v7 = vpop.f32.mrf.mxu1  ;;  %v2258_v10 = vpop.f32.mrf.mxu0 }
 0x125   : > { %v840_v50 = vadd.f32 %v807_v7, %v659_v16 }
 0x126   : > { %v2229_v11 = vpop.f32.mrf.mxu1  ;;  %v1004_v59 = vpop.f32.mrf.mxu0 }
 0x127   : > { %v2979_v12 = vadd.f32 %v996_v44, %v840_v50 }
 0x128   : > { %v810_v13 = vpop.f32.mrf.mxu1  ;;  %v2261_v62 = vpop.f32.mrf.mxu0 }
 0x129   : > { %v841_v17 = vadd.f32 %v810_v13, %v660_v23 }
 0x12a   : > { %v2230_v19 = vpop.f32.mrf.mxu1  ;;  %v1007_v20 = vpop.f32.mrf.mxu0 }
 0x12b   : > { %v2981_v21 = vadd.f32 %v999_v3, %v841_v17 }
 0x12c   : > { %v815_v22 = vpop.f32.mrf.mxu1  ;;  %v2262_v8 = vpop.f32.mrf.mxu0 }
 0x12d   : > { %v842_v63 = vadd.f32 %v815_v22, %v661_v26 }
 0x12e   : > { %v2233_v24 = vpop.f32.mrf.mxu1  ;;  %v1012_v25 = vpop.f32.mrf.mxu0 }
 0x12f   : > { %v2983_v5 = vadd.f32 %v1004_v59, %v842_v63 }
 0x130   : > { %v818_v15 = vpop.f32.mrf.mxu1  ;;  %v2265_v16 = vpop.f32.mrf.mxu0 }
 0x131   : > { %v843_v9 = vadd.f32 %v818_v15, %v662_v31 }
 0x132   : > { %v2234_v18 = vpop.f32.mrf.mxu1  ;;  %v1015_v27 = vpop.f32.mrf.mxu0 }
 0x133   : > { %v2985_v29 = vadd.f32 %v1007_v20, %v843_v9 }
 0x134   : > { %v823_v30 = vpop.f32.mrf.mxu1  ;;  %v2266_v23 = vpop.f32.mrf.mxu0 }
 0x135   : > { %v844_v32 = vadd.f32 %v823_v30, %v663_v36 }
 0x136   : > { %v2237_v33 = vpop.f32.mrf.mxu1  ;;  %v1020_v6 = vpop.f32.mrf.mxu0 }
 0x137   : > { %v2987_v28 = vadd.f32 %v1012_v25, %v844_v32 }
 0x138   : > { %v826_v34 = vpop.f32.mrf.mxu1  ;;  %v2269_v26 = vpop.f32.mrf.mxu0 }
 0x139   : > { %v845_v37 = vadd.f32 %v826_v34, %v664_v41 }
 0x13a   : > { %v2238_v39 = vpop.f32.mrf.mxu1  ;;  %v1023_v40 = vpop.f32.mrf.mxu0 }
 0x13b   : > { %v2989_v56 = vadd.f32 %v1015_v27, %v845_v37 }
 0x13c   : > { %v831_v35 = vpop.f32.mrf.mxu1  ;;  %v2270_v31 = vpop.f32.mrf.mxu0 }
 0x13d   : > { %v846_v42 = vadd.f32 %v831_v35, %v665_v46 }
 0x13e   : > { %v2241_v43 = vpop.f32.mrf.mxu1  ;;  %v1316_v1 = vpop.f32.mrf.mxu0 }
 0x13f   : > { %v2991_v45 = vadd.f32 %v1020_v6, %v846_v42  ;;  %v3024_v42 = vld [vmem:[%s3102_s2] ss:$0 sm:$0xff] }
 0x140   : > { %v834_v38 = vpop.f32.mrf.mxu1  ;;  %v2309_v36 = vpop.f32.mrf.mxu0 }
 0x141   : > { %v847_v57 = vadd.f32 %v834_v38, %v666_v52 }
 0x142   : > { %v2242_v48 = vpop.f32.mrf.mxu1  ;;  %v1319_v49 = vpop.f32.mrf.mxu0 }
 0x143   : > { %v2993_v51 = vadd.f32 %v1023_v40, %v847_v57 }
 0x144   : > { %v1135_v14 = vpop.f32.mrf.mxu1  ;;  %v2310_v41 = vpop.f32.mrf.mxu0 }
 0x145   : > { %v1174_v32 = vadd.f32 %v1135_v14, %v2975_v60 }
 0x146   : > { %v2281_v53 = vpop.f32.mrf.mxu1  ;;  %v1324_v54 = vpop.f32.mrf.mxu0 }
 0x147   : > { %v1355_v39 = vadd.f32 %v1316_v1, %v1174_v32 }
 0x148   : > { %v1138_v55 = vpop.f32.mrf.mxu1  ;;  %v2313_v58 = vpop.f32.mrf.mxu0 }
 0x149   : > { %v1175_v37 = vadd.f32 %v1138_v55, %v2977_v4  ;;  %v3030_v4 = vld [vmem:[%s3103_s3] ss:$0 sm:$0xff] }
 0x14a   : > { %v2282_v44 = vpop.f32.mrf.mxu1  ;;  %v2995_v61 = vpop.f32.mrf.mxu0 }
 0x14b   : > { %v1356_v57 = vadd.f32 %v1319_v49, %v1175_v37 }
 0x14c   : > { %v1143_v46 = vpop.f32.mrf.mxu1  ;;  %v2314_v0 = vpop.f32.mrf.mxu0 }
 0x14d   : > { %v1176_v60 = vadd.f32 %v1143_v46, %v2979_v12 }
 0x14e   : > { %v2285_v2 = vpop.f32.mrf.mxu1  ;;  %v2997_v47 = vpop.f32.mrf.mxu0 }
 0x14f   : > { %v1357_v46 = vadd.f32 %v1324_v54, %v1176_v60 }
 0x150   : > { %v1146_v3 = vpop.f32.mrf.mxu1  ;;  %v2317_v52 = vpop.f32.mrf.mxu0 }
 0x151   : > { %v1177_v58 = vadd.f32 %v1146_v3, %v2981_v21 }
 0x152   : > { %v2286_v7 = vpop.f32.mrf.mxu1  ;;  %v2999_v10 = vpop.f32.mrf.mxu0 }
 0x154   : > { %v1151_v50 = vpop.f32.mrf.mxu1  ;;  %v2318_v11 = vpop.f32.mrf.mxu0 }
 0x155   : > { %v1178_v11 = vadd.f32 %v1151_v50, %v2983_v5 }
 0x156   : > { %v2289_v59 = vpop.f32.mrf.mxu1  ;;  %v3001_v13 = vpop.f32.mrf.mxu0 }
 0x158   : > { %v3003_v62 = vpop.f32.mrf.mxu1  ;;  %v2321_v17 = vpop.f32.mrf.mxu0 }
 0x15a   : > { %v2290_v19 = vpop.f32.mrf.mxu1  ;;  %v3005_v20 = vpop.f32.mrf.mxu0 }
 0x15b   : > { %v1358_v19 = vadd.f32 %v2995_v61, %v1177_v58 }
 0x15c   : > { %v3007_v22 = vpop.f32.mrf.mxu1  ;;  %v2322_v8 = vpop.f32.mrf.mxu0 }
 0x15e   : > { %v2293_v63 = vpop.f32.mrf.mxu1  ;;  %v3009_v24 = vpop.f32.mrf.mxu0 }
 0x160   : > { %v3011_v25 = vpop.f32.mrf.mxu1  ;;  %v2325_v15 = vpop.f32.mrf.mxu0 }
 0x162   : > { %v2294_v16 = vpop.f32.mrf.mxu1  ;;  %v3013_v9 = vpop.f32.mrf.mxu0 }
 0x164   : > { %v3015_v18 = vpop.f32.mrf.mxu1  ;;  %v2326_v27 = vpop.f32.mrf.mxu0 }
 0x165   : > { %v1359_v27 = vadd.f32 %v2997_v47, %v1178_v11  ;;  %v1180_v47 = vadd.f32 %v3007_v22, %v2987_v28 }
 0x166   : > { %v2297_v30 = vpop.f32.mrf.mxu1  ;;  %v1652_v23 = vpop.f32.mrf.mxu0 }
 0x167   : > { %v1361_v28 = vadd.f32 %v3001_v13, %v1180_v47  ;;  %v1182_v13 = vadd.f32 %v3015_v18, %v2991_v45 }
 0x168   : > { %v3018_v33 = vpop.f32.mrf.mxu1  ;;  %v2365_v6 = vpop.f32.mrf.mxu0 }
 0x169   : > { %v1363_v45 = vadd.f32 %v3009_v24, %v1182_v13 }
 0x16a   : > { %v2298_v34 = vpop.f32.mrf.mxu1  ;;  %v1655_v26 = vpop.f32.mrf.mxu0 }
 0x16c   : > { %v1505_v40 = vpop.f32.mrf.mxu1  ;;  %v2366_v35 = vpop.f32.mrf.mxu0 }
 0x16d   : > { %v1544_v31 = vadd.f32 %v1505_v40, %v1355_v39 }
 0x16e   : > { %v2337_v43 = vpop.f32.mrf.mxu1  ;;  %v1660_v38 = vpop.f32.mrf.mxu0 }
 0x16f   : > { %v1691_v36 = vadd.f32 %v1652_v23, %v1544_v31  ;;  %v1179_v23 = vadd.f32 %v3003_v62, %v2985_v29 }
 0x170   : > { %v1508_v1 = vpop.f32.mrf.mxu1  ;;  %v2369_v48 = vpop.f32.mrf.mxu0 }
 0x171   : > { %v1708_v14 = vmul.f32 %v3024_v42, %v1691_v36  ;;  %v1545_v41 = vadd.f32 %v1508_v1, %v1356_v57 }
 0x172   : > { %v2338_v53 = vpop.f32.mrf.mxu1  ;;  %v1663_v55 = vpop.f32.mrf.mxu0 }
 0x173   : > { %v1725_v44 = vadd.f32 %v3030_v4, %v1708_v14  ;;  %v1692_v12 = vadd.f32 %v1655_v26, %v1545_v41  ;;  %v1181_v41 = vadd.f32 %v3011_v25, %v2989_v56 }
 0x174   : > { %v1513_v49 = vpop.f32.mrf.mxu1  ;;  %v2370_v0 = vpop.f32.mrf.mxu0 }
 0x175   : > { %v1735_v2 = vmax.f32 %v1725_v44, 0.0  ;;  %v1709_v52 = vmul.f32 %v3024_v42, %v1692_v12  ;;  %v1546_v7 = vadd.f32 %v1513_v49, %v1357_v46 }
 0x176   : > { %v2341_v21 = vpop.f32.mrf.mxu1  ;;  %v1668_v3 = vpop.f32.mrf.mxu0 }
 0x177   : > { %v2040_v59 = vpack.c.bf16 %v1735_v2, %v1735_v2  ;;  %v1726_v54 = vadd.f32 %v3030_v4, %v1709_v52  ;;  %v1693_v17 = vadd.f32 %v1660_v38, %v1546_v7  ;;  %v1360_v38 = vadd.f32 %v2999_v10, %v1179_v23 }
 0x178   : > { %v1516_v8 = vpop.f32.mrf.mxu1  ;;  %v2373_v63 = vpop.f32.mrf.mxu0  ;;  %v1362_v7 = vadd.f32 %v3005_v20, %v1181_v41 }
 0x179   : > { %1786 = vst.msk [vmem:[%s3041_s16] sm:$0xf] %vm1785_vm8, %v2040_v59  ;;  %v1736_v5 = vmax.f32 %v1726_v54, 0.0  ;;  %v1710_v50 = vmul.f32 %v3024_v42, %v1693_v17  ;;  %v1547_v15 = vadd.f32 %v1516_v8, %v1358_v19  ;;  %v1183_v19 = vadd.f32 %v3018_v33, %v2993_v51 }
 0x17a   : > { %v2342_v16 = vpop.f32.mrf.mxu1  ;;  %v1671_v30 = vpop.f32.mrf.mxu0 }
 0x17b   : > { %v2041_v32 = vpack.c.bf16 %v1736_v5, %v1736_v5  ;;  %v1727_v6 = vadd.f32 %v3030_v4, %v1710_v50  ;;  %v1694_v61 = vadd.f32 %v1663_v55, %v1547_v15  ;;  %v1364_v51 = vadd.f32 %v3013_v9, %v1183_v19 }
 0x17c   : > { %v1521_v34 = vpop.f32.mrf.mxu1  ;;  %v2374_v26 = vpop.f32.mrf.mxu0 }
 0x17d   : > { %1787 = vst.msk [vmem:[%s3041_s16 + $0x4] sm:$0xf] %vm1785_vm8, %v2041_v32  ;;  %v1737_v37 = vmax.f32 %v1727_v6, 0.0  ;;  %v1711_v39 = vmul.f32 %v3024_v42, %v1694_v61  ;;  %v1548_v40 = vadd.f32 %v1521_v34, %v1359_v27 }
 0x17e   : > { %v2345_v35 = vpop.f32.mrf.mxu1  ;;  %v1676_v31 = vpop.f32.mrf.mxu0 }
 0x17f   : > { %v2042_v43 = vpack.c.bf16 %v1737_v37, %v1737_v37  ;;  %v1728_v29 = vadd.f32 %v3030_v4, %v1711_v39  ;;  %v1695_v62 = vadd.f32 %v1668_v3, %v1548_v40 }
 0x180   : > { %v1524_v60 = vpop.f32.mrf.mxu1  ;;  %v2377_v36 = vpop.f32.mrf.mxu0 }
 0x181   : > { %1788 = vst.msk [vmem:[%s3041_s16 + $0x8] sm:$0xf] %vm1785_vm8, %v2042_v43  ;;  %v1738_v57 = vmax.f32 %v1728_v29, 0.0  ;;  %v1712_v1 = vmul.f32 %v3024_v42, %v1695_v62  ;;  %v1549_v48 = vadd.f32 %v1524_v60, %v1360_v38 }
 0x182   : > { %v2346_v14 = vpop.f32.mrf.mxu1  ;;  %v1679_v22 = vpop.f32.mrf.mxu0 }
 0x183   : > { %v2043_v53 = vpack.c.bf16 %v1738_v57, %v1738_v57  ;;  %v1729_v55 = vadd.f32 %v3030_v4, %v1712_v1  ;;  %v1696_v10 = vadd.f32 %v1671_v30, %v1549_v48 }
 0x184   : > { %v1529_v58 = vpop.f32.mrf.mxu1  ;;  %v2378_v44 = vpop.f32.mrf.mxu0 }
 0x185   : > { %1789 = vst.msk [vmem:[%s3041_s16 + $0xc] sm:$0xf] %vm1785_vm8, %v2043_v53  ;;  %v1739_v12 = vmax.f32 %v1729_v55, 0.0  ;;  %v1713_v46 = vmul.f32 %v3024_v42, %v1696_v10  ;;  %v1550_v49 = vadd.f32 %v1529_v58, %v1361_v28 }
 0x186   : > { %v2349_v0 = vpop.f32.mrf.mxu1  ;;  %v1684_v2 = vpop.f32.mrf.mxu0 }
 0x187   : > { %v2044_v52 = vpack.c.bf16 %v1739_v12, %v1739_v12  ;;  %v1730_v56 = vadd.f32 %v3030_v4, %v1713_v46  ;;  %v1697_v25 = vadd.f32 %v1676_v31, %v1550_v49 }
 0x188   : > { %v1532_v11 = vpop.f32.mrf.mxu1  ;;  %v2381_v21 = vpop.f32.mrf.mxu0 }
 0x189   : > { %1790 = vst.msk [vmem:[%s3041_s16 + $0x10] sm:$0xf] %vm1785_vm8, %v2044_v52  ;;  %v1740_v3 = vmax.f32 %v1730_v56, 0.0  ;;  %v1714_v59 = vmul.f32 %v3024_v42, %v1697_v25  ;;  %v1551_v54 = vadd.f32 %v1532_v11, %v1362_v7 }
 0x18a   : > { %v2350_v17 = vpop.f32.mrf.mxu1  ;;  %v1687_v18 = vpop.f32.mrf.mxu0 }
 0x18b   : > { %v2045_v8 = vpack.c.bf16 %v1740_v3, %v1740_v3  ;;  %v1731_v20 = vadd.f32 %v3030_v4, %v1714_v59  ;;  %v1698_v63 = vadd.f32 %v1679_v22, %v1551_v54 }
 0x18c   : > { %v1537_v5 = vpop.f32.mrf.mxu1  ;;  %v2382_v50 = vpop.f32.mrf.mxu0 }
 0x18d   : > { %1791 = vst.msk [vmem:[%s3041_s16 + $0x14] sm:$0xf] %vm1785_vm8, %v2045_v8  ;;  %v1741_v15 = vmax.f32 %v1731_v20, 0.0  ;;  %v1715_v16 = vmul.f32 %v3024_v42, %v1698_v63  ;;  %v1552_v27 = vadd.f32 %v1537_v5, %v1363_v45 }
 0x18e   : > { %v2353_v30 = vpop.f32.mrf.mxu1 }
 0x18f   : > { %v2046_v24 = vpack.c.bf16 %v1741_v15, %v1741_v15  ;;  %v1732_v23 = vadd.f32 %v3030_v4, %v1715_v16  ;;  %v1699_v32 = vadd.f32 %v1684_v2, %v1552_v27 }
 0x190   : > { %v1540_v33 = vpop.f32.mrf.mxu1 }
 0x191   : > { %1792 = vst.msk [vmem:[%s3041_s16 + $0x18] sm:$0xf] %vm1785_vm8, %v2046_v24  ;;  %v1742_v6 = vmax.f32 %v1732_v23, 0.0  ;;  %v1716_v61 = vmul.f32 %v3024_v42, %v1699_v32  ;;  %v1553_v34 = vadd.f32 %v1540_v33, %v1364_v51 }
 0x192   : > { %v2354_v26 = vpop.f32.mrf.mxu1 }
 0x193   : > { %v2047_v37 = vpack.c.bf16 %v1742_v6, %v1742_v6  ;;  %v1733_v39 = vadd.f32 %v3030_v4, %v1716_v61  ;;  %v1700_v40 = vadd.f32 %v1687_v18, %v1553_v34 }
 0x195   : > { %1793 = vst.msk [vmem:[%s3041_s16 + $0x1c] sm:$0xf] %vm1785_vm8, %v2047_v37  ;;  %v1743_v47 = vmax.f32 %v1733_v39, 0.0  ;;  %v1717_v35 = vmul.f32 %v3024_v42, %v1700_v40 }
 0x197   : > { %v2048_v31 = vpack.c.bf16 %v1743_v47, %v1743_v47  ;;  %v1734_v9 = vadd.f32 %v3030_v4, %v1717_v35 }
 0x199   : > { %1794 = vst.msk [vmem:[%s3041_s16 + $0x20] sm:$0xf] %vm1785_vm8, %v2048_v31  ;;  %v1744_v43 = vmax.f32 %v1734_v9, 0.0 }
 0x19b   : > { %v2049_v29 = vpack.c.bf16 %v1744_v43, %v1744_v43 }
 0x19d   : > { %1795 = vst.msk [vmem:[%s3041_s16 + $0x24] sm:$0xf] %vm1785_vm8, %v2049_v29 }
 0x19e PF: > { %s14_s15 = sadd.s32 1, %s2468_s15  }
 0x19f   : > { %p11_p4 = scmp.ge.s32.totalorder %s14_s15, 4  }
 0x1a1   :  { %13 = sbr.rel (!%p11_p4) target bundleno = 1 (0x1), region = 74 }

// kernel: cross_relation_net.11
= control target key start
LH: loop header
LB: loop body
LE: loop exit
PB: predicated region body
PF: predicated region fallthrough
CT: control target
= control target key end

     0   :  { %s1621_s15 = smov 0   ;;  %s1827_s0 = inlined_call_operand.vmem [shape: bf16[2,42,64], index: 0, kind: input, shape index: {}]   ;;  %s1828_s1 = inlined_call_operand.vmem [shape: bf16[9,64,64], index: 1, kind: input, shape index: {}]   ;;  %s1829_s2 = inlined_call_operand.vmem [shape: f32[1,64], index: 2, kind: input, shape index: {}]   ;;  %s1830_s3 = inlined_call_operand.vmem [shape: f32[1,64], index: 3, kind: input, shape index: {}]   ;;  %s1831_s4 = inlined_call_operand.vmem [shape: bf16[2,24,64], index: 4, kind: output, shape index: {}]  }
   0x1 LB: > { %s1219_s16 = sadd.s32 4294967295, %s1594_s15   ;;  %p1223_p0 = scmp.ge.s32.totalorder %s1594_s15, 1  ;;  %s1594_s15 = sphi %s1621_s15, %s14_s15  }
   0x2   : > { %p162_p1 = scmp.lt.s32.totalorder %s1594_s15, 3 }
   0x4   : > { %p163_p2 = pnand %p1223_p0, %p162_p1 }
   0x5   : > { %p188_p3 = scmp.lt.s32.totalorder (!%p163_p2), %s1219_s16, 1 }
   0x6   : > { %166 = sbr.rel (%p163_p2) target bundleno = 302 (0x12e), region = 36 }
   0xb   : > { %v1539_v0 = vld [vmem:[%s1828_s1 + $0x38] sm:$0xff]   ;;  %v1541_v2 = vld [vmem:[%s1828_s1 + $0x30] sm:$0xff]   ;;  %s1833_s16 = smov (!%p188_p3, %s1219_s16), 1  ;;  %v1543_v4 = vld [vmem:[%s1828_s1 + $0x28] sm:$0xff]   ;;  %vm270_vm0 = vcmask 523264   ;;  %vm416_vm2 = vcmask 1046528  }
   0xc   : > { %v1540_v1 = vld [vmem:[%s1828_s1 + $0x18] sm:$0xff]   ;;  %1421 = vmatprep.subr.bf16.mxu0 %v1539_v0  ;;  %v1542_v3 = vld [vmem:[%s1828_s1 + $0x10] sm:$0xff]   ;;  %s1529_s27 = smul.u32 24, %s1833_s16  ;;  %v1544_v5 = vld [vmem:[%s1828_s1 + $0x8] sm:$0xff]   ;;  %vm230_vm1 = vsmask.f32 7424 }
   0xd   : > { %1433 = vmatprep.subr.bf16.mxu1 %v1540_v1  ;;  %1422 = vmatpush3.bf16.msra.mxu0 %v1539_v0  ;;  %v1545_v6 = vld [vmem:[%s1828_s1 + $0x20] sm:$0xff]   ;;  %v1550_v16 = vld [vmem:[%s1828_s1 + $0x58] sm:$0xff]   ;;  %v1552_v25 = vld [vmem:[%s1828_s1 + $0x50] sm:$0xff]   ;;  %vm518_vm3 = vcmask 1044480   ;;  %vm616_vm4 = vsmask.f32 4352 }
   0xe   : > { %1434 = vmatpush3.bf16.msra.mxu1 %v1540_v1  ;;  %1423 = vmatprep.subr.bf16.mxu0 %v1541_v2  ;;  %s1653_s6 = scalar_lea.vmem %s1827_s0, %s1529_s27  ;;  %v1546_v10 = vld [vmem:[%s1828_s1] sm:$0xff]   ;;  %v1551_v20 = vld [vmem:[%s1828_s1 + $0x78] sm:$0xff]   ;;  %v1553_v27 = vld [vmem:[%s1828_s1 + $0x70] sm:$0xff]   ;;  %vm830_vm5 = vcmask 1045504   ;;  %vm928_vm6 = vsmask.f32 5376 }
   0xf   : > { %1435 = vmatprep.subr.bf16.mxu1 %v1542_v3  ;;  %v199_v7 = vld [vmem:[%s1653_s6] sm:$0xf]  ;;  %v1660_v8 = vld [vmem:[%s1653_s6 + $0x4] sm:$0xf]  ;;  %v1663_v9 = vld [vmem:[%s1653_s6 + $0x8] sm:$0xf] }
  0x10   : > { %v210_v11 = vld [vmem:[%s1653_s6 + $0xc] sm:$0x1]  ;;  %v1234_v12 = vcombine.low %v199_v7, %v1660_v8  ;;  %v1242_v23 = vcombine.low %v1663_v9, %v1663_v9  ;;  %v403_v28 = vld [vmem:[%s1653_s6] sm:$0xe]  ;;  %v1559_v46 = vld [vmem:[%s1828_s1 + $0x98] sm:$0xff]   ;;  %v1303_v60 = vcombine.low %v1660_v8, %v1663_v9  ;;  %s1530_s26 = smul.u32 12, %s1833_s16 }
  0x11   : > { %1424 = vmatpush3.bf16.msra.mxu0 %v1541_v2  ;;  %v1671_v13 = vcombine.low %v1663_v9, %v210_v11  ;;  %v1257_v29 = vcombine.low %v403_v28, %v1660_v8  ;;  %v501_v31 = vld [vmem:[%s1653_s6] sm:$0x8]  ;;  %v502_v32 = vld [vmem:[%s1653_s6 + $0xc] sm:$0x7]  ;;  %v1562_v51 = vld [vmem:[%s1828_s1 + $0xb8] sm:$0xff]   ;;  %vm1160_vm7 = vcmask 519168  }
  0x12   : > { %1436 = vmatpush3.bf16.msra.mxu1 %v1542_v3  ;;  %1425 = vmatprep.subr.bf16.mxu0 %v1543_v4  ;;  %v232_v14 = vshrl.u32 %v1234_v12, 16  ;;  %v234_v15 = vshll.u32 %v1234_v12, 16  ;;  %v1554_v33 = vld [vmem:[%s1828_s1 + $0x48] sm:$0xff]   ;;  %v1272_v34 = vcombine.low %v501_v31, %v1660_v8  ;;  %v1273_v35 = vcombine.low %v1663_v9, %v502_v32  ;;  %v1556_v42 = vld [vmem:[%s1828_s1 + $0x40] sm:$0xff]   ;;  %v1563_v54 = vld [vmem:[%s1828_s1 + $0x90] sm:$0xff]   ;;  %s197_s29 = scalar_lea.vmem %s1831_s4, %s1530_s26 }
  0x13   : > { %1437 = vmatprep.subr.bf16.mxu1 %v1544_v5  ;;  %1441 = vmatprep.mubr.msk.bf16.mxu1 %vm270_vm0, %v1234_v12  ;;  %v239_v17 = vshll.u32 %v1671_v13, 16  ;;  %v243_v18 = vshrl.u32 %v1671_v13, 16  ;;  %v418_v30 = vrot.slane %v1671_v13, 1  ;;  %v1555_v36 = vld [vmem:[%s1828_s1 + $0x68] sm:$0xff]   ;;  %v417_v37 = vrot.slane %v1257_v29, 1  ;;  %v1557_v45 = vld [vmem:[%s1828_s1 + $0x60] sm:$0xff]  }
  0x14   : > { %v236_v19 = vrot.slane %v234_v15, 1  ;;  %v519_v38 = vrot.slane %v1272_v34, 3  ;;  %v520_v39 = vrot.slane %v1273_v35, 3  ;;  %v618_v41 = vshrl.u32 %v1272_v34, 16  ;;  %v1721_v47 = vld [vmem:[%s1653_s6 + $0xc] sm:$0xf] }
  0x15   : > { %1426 = vmatpush3.bf16.msra.mxu0 %v1543_v4  ;;  %v241_v21 = vrot.slane %v239_v17, 1  ;;  %v419_v40 = vsel %vm416_vm2, %v417_v37, %v418_v30  ;;  %v621_v44 = vshll.u32 %v1272_v34, 16  ;;  %v1288_v50 = vcombine.low %v1663_v9, %v1721_v47  ;;  %v1564_v55 = vld [vmem:[%s1828_s1 + $0xb0] sm:$0xff]   ;;  %v1565_v61 = vld [vmem:[%s1828_s1 + $0x88] sm:$0xff]   ;;  %v807_v62 = vld [vmem:[%s1653_s6 + $0x4] sm:$0xc] }
  0x16   : > { %1438 = vmatpush3.bf16.msra.mxu1 %v1544_v5  ;;  %1427 = vmatprep.subr.bf16.mxu0 %v1545_v6  ;;  %v237_v22 = vor.u32 %v236_v19, %v232_v14  ;;  %v521_v43 = vsel %vm518_vm3, %v519_v38, %v520_v39  ;;  %v620_v48 = vrot.slane %v618_v41, 3  ;;  %v1566_v63 = vld [vmem:[%s1828_s1 + $0xa8] sm:$0xff]   ;;  %v915_v4 = vld [vmem:[%s1653_s6 + $0x10] sm:$0x7]  ;;  %v1567_v11 = vld [vmem:[%s1828_s1 + $0x80] sm:$0xff]  }
  0x17   : > { %1439 = vmatprep.subr.bf16.mxu1 %v1546_v10  ;;  %v245_v24 = vor.u32 %v243_v18, %v241_v21  ;;  %v623_v49 = vrot.slane %v621_v44, 4  ;;  %v626_v52 = vshrl.u32 %v1288_v50, 16  ;;  %v629_v53 = vshll.u32 %v1288_v50, 16  ;;  %v1746_v1 = vld [vmem:[%s1653_s6 + $0x8] sm:$0xf]  ;;  %v1568_v12 = vld [vmem:[%s1828_s1 + $0xa0] sm:$0xff]  }
  0x18   : > { %v242_v26 = vsel %vm230_vm1, %v237_v22, %v241_v21  ;;  %v809_v2 = vld [vmem:[%s1653_s6 + $0xc] sm:$0xf]  ;;  %v1319_v3 = vcombine.low %v807_v62, %v1746_v1  ;;  %v1570_v18 = vld [vmem:[%s1828_s1 + $0xd8] sm:$0xff]   ;;  %v1027_v31 = vld [vmem:[%s1653_s6 + $0x4] sm:$0x8] }
  0x19   : > { %1428 = vmatpush3.bf16.msra.mxu0 %v1545_v6  ;;  %1429 = vmatprep.mubr.msk.bf16.mxu0 %vm270_vm0, %v242_v26  ;;  %v624_v56 = vor.u32 %v623_v49, %v620_v48  ;;  %v628_v57 = vrot.slane %v626_v52, 3  ;;  %v631_v58 = vrot.slane %v629_v53, 4  ;;  %v1753_v5 = vcombine.low %v809_v2, %v915_v4  ;;  %v810_v6 = vld [vmem:[%s1653_s6 + $0x10] sm:$0x3]  ;;  %v1573_v19 = vld [vmem:[%s1828_s1 + $0xf8] sm:$0xff]   ;;  %v1576_v29 = vld [vmem:[%s1828_s1 + $0xc8] sm:$0xff]  }
  0x1a   : > { %1440 = vmatpush3.bf16.msra.mxu1 %v1546_v10  ;;  %1445 = vmatprep.subr.bf16.mxu0 %v1550_v16  ;;  %v930_v7 = vshrl.u32 %v1319_v3, 16  ;;  %v933_v8 = vshll.u32 %v1319_v3, 16  ;;  %v1320_v13 = vcombine.low %v809_v2, %v810_v6  ;;  %v831_v21 = vrot.slane %v1319_v3, 2  ;;  %v1575_v26 = vld [vmem:[%s1828_s1 + $0xf0] sm:$0xff]   ;;  %v1578_v32 = vld [vmem:[%s1828_s1 + $0xc0] sm:$0xff]   ;;  %v1583_v35 = vld [vmem:[%s1828_s1 + $0x118] sm:$0xff]  }
  0x1b   : > { %1457 = vmatprep.subr.bf16.mxu1 %v1551_v20  ;;  %v632_v59 = vor.u32 %v631_v58, %v628_v57  ;;  %v938_v9 = vshrl.u32 %v1753_v5, 16  ;;  %v941_v10 = vshll.u32 %v1753_v5, 16  ;;  %v1350_v34 = vcombine.low %v1027_v31, %v1746_v1  ;;  %v1584_v38 = vld [vmem:[%s1828_s1 + $0x110] sm:$0xff]   ;;  %v1586_v41 = vld [vmem:[%s1828_s1 + $0x100] sm:$0xff]  }
  0x1c   : > { %1430 = vmatmul.mubr.msk.bf16.vlgmr.msra.gmra.mxu0 %vm270_vm0, %v245_v24  ;;  %v932_v14 = vrot.slane %v930_v7, 2  ;;  %v935_v15 = vrot.slane %v933_v8, 3  ;;  %v832_v22 = vrot.slane %v1320_v13, 2  ;;  %v1041_v37 = vrot.slane %v1753_v5, 3 }
  0x1d   : > { %1442 = vmatmul.mubr.msk.bf16.vlgmr.msra.gmra.mxu1 %vm270_vm0, %v1242_v23  ;;  %1446 = vmatpush3.bf16.msra.mxu0 %v1550_v16  ;;  %v633_v0 = vsel %vm616_vm4, %v624_v56, %v632_v59  ;;  %v940_v16 = vrot.slane %v938_v9, 2  ;;  %v943_v17 = vrot.slane %v941_v10, 3 }
  0x1e   : > { %1458 = vmatpush3.bf16.msra.mxu1 %v1551_v20  ;;  %1447 = vmatprep.subr.bf16.mxu0 %v1552_v25  ;;  %v1304_v20 = vcombine.low %v1721_v47, %v1721_v47  ;;  %v936_v23 = vor.u32 %v935_v15, %v932_v14 }
  0x1f   : > { %1459 = vmatprep.subr.bf16.mxu1 %v1553_v27  ;;  %1453 = vmatprep.mubr.msk.bf16.mxu0 %vm270_vm0, %v419_v40  ;;  %v944_v24 = vor.u32 %v943_v17, %v940_v16  ;;  %v1585_v40 = vld [vmem:[%s1828_s1 + $0x108] sm:$0xff]  }
  0x20   : > { %1465 = vmatprep.mubr.msk.bf16.mxu1 %vm270_vm0, %v521_v43 }
  0x21   : > { %1448 = vmatpush3.bf16.msra.mxu0 %v1552_v25  ;;  %v1574_v25 = vld [vmem:[%s1828_s1 + $0xd0] sm:$0xff]   ;;  %v945_v28 = vsel %vm928_vm6, %v936_v23, %v944_v24 }
  0x22   : > { %1460 = vmatpush3.bf16.msra.mxu1 %v1553_v27  ;;  %1449 = vmatprep.subr.bf16.mxu0 %v1554_v33  ;;  %v833_v27 = vsel %vm830_vm5, %v831_v21, %v832_v22 }
  0x23   : > { %1461 = vmatprep.subr.bf16.mxu1 %v1555_v36 }
  0x25   : > { %1450 = vmatpush3.bf16.msra.mxu0 %v1554_v33  ;;  %v1579_v33 = vld [vmem:[%s1828_s1 + $0xe0] sm:$0xff]  }
  0x26   : > { %1462 = vmatpush3.bf16.msra.mxu1 %v1555_v36  ;;  %1451 = vmatprep.subr.bf16.mxu0 %v1556_v42  ;;  %v1040_v36 = vrot.slane %v1350_v34, 3 }
  0x27   : > { %1463 = vmatprep.subr.bf16.mxu1 %v1557_v45 }
  0x29   : > { %1452 = vmatpush3.bf16.msra.mxu0 %v1556_v42 }
  0x2a   : > { %1464 = vmatpush3.bf16.msra.mxu1 %v1557_v45  ;;  %1469 = vmatprep.subr.bf16.mxu0 %v1559_v46 }
  0x2b   : > { %1481 = vmatprep.subr.bf16.mxu1 %v1562_v51 }
  0x2c   : > { %1454 = vmatmul.mubr.msk.bf16.vlgmr.msra.gmra.mxu0 %vm270_vm0, %v418_v30  ;;  %v1577_v30 = vld [vmem:[%s1828_s1 + $0xe8] sm:$0xff]  }
  0x2d   : > { %1466 = vmatmul.mubr.msk.bf16.vlgmr.msra.gmra.mxu1 %vm270_vm0, %v520_v39  ;;  %1470 = vmatpush3.bf16.msra.mxu0 %v1559_v46  ;;  %v1042_v39 = vsel %vm518_vm3, %v1040_v36, %v1041_v37 }
  0x2e   : > { %1482 = vmatpush3.bf16.msra.mxu1 %v1562_v51  ;;  %1471 = vmatprep.subr.bf16.mxu0 %v1563_v54 }
  0x2f   : > { %1483 = vmatprep.subr.bf16.mxu1 %v1564_v55  ;;  %1477 = vmatprep.mubr.msk.bf16.mxu0 %vm270_vm0, %v633_v0 }
  0x30   : > { %1489 = vmatprep.mubr.msk.bf16.mxu1 %vm270_vm0, %v1303_v60 }
  0x31   : > { %1472 = vmatpush3.bf16.msra.mxu0 %v1563_v54 }
  0x32   : > { %1484 = vmatpush3.bf16.msra.mxu1 %v1564_v55  ;;  %1473 = vmatprep.subr.bf16.mxu0 %v1565_v61 }
  0x33   : > { %1485 = vmatprep.subr.bf16.mxu1 %v1566_v63 }
  0x35   : > { %1474 = vmatpush3.bf16.msra.mxu0 %v1565_v61 }
  0x36   : > { %1486 = vmatpush3.bf16.msra.mxu1 %v1566_v63  ;;  %1475 = vmatprep.subr.bf16.mxu0 %v1567_v11 }
  0x37   : > { %1487 = vmatprep.subr.bf16.mxu1 %v1568_v12 }
  0x39   : > { %1476 = vmatpush3.bf16.msra.mxu0 %v1567_v11 }
  0x3a   : > { %1488 = vmatpush3.bf16.msra.mxu1 %v1568_v12  ;;  %1493 = vmatprep.subr.bf16.mxu0 %v1570_v18 }
  0x3b   : > { %1505 = vmatprep.subr.bf16.mxu1 %v1573_v19 }
  0x3c   : > { %1478 = vmatmul.mubr.msk.bf16.vlgmr.msra.gmra.mxu0 %vm270_vm0, %v632_v59 }
  0x3d   : > { %1490 = vmatmul.mubr.msk.bf16.vlgmr.msra.gmra.mxu1 %vm270_vm0, %v1304_v20  ;;  %1494 = vmatpush3.bf16.msra.mxu0 %v1570_v18 }
  0x3e   : > { %1506 = vmatpush3.bf16.msra.mxu1 %v1573_v19  ;;  %1495 = vmatprep.subr.bf16.mxu0 %v1574_v25 }
  0x3f   : > { %1507 = vmatprep.subr.bf16.mxu1 %v1575_v26  ;;  %1501 = vmatprep.mubr.msk.bf16.mxu0 %vm270_vm0, %v833_v27 }
  0x40   : > { %1513 = vmatprep.mubr.msk.bf16.mxu1 %vm270_vm0, %v945_v28  ;;  %v1357_v28 = vld [vmem:[%s1829_s2] ss:$0 sm:$0xff] }
  0x41   : > { %1496 = vmatpush3.bf16.msra.mxu0 %v1574_v25 }
  0x42   : > { %1508 = vmatpush3.bf16.msra.mxu1 %v1575_v26  ;;  %1497 = vmatprep.subr.bf16.mxu0 %v1576_v29 }
  0x43   : > { %1509 = vmatprep.subr.bf16.mxu1 %v1577_v30 }
  0x45   : > { %1498 = vmatpush3.bf16.msra.mxu0 %v1576_v29 }
  0x46   : > { %1510 = vmatpush3.bf16.msra.mxu1 %v1577_v30  ;;  %1499 = vmatprep.subr.bf16.mxu0 %v1578_v32 }
  0x47   : > { %1511 = vmatprep.subr.bf16.mxu1 %v1579_v33 }
  0x49   : > { %1500 = vmatpush3.bf16.msra.mxu0 %v1578_v32 }
  0x4a   : > { %1512 = vmatpush3.bf16.msra.mxu1 %v1579_v33  ;;  %1517 = vmatprep.subr.bf16.mxu0 %v1583_v35  ;;  %v1358_v33 = vld [vmem:[%s1830_s3] ss:$0 sm:$0xff] }
  0x4c   : > { %1502 = vmatmul.mubr.msk.bf16.vlgmr.msra.gmra.mxu0 %vm270_vm0, %v832_v22 }
  0x4d   : > { %1514 = vmatmul.mubr.msk.bf16.vlgmr.msra.gmra.mxu1 %vm270_vm0, %v944_v24  ;;  %1518 = vmatpush3.bf16.msra.mxu0 %v1583_v35 }
  0x4e   : > { %1525 = vmatprep.mubr.msk.bf16.mxu0 %vm270_vm0, %v1042_v39  ;;  %1519 = vmatprep.subr.bf16.mxu0 %v1584_v38 }
  0x51   : > { %1520 = vmatpush3.bf16.msra.mxu0 %v1584_v38 }
  0x52   : > { %1521 = vmatprep.subr.bf16.mxu0 %v1585_v40 }
  0x55   : > { %1522 = vmatpush3.bf16.msra.mxu0 %v1585_v40 }
  0x56   : > { %1523 = vmatprep.subr.bf16.mxu0 %v1586_v41 }
  0x59   : > { %1524 = vmatpush3.bf16.msra.mxu0 %v1586_v41 }
  0x5c   : > { %1526 = vmatmul.mubr.msk.bf16.vlgmr.msra.gmra.mxu0 %vm270_vm0, %v1041_v37 }
  0xdc   : > { %v1431_v42 = vpop.f32.mrf.mxu0 }
  0xdd   : > { %v1443_v43 = vpop.f32.mrf.mxu1 }
  0xde   : > { %v311_v44 = vpop.f32.mrf.mxu0  ;;  %v398_v0 = vadd.f32 %v1443_v43, %v1431_v42 }
  0xdf   : > { %v389_v45 = vpop.f32.mrf.mxu1 }
  0xe0   : > { %v1432_v46 = vpop.f32.mrf.mxu0  ;;  %v390_v3 = vadd.f32 %v389_v45, %v311_v44 }
  0xe1   : > { %v1444_v47 = vpop.f32.mrf.mxu1 }
  0xe2   : > { %v314_v48 = vpop.f32.mrf.mxu0 }
  0xe3   : > { %v392_v49 = vpop.f32.mrf.mxu1 }
  0xe4   : > { %v393_v10 = vadd.f32 %v392_v49, %v314_v48 }
  0xec   : > { %v1455_v50 = vpop.f32.mrf.mxu0 }
  0xed   : > { %v1467_v51 = vpop.f32.mrf.mxu1  ;;  %v500_v4 = vadd.f32 %v1455_v50, %v398_v0 }
  0xee   : > { %v484_v52 = vpop.f32.mrf.mxu0 }
  0xef   : > { %v586_v53 = vpop.f32.mrf.mxu1  ;;  %v498_v7 = vadd.f32 %v484_v52, %v390_v3  ;;  %v602_v11 = vadd.f32 %v1467_v51, %v500_v4 }
  0xf0   : > { %v1456_v54 = vpop.f32.mrf.mxu0 }
  0xf1   : > { %v1468_v55 = vpop.f32.mrf.mxu1  ;;  %v600_v14 = vadd.f32 %v586_v53, %v498_v7 }
  0xf2   : > { %v487_v56 = vpop.f32.mrf.mxu0 }
  0xf3   : > { %v589_v57 = vpop.f32.mrf.mxu1  ;;  %v499_v15 = vadd.f32 %v487_v56, %v393_v10 }
  0xf5   : > { %v601_v18 = vadd.f32 %v589_v57, %v499_v15 }
  0xfc   : > { %v1479_v58 = vpop.f32.mrf.mxu0 }
  0xfd   : > { %v1491_v59 = vpop.f32.mrf.mxu1  ;;  %v714_v16 = vadd.f32 %v1479_v58, %v602_v11 }
  0xfe   : > { %v698_v60 = vpop.f32.mrf.mxu0 }
  0xff   : > { %v790_v61 = vpop.f32.mrf.mxu1  ;;  %v712_v17 = vadd.f32 %v698_v60, %v600_v14  ;;  %v806_v19 = vadd.f32 %v1491_v59, %v714_v16 }
 0x100   : > { %v1480_v62 = vpop.f32.mrf.mxu0 }
 0x101   : > { %v1492_v63 = vpop.f32.mrf.mxu1  ;;  %v804_v20 = vadd.f32 %v790_v61, %v712_v17 }
 0x102   : > { %v701_v1 = vpop.f32.mrf.mxu0 }
 0x103   : > { %v793_v2 = vpop.f32.mrf.mxu1  ;;  %v713_v21 = vadd.f32 %v701_v1, %v601_v18 }
 0x105   : > { %v805_v25 = vadd.f32 %v793_v2, %v713_v21 }
 0x10c   : > { %v1503_v5 = vpop.f32.mrf.mxu0 }
 0x10d   : > { %v1515_v6 = vpop.f32.mrf.mxu1  ;;  %v914_v22 = vadd.f32 %v1503_v5, %v806_v19 }
 0x10e   : > { %v898_v8 = vpop.f32.mrf.mxu0 }
 0x10f   : > { %v1010_v9 = vpop.f32.mrf.mxu1  ;;  %v912_v23 = vadd.f32 %v898_v8, %v804_v20  ;;  %v1026_v26 = vadd.f32 %v1515_v6, %v914_v22 }
 0x110   : > { %v1504_v12 = vpop.f32.mrf.mxu0 }
 0x111   : > { %v1516_v13 = vpop.f32.mrf.mxu1  ;;  %v1024_v29 = vadd.f32 %v1010_v9, %v912_v23 }
 0x112   : > { %v901_v24 = vpop.f32.mrf.mxu0 }
 0x113   : > { %v913_v30 = vadd.f32 %v901_v24, %v805_v25  ;;  %v1013_v32 = vpop.f32.mrf.mxu1 }
 0x115   : > { %v1025_v38 = vadd.f32 %v1013_v32, %v913_v30 }
 0x11c   : > { %v1527_v27 = vpop.f32.mrf.mxu0 }
 0x11d   : > { %v1123_v31 = vadd.f32 %v1527_v27, %v1026_v26 }
 0x11e   : > { %v1107_v34 = vpop.f32.mrf.mxu0 }
 0x11f   : > { %v1133_v35 = vmul.f32 %v1357_v28, %v1123_v31  ;;  %v1121_v36 = vadd.f32 %v1107_v34, %v1024_v29 }
 0x120   : > { %v1528_v37 = vpop.f32.mrf.mxu0 }
 0x121   : > { %v1143_v39 = vadd.f32 %v1358_v33, %v1133_v35  ;;  %v1131_v40 = vmul.f32 %v1357_v28, %v1121_v36 }
 0x122   : > { %v1110_v41 = vpop.f32.mrf.mxu0 }
 0x123   : > { %v1146_v42 = vmax.f32 %v1143_v39, 0.0  ;;  %v1141_v43 = vadd.f32 %v1358_v33, %v1131_v40  ;;  %v1122_v44 = vadd.f32 %v1110_v41, %v1025_v38 }
 0x125   : > { %v1366_v45 = vpack.c.bf16 %v1146_v42, %v1146_v42  ;;  %v1144_v46 = vmax.f32 %v1141_v43, 0.0  ;;  %v1132_v47 = vmul.f32 %v1357_v28, %v1122_v44 }
 0x127   : > { %1163 = vst.msk [vmem:[%s197_s29 + $0x8] sm:$0xf] %vm1160_vm7, %v1366_v45  ;;  %v1364_v48 = vpack.c.bf16 %v1144_v46, %v1144_v46  ;;  %v1142_v49 = vadd.f32 %v1358_v33, %v1132_v47 }
 0x129   : > { %1161 = vst.msk [vmem:[%s197_s29] sm:$0xf] %vm1160_vm7, %v1364_v48  ;;  %v1145_v50 = vmax.f32 %v1142_v49, 0.0 }
 0x12b   : > { %v1365_v51 = vpack.c.bf16 %v1145_v50, %v1145_v50 }
 0x12d   : > { %1162 = vst.msk [vmem:[%s197_s29 + $0x4] sm:$0xf] %vm1160_vm7, %v1365_v51 }
 0x12e PF: > { %s14_s15 = sadd.s32 1, %s1594_s15  }
 0x12f   : > { %p11_p4 = scmp.ge.s32.totalorder %s14_s15, 4  }
 0x131   :  { %13 = sbr.rel (!%p11_p4) target bundleno = 1 (0x1), region = 74 }

// kernel: cross_relation_net.9
= control target key start
LH: loop header
LB: loop body
LE: loop exit
PB: predicated region body
PF: predicated region fallthrough
CT: control target
= control target key end

     0   :  { %s4945_s15 = smov 0   ;;  %s6410_s0 = inlined_call_operand.vmem [shape: bf16[2,342,3], index: 0, kind: input, shape index: {}]   ;;  %s6411_s1 = inlined_call_operand.vmem [shape: bf16[9,3,64], index: 1, kind: input, shape index: {}]   ;;  %s6412_s2 = inlined_call_operand.vmem [shape: f32[1,64], index: 2, kind: input, shape index: {}]   ;;  %s6413_s3 = inlined_call_operand.vmem [shape: f32[1,64], index: 3, kind: input, shape index: {}]   ;;  %s6414_s4 = inlined_call_operand.vmem [shape: bf16[2,288,64], index: 4, kind: output, shape index: {}]  }
   0x1 LB: > { %s4008_s16 = sadd.s32 4294967295, %s4917_s15   ;;  %p4012_p0 = scmp.ge.s32.totalorder %s4917_s15, 1  ;;  %s4917_s15 = sphi %s4945_s15, %s14_s15  }
   0x2   : > { %p162_p1 = scmp.lt.s32.totalorder %s4917_s15, 3 }
   0x4   : > { %p163_p2 = pnand %p4012_p0, %p162_p1 }
   0x6   : > { %166 = sbr.rel (%p163_p2) target bundleno = 558 (0x22e), region = 36 }
   0xb   : > { %v4015_v0 = vld [vmem:[%s6411_s1 + $0x2] sm:$0x3]  ;;  %vm536_vm0 = vcmask 1040384   ;;  %vm537_vm1 = vcmask 1041408   ;;  %p188_p3 = scmp.lt.s32.totalorder %s4008_s16, 1  ;;  %v4919_v1 = vmov 65535  }
   0xc   : > { %v538_v2 = vsel %vm536_vm0, 4294967295, %v4919_v1  ;;  %v4071_v3 = vld [vmem:[%s6411_s1 + $0x4] sm:$0x3]  ;;  %v235_v5 = vld [vmem:[%s6411_s1] sm:$0x3]  ;;  %vm481_vm3 = vcmask 23552  }
   0xd   : > { %v4959_v4 = vsel %vm537_vm1, %v538_v2, 0  ;;  %s6454_s16 = smov (!%p188_p3, %s4008_s16), 1  ;;  %vm332_vm2 = vsmask.f32 7424  ;;  %v4091_v13 = vld [vmem:[%s6411_s1 + $0x6] sm:$0x3] }
   0xe   : > { %v541_v6 = vand.u32 %v4015_v0, %v4959_v4  ;;  %v4968_v7 = vand.u32 %v4071_v3, %v4959_v4  ;;  %v4971_v8 = vand.u32 %v4959_v4, %v235_v5  ;;  %s4838_s23 = smul.u32 172, %s6454_s16  ;;  %v4129_v14 = vld [vmem:[%s6411_s1 + $0x8] sm:$0x3]  ;;  %v5019_v30 = vand.u32 %v4091_v13, %v4959_v4 }
   0xf   : > { %v5027_v35 = vand.u32 %v4129_v14, %v4959_v4  ;;  %vm942_vm4 = vcmask 1046528   ;;  %vm2142_vm5 = vcmask 1045504   ;;  %vm1695_vm6 = vsmask.f32 6400  ;;  %s4839_s19 = smul.u32 144, %s6454_s16 }
  0x10   : > { %4494 = vmatprep.subr.bf16.mxu0 %v541_v6  ;;  %4836 = vmatprep.subr.bf16.mxu1 %v541_v6  ;;  %s4977_s26 = scalar_lea.vmem %s6410_s0, %s4838_s23  ;;  %vm3342_vm7 = vcmask 1044480   ;;  %vm2895_vm8 = vsmask.f32 5376  ;;  %vm3916_vm9 = vcmask 519168  }
  0x11   : > { %4495 = vmatpush3.bf16.msra.mxu0 %v541_v6  ;;  %4837 = vmatpush3.bf16.msra.mxu1 %v541_v6  ;;  %v199_v9 = vld [vmem:[%s4977_s26] sm:$0xf]  ;;  %v4981_v10 = vld [vmem:[%s4977_s26 + $0x4] sm:$0xf]  ;;  %v4989_v12 = vld [vmem:[%s4977_s26 + $0x8] sm:$0xff]   ;;  %s6235_s21 = scalar_lea.vmem %s6414_s4, %s4839_s19 }
  0x12   : > { %4570 = vmatprep.subr.bf16.mxu0 %v4968_v7  ;;  %4532 = vmatprep.subr.bf16.mxu1 %v4971_v8  ;;  %v4986_v11 = vcombine.low %v199_v9, %v4981_v10  ;;  %v341_v17 = vshll.u32 %v4989_v12, 16  ;;  %v345_v18 = vshrl.u32 %v4989_v12, 16  ;;  %v5002_v19 = vld [vmem:[%s4977_s26 + $0x50] sm:$0xff]   ;;  %v5005_v20 = vld [vmem:[%s4977_s26 + $0x58] sm:$0xff]   ;;  %v5016_v29 = vld [vmem:[%s4977_s26 + $0x60] sm:$0xff]  }
  0x13   : > { %v5008_v21 = vld [vmem:[%s4977_s26 + $0x10] sm:$0xff]   ;;  %v413_v24 = vshll.u32 %v5002_v19, 16  ;;  %v417_v25 = vshrl.u32 %v5002_v19, 16  ;;  %v421_v26 = vshll.u32 %v5005_v20, 16  ;;  %v425_v27 = vshrl.u32 %v5005_v20, 16  ;;  %v5024_v34 = vld [vmem:[%s4977_s26 + $0x18] sm:$0xff]  }
  0x14   : > { %v334_v15 = vshrl.u32 %v4986_v11, 16  ;;  %v336_v16 = vshll.u32 %v4986_v11, 16  ;;  %v343_v23 = vrot.slane %v341_v17, 1  ;;  %v349_v28 = vshll.u32 %v5008_v21, 16  ;;  %v5035_v43 = vld [vmem:[%s4977_s26 + $0x68] sm:$0xff]   ;;  %v5039_v45 = vld [vmem:[%s4977_s26 + $0x20] sm:$0xff]  }
  0x15   : > { %v5021_v33 = vrot.slane %v413_v24, 1  ;;  %v423_v36 = vrot.slane %v421_v26, 1  ;;  %v429_v38 = vshll.u32 %v5016_v29, 16  ;;  %v353_v39 = vshrl.u32 %v5008_v21, 16  ;;  %v5044_v50 = vld [vmem:[%s4977_s26 + $0x70] sm:$0xff]   ;;  %v5051_v55 = vld [vmem:[%s4977_s26 + $0x28] sm:$0xff]  }
  0x16   : > { %v338_v22 = vrot.slane %v336_v16, 1  ;;  %v347_v32 = vor.u32 %v345_v18, %v343_v23  ;;  %v351_v37 = vrot.slane %v349_v28, 1  ;;  %v357_v42 = vshll.u32 %v5024_v34, 16  ;;  %v5067_v3 = vld [vmem:[%s4977_s26 + $0x78] sm:$0xff]   ;;  %v5076_v16 = vld [vmem:[%s4977_s26 + $0x30] sm:$0xff]   ;;  %v5079_v17 = vld [vmem:[%s4977_s26 + $0x80] sm:$0xff]  }
  0x17   : > { %v419_v41 = vor.u32 %v417_v25, %v5021_v33  ;;  %v433_v44 = vshrl.u32 %v5016_v29, 16  ;;  %v427_v46 = vor.u32 %v425_v27, %v423_v36  ;;  %v431_v48 = vrot.slane %v429_v38, 1 }
  0x18   : > { %v339_v31 = vor.u32 %v338_v22, %v334_v15  ;;  %v352_v47 = vsel %vm332_vm2, %v347_v32, %v351_v37  ;;  %v355_v49 = vor.u32 %v353_v39, %v351_v37  ;;  %v359_v52 = vrot.slane %v357_v42, 1 }
  0x19   : > { %v424_v51 = vsel %vm332_vm2, %v419_v41, %v423_v36  ;;  %v437_v53 = vshll.u32 %v5035_v43, 16  ;;  %v361_v54 = vshrl.u32 %v5024_v34, 16  ;;  %v432_v56 = vsel %vm332_vm2, %v427_v46, %v431_v48  ;;  %v5093_v36 = vld [vmem:[%s4977_s26 + $0x88] sm:$0xff]   ;;  %v5102_v46 = vld [vmem:[%s4977_s26 + $0x40] sm:$0xff]  }
  0x1a   : > { %v344_v40 = vsel %vm332_vm2, %v339_v31, %v343_v23  ;;  %4516 = vmatprep.mubr.msk.bf16.mxu1 %vm481_vm3, %v424_v51  ;;  %v435_v57 = vor.u32 %v433_v44, %v431_v48  ;;  %v365_v58 = vshll.u32 %v5039_v45, 16  ;;  %v441_v59 = vshrl.u32 %v5035_v43, 16  ;;  %v5088_v31 = vld [vmem:[%s4977_s26 + $0x38] sm:$0xff]   ;;  %v4866_v51 = vld [vmem:[%s4977_s26 + $0x90] ss:$0 sps:$4 sm:$0x11]  }
  0x1b   : > { %4496 = vmatprep.mubr.msk.bf16.mxu0 %vm481_vm3, %v344_v40  ;;  %4517 = vmatmul.mubr.msk.bf16.vlgmr.msra.gmra.mxu1 %vm481_vm3, %v432_v56  ;;  %v360_v60 = vsel %vm332_vm2, %v355_v49, %v359_v52  ;;  %v439_v61 = vrot.slane %v437_v53, 1  ;;  %v363_v62 = vor.u32 %v361_v54, %v359_v52  ;;  %v445_v63 = vshll.u32 %v5044_v50, 16 }
  0x1c   : > { %4497 = vmatmul.mubr.msk.bf16.vlgmr.msra.gmra.mxu0 %vm481_vm3, %v352_v47  ;;  %4533 = vmatpush3.bf16.msra.mxu1 %v4971_v8  ;;  %v367_v0 = vrot.slane %v365_v58, 1  ;;  %v369_v1 = vshrl.u32 %v5039_v45, 16  ;;  %v373_v2 = vshll.u32 %v5051_v55, 16  ;;  %v449_v9 = vshrl.u32 %v5044_v50, 16  ;;  %v5105_v47 = vld [vmem:[%s4977_s26 + $0x48] sm:$0xff]  }
  0x1d   : > { %4571 = vmatpush3.bf16.msra.mxu0 %v4968_v7  ;;  %4500 = vmatprep.mubr.msk.bf16.mxu0 %vm481_vm3, %v360_v60  ;;  %v440_v5 = vsel %vm332_vm2, %v435_v57, %v439_v61  ;;  %v443_v6 = vor.u32 %v441_v59, %v439_v61  ;;  %v447_v7 = vrot.slane %v445_v63, 1  ;;  %v453_v15 = vshll.u32 %v5067_v3, 16 }
  0x1e   : > { %4646 = vmatprep.subr.bf16.mxu0 %v5027_v35  ;;  %4608 = vmatprep.subr.bf16.mxu1 %v5019_v30  ;;  %v368_v8 = vsel %vm332_vm2, %v363_v62, %v367_v0  ;;  %v371_v13 = vor.u32 %v369_v1, %v367_v0  ;;  %v375_v14 = vrot.slane %v373_v2, 1  ;;  %v377_v23 = vshrl.u32 %v5051_v55, 16 }
  0x1f   : > { %4520 = vmatprep.mubr.msk.bf16.mxu1 %vm481_vm3, %v440_v5  ;;  %v448_v18 = vsel %vm332_vm2, %v443_v6, %v447_v7  ;;  %v451_v22 = vor.u32 %v449_v9, %v447_v7  ;;  %v457_v24 = vshrl.u32 %v5067_v3, 16  ;;  %v455_v26 = vrot.slane %v453_v15, 1  ;;  %v936_v6 = vld [vmem:[%s4977_s26] sm:$0xe] }
  0x20   : > { %v376_v25 = vsel %vm332_vm2, %v371_v13, %v375_v14  ;;  %v381_v27 = vshll.u32 %v5076_v16, 16  ;;  %v461_v28 = vshll.u32 %v5079_v17, 16  ;;  %v385_v32 = vshrl.u32 %v5076_v16, 16 }
  0x21   : > { %v456_v37 = vsel %vm332_vm2, %v451_v22, %v455_v26  ;;  %v379_v38 = vor.u32 %v377_v23, %v375_v14  ;;  %v389_v41 = vshll.u32 %v5088_v31, 16  ;;  %v465_v42 = vshrl.u32 %v5079_v17, 16 }
  0x22   : > { %v383_v39 = vrot.slane %v381_v27, 1  ;;  %v463_v40 = vrot.slane %v461_v28, 1  ;;  %v469_v44 = vshll.u32 %v5093_v36, 16  ;;  %v459_v48 = vor.u32 %v457_v24, %v455_v26 }
  0x23   : > { %4521 = vmatmul.mubr.msk.bf16.gmra.mxu1 %vm481_vm3, %v448_v18  ;;  %v391_v52 = vrot.slane %v389_v41, 1  ;;  %v397_v56 = vshll.u32 %v5102_v46, 16  ;;  %v393_v58 = vshrl.u32 %v5088_v31, 16  ;;  %v401_v60 = vshrl.u32 %v5102_v46, 16 }
  0x24   : > { %4501 = vmatmul.mubr.msk.bf16.gmra.mxu0 %vm481_vm3, %v368_v8  ;;  %4524 = vmatprep.mubr.msk.bf16.mxu1 %vm481_vm3, %v456_v37  ;;  %v387_v49 = vor.u32 %v385_v32, %v383_v39  ;;  %v467_v53 = vor.u32 %v465_v42, %v463_v40  ;;  %v471_v54 = vrot.slane %v469_v44, 1  ;;  %v384_v57 = vsel %vm332_vm2, %v379_v38, %v383_v39  ;;  %v4149_v37 = vld [vmem:[%s6411_s1 + $0xa] sm:$0x3] }
  0x25   : > { %4504 = vmatprep.mubr.msk.bf16.mxu0 %vm481_vm3, %v376_v25  ;;  %v405_v61 = vshll.u32 %v5105_v47, 16  ;;  %v464_v62 = vsel %vm332_vm2, %v459_v48, %v463_v40  ;;  %v473_v63 = vshrl.u32 %v5093_v36, 16  ;;  %v477_v0 = vshll.u32 %v4866_v51, 16  ;;  %v4169_v40 = vld [vmem:[%s6411_s1 + $0xc] sm:$0x3] }
  0x26   : > { %v392_v59 = vsel %vm332_vm2, %v387_v49, %v391_v52  ;;  %v472_v1 = vsel %vm332_vm2, %v467_v53, %v471_v54  ;;  %v399_v2 = vrot.slane %v397_v56, 1  ;;  %v395_v5 = vor.u32 %v393_v58, %v391_v52  ;;  %v2136_v52 = vld [vmem:[%s4977_s26 + $0x8] sm:$0xc]  ;;  %v5202_v53 = vld [vmem:[%s4977_s26 + $0x10] sm:$0xff]   ;;  %v5211_v58 = vld [vmem:[%s4977_s26 + $0x20] sm:$0xff]  }
  0x27   : > { %v407_v9 = vrot.slane %v405_v61, 1  ;;  %v475_v8 = vor.u32 %v473_v63, %v471_v54  ;;  %v479_v13 = vrot.slane %v477_v0, 1  ;;  %v409_v15 = vshrl.u32 %v5105_v47, 16  ;;  %v5217_v61 = vld [vmem:[%s4977_s26 + $0x28] sm:$0xff]  }
  0x28   : > { %v403_v7 = vor.u32 %v401_v60, %v399_v2  ;;  %v400_v14 = vsel %vm332_vm2, %v395_v5, %v399_v2  ;;  %v4072_v22 = vcombine.low %v936_v6, %v4981_v10  ;;  %v976_v24 = vrot.slane %v5093_v36, 1  ;;  %v5235_v6 = vld [vmem:[%s4977_s26 + $0x38] sm:$0xff]  }
  0x29   : > { %v480_v23 = vsel %vm332_vm2, %v475_v8, %v479_v13  ;;  %v411_v25 = vor.u32 %v409_v15, %v407_v9  ;;  %v978_v26 = vrot.slane %v4866_v51, 1  ;;  %v944_v28 = vrot.slane %v4989_v12, 1  ;;  %v5245_v13 = vld [vmem:[%s4977_s26 + $0x40] sm:$0xff]   ;;  %v5250_v15 = vld [vmem:[%s4977_s26 + $0x48] sm:$0xff]  }
  0x2a   : > { %v408_v18 = vsel %vm332_vm2, %v403_v7, %v407_v9  ;;  %v943_v27 = vrot.slane %v4072_v22, 1  ;;  %v5148_v39 = vand.u32 %v4149_v37, %v4959_v4  ;;  %v5165_v44 = vand.u32 %v4169_v40, %v4959_v4 }
  0x2b   : > { %4525 = vmatmul.mubr.msk.bf16.gmra.mxu1 %vm481_vm3, %v464_v62  ;;  %v5138_v10 = vsel %vm942_vm4, %v976_v24, %v978_v26  ;;  %v416_v32 = vsel %vm332_vm2, %v411_v25, %v5021_v33  ;;  %v948_v33 = vrot.slane %v5024_v34, 1  ;;  %v958_v51 = vrot.slane %v5102_v46, 1 }
  0x2c   : > { %4505 = vmatmul.mubr.msk.bf16.gmra.mxu0 %vm481_vm3, %v384_v57  ;;  %4528 = vmatprep.mubr.msk.bf16.mxu1 %vm481_vm3, %v472_v1  ;;  %v945_v38 = vsel %vm942_vm4, %v943_v27, %v944_v28  ;;  %v5207_v57 = vld [vmem:[%s4977_s26 + $0x18] sm:$0xff]   ;;  %v2148_v63 = vrot.slane %v5211_v58, 2  ;;  %v962_v0 = vrot.slane %v5002_v19, 1  ;;  %v5226_v1 = vld [vmem:[%s4977_s26 + $0x30] sm:$0xff]   ;;  %v964_v5 = vrot.slane %v5005_v20, 1 }
  0x2d   : > { %4508 = vmatprep.mubr.msk.bf16.mxu0 %vm481_vm3, %v392_v59  ;;  %v2146_v60 = vrot.slane %v5207_v57, 2  ;;  %v2150_v9 = vrot.slane %v5217_v61, 2  ;;  %v2152_v8 = vrot.slane %v5226_v1, 2  ;;  %v2156_v25 = vrot.slane %v5245_v13, 2 }
  0x2e   : > { %v2158_v26 = vrot.slane %v5250_v15, 2  ;;  %v966_v27 = vrot.slane %v5016_v29, 1  ;;  %v968_v37 = vrot.slane %v5035_v43, 1 }
  0x2f   : > { %v5238_v7 = vsel %vm2142_vm5, %v2146_v60, %v2148_v63  ;;  %v5256_v22 = vsel %vm2142_vm5, %v2150_v9, %v2152_v8 }
  0x30   : > { %v969_v40 = vsel %vm942_vm4, %v966_v27, %v968_v37 }
  0x33   : > { %4529 = vmatmul.mubr.msk.bf16.gmra.mxu1 %vm481_vm3, %v480_v23 }
  0x34   : > { %4509 = vmatmul.mubr.msk.bf16.gmra.mxu0 %vm481_vm3, %v400_v14  ;;  %4534 = vmatprep.mubr.msk.bf16.mxu1 %vm481_vm3, %v4986_v11  ;;  %v946_v11 = vrot.slane %v5008_v21, 1  ;;  %v2154_v14 = vrot.slane %v5235_v6, 2 }
  0x35   : > { %4512 = vmatprep.mubr.msk.bf16.mxu0 %vm481_vm3, %v408_v18  ;;  %v5253_v18 = vsel %vm2142_vm5, %v2148_v63, %v2150_v9 }
  0x36   : > { %v947_v41 = vsel %vm942_vm4, %v944_v28, %v946_v11  ;;  %v949_v42 = vsel %vm942_vm4, %v946_v11, %v948_v33  ;;  %v5260_v23 = vsel %vm2142_vm5, %v2152_v8, %v2154_v14  ;;  %v5268_v28 = vsel %vm2142_vm5, %v2154_v14, %v2156_v25 }
  0x37   : > { %v967_v11 = vsel %vm942_vm4, %v964_v5, %v966_v27 }
  0x3b   : > { %4535 = vmatmul.mubr.msk.bf16.vlgmr.msra.gmra.mxu1 %vm481_vm3, %v4989_v12  ;;  %v950_v12 = vrot.slane %v5039_v45, 1 }
  0x3c   : > { %4513 = vmatmul.mubr.msk.bf16.gmra.mxu0 %vm481_vm3, %v416_v32  ;;  %4609 = vmatpush3.bf16.msra.mxu1 %v5019_v30  ;;  %v5271_v32 = vsel %vm2142_vm5, %v2156_v25, %v2158_v26  ;;  %v1717_v25 = vshll.u32 %v5207_v57, 16 }
  0x3d   : > { %4572 = vmatprep.mubr.msk.bf16.mxu0 %vm481_vm3, %v945_v38  ;;  %4538 = vmatprep.mubr.msk.bf16.mxu1 %vm481_vm3, %v5008_v21  ;;  %v952_v21 = vrot.slane %v5051_v55, 1  ;;  %v951_v30 = vsel %vm942_vm4, %v948_v33, %v950_v12  ;;  %v5279_v38 = vld [vmem:[%s4977_s26 + $0x50] sm:$0xff]   ;;  %v5283_v33 = vld [vmem:[%s4977_s26 + $0x58] sm:$0xff]  }
  0x3e   : > { %4684 = vmatprep.subr.bf16.mxu1 %v5148_v39 }
  0x3f   : > { %v953_v48 = vsel %vm942_vm4, %v950_v12, %v952_v21 }
  0x43   : > { %4539 = vmatmul.mubr.msk.bf16.gmra.mxu1 %vm481_vm3, %v5024_v34  ;;  %v954_v34 = vrot.slane %v5076_v16, 1 }
  0x44   : > { %4573 = vmatmul.mubr.msk.bf16.vlgmr.msra.gmra.mxu0 %vm481_vm3, %v947_v41  ;;  %4542 = vmatprep.mubr.msk.bf16.mxu1 %vm481_vm3, %v5039_v45  ;;  %v2160_v41 = vrot.slane %v5279_v38, 2 }
  0x45   : > { %4647 = vmatpush3.bf16.msra.mxu0 %v5027_v35  ;;  %4576 = vmatprep.mubr.msk.bf16.mxu0 %vm481_vm3, %v949_v42  ;;  %v956_v35 = vrot.slane %v5088_v31, 1  ;;  %v955_v45 = vsel %vm942_vm4, %v952_v21, %v954_v34  ;;  %v972_v21 = vrot.slane %v5067_v3, 1 }
  0x46   : > { %4722 = vmatprep.subr.bf16.mxu0 %v5165_v44  ;;  %v5290_v42 = vsel %vm2142_vm5, %v2158_v26, %v2160_v41 }
  0x47   : > { %v957_v49 = vsel %vm942_vm4, %v954_v34, %v956_v35  ;;  %v959_v56 = vsel %vm942_vm4, %v956_v35, %v958_v51  ;;  %v5308_v35 = vld [vmem:[%s4977_s26 + $0x68] sm:$0xff]  }
  0x4b   : > { %4543 = vmatmul.mubr.msk.bf16.gmra.mxu1 %vm481_vm3, %v5051_v55  ;;  %v960_v55 = vrot.slane %v5105_v47, 1 }
  0x4c   : > { %4577 = vmatmul.mubr.msk.bf16.gmra.mxu0 %vm481_vm3, %v951_v30  ;;  %4546 = vmatprep.mubr.msk.bf16.mxu1 %vm481_vm3, %v5076_v16  ;;  %v5199_v16 = vld [vmem:[%s4977_s26 + $0xc] sm:$0xf]  ;;  %v1250_v30 = vld [vmem:[%s4977_s26 + $0x8] sm:$0xe] }
  0x4d   : > { %4580 = vmatprep.mubr.msk.bf16.mxu0 %vm481_vm3, %v953_v48  ;;  %v4150_v54 = vcombine.low %v2136_v52, %v5199_v16  ;;  %v5304_v48 = vld [vmem:[%s4977_s26 + $0x60] sm:$0xff]   ;;  %v974_v52 = vrot.slane %v5079_v17, 1 }
  0x4f   : > { %v2143_v59 = vrot.slane %v4150_v54, 2  ;;  %v975_v63 = vsel %vm942_vm4, %v972_v21, %v974_v52 }
  0x53   : > { %4547 = vmatmul.mubr.msk.bf16.gmra.mxu1 %vm481_vm3, %v5088_v31  ;;  %v961_v31 = vsel %vm942_vm4, %v958_v51, %v960_v55  ;;  %v4092_v51 = vcombine.low %v1250_v30, %v5199_v16  ;;  %v1719_v30 = vrot.slane %v1717_v25, 2 }
  0x54   : > { %4581 = vmatmul.mubr.msk.bf16.gmra.mxu0 %vm481_vm3, %v955_v45  ;;  %4550 = vmatprep.mubr.msk.bf16.mxu1 %vm481_vm3, %v5102_v46  ;;  %v2144_v46 = vrot.slane %v5202_v53, 2 }
  0x55   : > { %4584 = vmatprep.mubr.msk.bf16.mxu0 %vm481_vm3, %v957_v49  ;;  %v2164_v49 = vrot.slane %v5304_v48, 2  ;;  %v1700_v16 = vshll.u32 %v4092_v51, 16 }
  0x56   : > { %v5220_v62 = vsel %vm2142_vm5, %v2143_v59, %v2144_v46  ;;  %v5229_v2 = vsel %vm2142_vm5, %v2144_v46, %v2146_v60  ;;  %v1382_v59 = vrot.slane %v4092_v51, 1  ;;  %v1383_v46 = vrot.slane %v5202_v53, 1  ;;  %v5331_v60 = vld [vmem:[%s4977_s26 + $0x70] sm:$0xff]  }
  0x57   : > { %v1702_v9 = vrot.slane %v1700_v16, 2 }
  0x5b   : > { %4551 = vmatmul.mubr.msk.bf16.gmra.mxu1 %vm481_vm3, %v5105_v47  ;;  %v963_v47 = vsel %vm942_vm4, %v960_v55, %v962_v0  ;;  %v1697_v55 = vshrl.u32 %v4092_v51, 16 }
  0x5c   : > { %4585 = vmatmul.mubr.msk.bf16.gmra.mxu0 %vm481_vm3, %v959_v56  ;;  %4554 = vmatprep.mubr.msk.bf16.mxu1 %vm481_vm3, %v5002_v19  ;;  %v965_v19 = vsel %vm942_vm4, %v962_v0, %v964_v5  ;;  %v1705_v56 = vshrl.u32 %v5202_v53, 16  ;;  %v977_v0 = vsel %vm942_vm4, %v974_v52, %v976_v24  ;;  %v5338_v5 = vld [vmem:[%s4977_s26 + $0x78] sm:$0xff]   ;;  %v1714_v24 = vshrl.u32 %v5207_v57, 16 }
  0x5d   : > { %4588 = vmatprep.mubr.msk.bf16.mxu0 %vm481_vm3, %v961_v31  ;;  %v1708_v31 = vshll.u32 %v5202_v53, 16  ;;  %v1384_v53 = vsel %vm942_vm4, %v1382_v59, %v1383_v46  ;;  %v1735_v59 = vshll.u32 %v5217_v61, 16 }
  0x5e   : > { %v1707_v8 = vrot.slane %v1705_v56, 1 }
  0x5f   : > { %v1710_v14 = vrot.slane %v1708_v31, 2 }
  0x63   : > { %4555 = vmatmul.mubr.msk.bf16.gmra.mxu1 %vm481_vm3, %v5005_v20  ;;  %v2162_v20 = vrot.slane %v5283_v33, 2 }
  0x64   : > { %4589 = vmatmul.mubr.msk.bf16.gmra.mxu0 %vm481_vm3, %v963_v47  ;;  %4558 = vmatprep.mubr.msk.bf16.mxu1 %vm481_vm3, %v5016_v29  ;;  %v970_v29 = vrot.slane %v5044_v50, 1  ;;  %v2168_v47 = vrot.slane %v5331_v60, 2 }
  0x65   : > { %4592 = vmatprep.mubr.msk.bf16.mxu0 %vm481_vm3, %v965_v19  ;;  %v5295_v12 = vsel %vm2142_vm5, %v2160_v41, %v2162_v20  ;;  %v1385_v41 = vrot.slane %v5207_v57, 1 }
  0x66   : > { %v971_v34 = vsel %vm942_vm4, %v968_v37, %v970_v29  ;;  %v973_v45 = vsel %vm942_vm4, %v970_v29, %v972_v21  ;;  %v1711_v37 = vor.u32 %v1710_v14, %v1707_v8  ;;  %v5361_v29 = vld [vmem:[%s4977_s26 + $0x80] sm:$0xff]   ;;  %v1716_v21 = vrot.slane %v1714_v24, 1  ;;  %v5399_v14 = vld [vmem:[%s4977_s26 + $0x90] sm:$0xff]  }
  0x67   : > { %v1386_v57 = vsel %vm942_vm4, %v1383_v46, %v1385_v41  ;;  %v1741_v46 = vshrl.u32 %v5226_v1, 16  ;;  %v1391_v8 = vrot.slane %v5226_v1, 1 }
  0x68   : > { %v1720_v31 = vor.u32 %v1719_v30, %v1716_v21  ;;  %v1753_v30 = vshll.u32 %v5235_v6, 16 }
  0x69   : > { %v1743_v24 = vrot.slane %v1741_v46, 1 }
  0x6b   : > { %4559 = vmatmul.mubr.msk.bf16.gmra.mxu1 %vm481_vm3, %v5035_v43  ;;  %v2166_v43 = vrot.slane %v5308_v35, 2 }
  0x6c   : > { %4593 = vmatmul.mubr.msk.bf16.gmra.mxu0 %vm481_vm3, %v967_v11  ;;  %4562 = vmatprep.mubr.msk.bf16.mxu1 %vm481_vm3, %v5044_v50  ;;  %v5316_v50 = vsel %vm2142_vm5, %v2162_v20, %v2164_v49  ;;  %v1723_v11 = vshrl.u32 %v5211_v58, 16  ;;  %v1387_v20 = vrot.slane %v5211_v58, 1 }
  0x6d   : > { %4596 = vmatprep.mubr.msk.bf16.mxu0 %vm481_vm3, %v969_v40  ;;  %v5321_v54 = vsel %vm2142_vm5, %v2164_v49, %v2166_v43  ;;  %v5345_v19 = vsel %vm2142_vm5, %v2166_v43, %v2168_v47  ;;  %v1726_v40 = vshll.u32 %v5211_v58, 16  ;;  %v2172_v43 = vrot.slane %v5361_v29, 2 }
  0x6e   : > { %v1725_v49 = vrot.slane %v1723_v11, 1  ;;  %v1388_v52 = vsel %vm942_vm4, %v1385_v41, %v1387_v20  ;;  %v2176_v11 = vrot.slane %v5399_v14, 2 }
  0x6f   : > { %v1728_v51 = vrot.slane %v1726_v40, 2 }
  0x73   : > { %4563 = vmatmul.mubr.msk.bf16.gmra.mxu1 %vm481_vm3, %v5067_v3  ;;  %v1699_v3 = vrot.slane %v1697_v55, 1  ;;  %v1732_v55 = vshrl.u32 %v5217_v61, 16 }
  0x74   : > { %4597 = vmatmul.mubr.msk.bf16.gmra.mxu0 %vm481_vm3, %v971_v34  ;;  %4566 = vmatprep.mubr.msk.bf16.mxu1 %vm481_vm3, %v5079_v17  ;;  %v2170_v17 = vrot.slane %v5338_v5, 2  ;;  %v5364_v34 = vld [vmem:[%s4977_s26 + $0x88] sm:$0xff]  }
  0x75   : > { %4600 = vmatprep.mubr.msk.bf16.mxu0 %vm481_vm3, %v973_v45  ;;  %v1703_v27 = vor.u32 %v1702_v9, %v1699_v3  ;;  %v2174_v58 = vrot.slane %v5364_v34, 2  ;;  %v1389_v3 = vrot.slane %v5217_v61, 1  ;;  %v4227_v9 = vld [vmem:[%s6411_s1 + $0x10] sm:$0x3] }
  0x76   : > { %v5351_v26 = vsel %vm2142_vm5, %v2168_v47, %v2170_v17  ;;  %v5381_v56 = vsel %vm2142_vm5, %v2170_v17, %v2172_v43  ;;  %v1721_v47 = vsel %vm1695_vm6, %v1711_v37, %v1720_v31  ;;  %v1734_v17 = vrot.slane %v1732_v55, 1 }
  0x77   : > { %v1712_v45 = vsel %vm1695_vm6, %v1703_v27, %v1711_v37  ;;  %v5408_v27 = vand.u32 %v4227_v9, %v4959_v4  ;;  %v1392_v37 = vsel %vm942_vm4, %v1389_v3, %v1391_v8  ;;  %v5416_v41 = vsel %vm2142_vm5, %v2174_v58, %v2176_v11 }
  0x78   : > { %v1780_v9 = vshll.u32 %v5279_v38, 16 }
  0x7b   : > { %4567 = vmatmul.mubr.msk.bf16.gmra.mxu1 %vm481_vm3, %v5093_v36  ;;  %v4207_v36 = vld [vmem:[%s6411_s1 + $0xe] sm:$0x3] }
  0x7c   : > { %4601 = vmatmul.mubr.msk.bf16.gmra.mxu0 %vm481_vm3, %v975_v63  ;;  %4610 = vmatprep.mubr.msk.bf16.mxu1 %vm481_vm3, %v1384_v53  ;;  %v5378_v16 = vand.u32 %v4207_v36, %v4959_v4  ;;  %v1729_v63 = vor.u32 %v1728_v51, %v1725_v49  ;;  %v1737_v53 = vrot.slane %v1735_v59, 2  ;;  %v1750_v4 = vshrl.u32 %v5235_v6, 16 }
  0x7d   : > { %4604 = vmatprep.mubr.msk.bf16.mxu0 %vm481_vm3, %v977_v0  ;;  %v1744_v0 = vshll.u32 %v5226_v1, 16  ;;  %v1390_v1 = vsel %vm942_vm4, %v1387_v20, %v1389_v3  ;;  %v1762_v49 = vshll.u32 %v5245_v13, 16  ;;  %v1395_v51 = vrot.slane %v5245_v13, 1 }
  0x7e   : > { %v1730_v25 = vsel %vm1695_vm6, %v1720_v31, %v1729_v63  ;;  %v1738_v21 = vor.u32 %v1737_v53, %v1734_v17  ;;  %v1777_v3 = vshrl.u32 %v5279_v38, 16  ;;  %v5447_v17 = vld [vmem:[%s4977_s26 + $0x14] sm:$0xf]  ;;  %v3336_v53 = vld [vmem:[%s4977_s26 + $0x10] sm:$0x8] }
  0x7f   : > { %v1746_v61 = vrot.slane %v1744_v0, 2  ;;  %v1764_v31 = vrot.slane %v1762_v49, 2 }
  0x81   : > { %v1747_v36 = vor.u32 %v1746_v61, %v1743_v24 }
  0x83   : > { %4611 = vmatmul.mubr.msk.bf16.vlgmr.msra.gmra.mxu1 %vm481_vm3, %v1386_v57  ;;  %v1752_v57 = vrot.slane %v1750_v4, 1  ;;  %v5457_v4 = vld [vmem:[%s4977_s26 + $0x20] sm:$0xff]  }
  0x84   : > { %4605 = vmatmul.mubr.msk.bf16.gmra.mxu0 %vm481_vm3, %v5138_v10  ;;  %v5387_v10 = vsel %vm2142_vm5, %v2172_v43, %v2174_v58  ;;  %4685 = vmatpush3.bf16.msra.mxu1 %v5148_v39  ;;  %v5404_v39 = vld [vmem:[%s4977_s26 + $0x98] ss:$0 sps:$4 sm:$0x33]   ;;  %v1739_v43 = vsel %vm1695_vm6, %v1729_v63, %v1738_v21  ;;  %v1755_v58 = vrot.slane %v1753_v30, 2  ;;  %v1771_v63 = vshll.u32 %v5250_v15, 16 }
  0x85   : > { %4648 = vmatprep.mubr.msk.bf16.mxu0 %vm481_vm3, %v1712_v45  ;;  %4614 = vmatprep.mubr.msk.bf16.mxu1 %vm481_vm3, %v1388_v52  ;;  %v2178_v40 = vrot.slane %v5404_v39, 2  ;;  %v1759_v45 = vshrl.u32 %v5245_v13, 16  ;;  %v1748_v52 = vsel %vm1695_vm6, %v1738_v21, %v1747_v36  ;;  %v1768_v13 = vshrl.u32 %v5250_v15, 16 }
  0x86   : > { %4760 = vmatprep.subr.bf16.mxu1 %v5378_v16  ;;  %v1773_v61 = vrot.slane %v1771_v63, 2  ;;  %v1782_v21 = vrot.slane %v1780_v9, 2 }
  0x87   : > { %v5423_v20 = vsel %vm2142_vm5, %v2176_v11, %v2178_v40  ;;  %v1761_v55 = vrot.slane %v1759_v45, 1  ;;  %v5452_v11 = vld [vmem:[%s4977_s26 + $0x18] sm:$0xff]   ;;  %v6415_v45 = vrot.slane %v5457_v4, 3 }
  0x88   : > { %v3344_v30 = vrot.slane %v5452_v11, 3 }
  0x89   : > { %v1765_v0 = vor.u32 %v1764_v31, %v1761_v55  ;;  %v1401_v31 = vrot.slane %v5283_v33, 1 }
  0x8a   : > { %v5476_v55 = vsel %vm3342_vm7, %v3344_v30, %v6415_v45 }
  0x8b   : > { %4615 = vmatmul.mubr.msk.bf16.gmra.mxu1 %vm481_vm3, %v1390_v1  ;;  %v4228_v1 = vcombine.low %v3336_v53, %v5447_v17 }
  0x8c   : > { %4649 = vmatmul.mubr.msk.bf16.vlgmr.msra.gmra.mxu0 %vm481_vm3, %v1721_v47  ;;  %4618 = vmatprep.mubr.msk.bf16.mxu1 %vm481_vm3, %v1392_v37  ;;  %v1399_v47 = vrot.slane %v5279_v38, 1  ;;  %v1779_v37 = vrot.slane %v1777_v3, 1 }
  0x8d   : > { %4723 = vmatpush3.bf16.msra.mxu0 %v5165_v44  ;;  %4652 = vmatprep.mubr.msk.bf16.mxu0 %vm481_vm3, %v1730_v25  ;;  %v1393_v44 = vrot.slane %v5235_v6, 1  ;;  %v1756_v6 = vor.u32 %v1755_v58, %v1752_v57  ;;  %v1770_v25 = vrot.slane %v1768_v13, 1  ;;  %v3343_v38 = vrot.slane %v4228_v1, 3 }
  0x8e   : > { %4798 = vmatprep.subr.bf16.mxu0 %v5408_v27  ;;  %v1795_v58 = vshrl.u32 %v5304_v48, 16  ;;  %v1407_v1 = vrot.slane %v5331_v60, 1 }
  0x8f   : > { %v1394_v59 = vsel %vm942_vm4, %v1391_v8, %v1393_v44  ;;  %v1396_v46 = vsel %vm942_vm4, %v1393_v44, %v1395_v51  ;;  %v1397_v8 = vrot.slane %v5250_v15, 1  ;;  %v1757_v24 = vsel %vm1695_vm6, %v1747_v36, %v1756_v6 }
  0x90   : > { %v1766_v40 = vsel %vm1695_vm6, %v1756_v6, %v1765_v0  ;;  %v1774_v49 = vor.u32 %v1773_v61, %v1770_v25  ;;  %v1786_v44 = vshrl.u32 %v5283_v33, 16  ;;  %v5468_v57 = vsel %vm3342_vm7, %v3343_v38, %v3344_v30 }
  0x91   : > { %v1398_v15 = vsel %vm942_vm4, %v1395_v51, %v1397_v8  ;;  %v1400_v36 = vsel %vm942_vm4, %v1397_v8, %v1399_v47  ;;  %v1783_v51 = vor.u32 %v1782_v21, %v1779_v37  ;;  %v1797_v3 = vrot.slane %v1795_v58, 1 }
  0x92   : > { %v1788_v6 = vrot.slane %v1786_v44, 1  ;;  %v1402_v8 = vsel %vm942_vm4, %v1399_v47, %v1401_v31  ;;  %v1813_v25 = vshrl.u32 %v5331_v60, 16  ;;  %v1816_v61 = vshll.u32 %v5331_v60, 16 }
  0x93   : > { %4619 = vmatmul.mubr.msk.bf16.gmra.mxu1 %vm481_vm3, %v1394_v59  ;;  %v1403_v59 = vrot.slane %v5304_v48, 1  ;;  %v1784_v63 = vsel %vm1695_vm6, %v1774_v49, %v1783_v51  ;;  %v1405_v47 = vrot.slane %v5308_v35, 1  ;;  %v1825_v60 = vshll.u32 %v5338_v5, 16 }
  0x94   : > { %4653 = vmatmul.mubr.msk.bf16.gmra.mxu0 %vm481_vm3, %v1739_v43  ;;  %4622 = vmatprep.mubr.msk.bf16.mxu1 %vm481_vm3, %v1396_v46  ;;  %v1789_v43 = vshll.u32 %v5283_v33, 16  ;;  %v1775_v46 = vsel %vm1695_vm6, %v1765_v0, %v1774_v49  ;;  %v1804_v33 = vshrl.u32 %v5308_v35, 16  ;;  %v1815_v38 = vrot.slane %v1813_v25, 1 }
  0x95   : > { %4656 = vmatprep.mubr.msk.bf16.mxu0 %vm481_vm3, %v1748_v52  ;;  %v1798_v52 = vshll.u32 %v5304_v48, 16  ;;  %v1404_v53 = vsel %vm942_vm4, %v1401_v31, %v1403_v59  ;;  %v1807_v48 = vshll.u32 %v5308_v35, 16  ;;  %v1818_v30 = vrot.slane %v1816_v61, 2 }
  0x96   : > { %v1791_v13 = vrot.slane %v1789_v43, 2  ;;  %v1806_v37 = vrot.slane %v1804_v33, 1  ;;  %v1408_v49 = vsel %vm942_vm4, %v1405_v47, %v1407_v1  ;;  %v1822_v35 = vshrl.u32 %v5338_v5, 16 }
  0x97   : > { %v1800_v9 = vrot.slane %v1798_v52, 2  ;;  %v1809_v21 = vrot.slane %v1807_v48, 2  ;;  %v1819_v43 = vor.u32 %v1818_v30, %v1815_v38  ;;  %v1834_v58 = vshll.u32 %v5361_v29, 16  ;;  %v4887_v38 = vld [vmem:[%s4977_s26 + $0x98] ss:$0 sps:$4 sm:$0x11]  }
  0x98   : > { %v1409_v52 = vrot.slane %v5338_v5, 1  ;;  %v1411_v31 = vrot.slane %v5361_v29, 1  ;;  %v1840_v5 = vshrl.u32 %v5364_v34, 16  ;;  %v1849_v33 = vshrl.u32 %v5399_v14, 16 }
  0x99   : > { %v1801_v0 = vor.u32 %v1800_v9, %v1797_v3  ;;  %v1810_v44 = vor.u32 %v1809_v21, %v1806_v37  ;;  %v1836_v3 = vrot.slane %v1834_v58, 2  ;;  %v1852_v48 = vshll.u32 %v5399_v14, 16 }
  0x9a   : > { %v1410_v9 = vsel %vm942_vm4, %v1407_v1, %v1409_v52  ;;  %v1415_v25 = vrot.slane %v5399_v14, 1  ;;  %v1851_v37 = vrot.slane %v1849_v33, 1  ;;  %v1858_v14 = vshrl.u32 %v5404_v39, 16 }
  0x9b   : > { %4623 = vmatmul.mubr.msk.bf16.gmra.mxu1 %vm481_vm3, %v1398_v15  ;;  %v1854_v21 = vrot.slane %v1852_v48, 2 }
  0x9c   : > { %4657 = vmatmul.mubr.msk.bf16.gmra.mxu0 %vm481_vm3, %v1757_v24  ;;  %4626 = vmatprep.mubr.msk.bf16.mxu1 %vm481_vm3, %v1400_v36  ;;  %v1792_v24 = vor.u32 %v1791_v13, %v1788_v6  ;;  %v1406_v36 = vsel %vm942_vm4, %v1403_v59, %v1405_v47  ;;  %v1811_v59 = vsel %vm1695_vm6, %v1801_v0, %v1810_v44  ;;  %v1827_v6 = vrot.slane %v1825_v60, 2 }
  0x9d   : > { %4660 = vmatprep.mubr.msk.bf16.mxu0 %vm481_vm3, %v1766_v40  ;;  %v1820_v13 = vsel %vm1695_vm6, %v1810_v44, %v1819_v43  ;;  %v1842_v47 = vrot.slane %v1840_v5, 1  ;;  %v1417_v44 = vrot.slane %v4887_v38, 1  ;;  %v5581_v5 = vld [vmem:[%s4977_s26 + $0x40] sm:$0xff]  }
  0x9e   : > { %v1793_v40 = vsel %vm1695_vm6, %v1783_v51, %v1792_v24  ;;  %v1802_v15 = vsel %vm1695_vm6, %v1792_v24, %v1801_v0  ;;  %v1831_v51 = vshrl.u32 %v5361_v29, 16  ;;  %v1843_v29 = vshll.u32 %v5364_v34, 16 }
  0x9f   : > { %v1413_v0 = vrot.slane %v5364_v34, 1 }
  0xa0   : > { %v1845_v1 = vrot.slane %v1843_v29, 2 }
  0xa1   : > { %v1416_v30 = vsel %vm942_vm4, %v1413_v0, %v1415_v25 }
  0xa2   : > { %v1846_v34 = vor.u32 %v1845_v1, %v1842_v47  ;;  %v5607_v47 = vld [vmem:[%s4977_s26 + $0x50] sm:$0xff]  }
  0xa3   : > { %4627 = vmatmul.mubr.msk.bf16.gmra.mxu1 %vm481_vm3, %v1402_v8  ;;  %v1412_v8 = vsel %vm942_vm4, %v1409_v52, %v1411_v31 }
  0xa4   : > { %4661 = vmatmul.mubr.msk.bf16.gmra.mxu0 %vm481_vm3, %v1775_v46  ;;  %4630 = vmatprep.mubr.msk.bf16.mxu1 %vm481_vm3, %v1404_v53  ;;  %v1824_v46 = vrot.slane %v1822_v35, 1  ;;  %v2450_v35 = vld [vmem:[%s4977_s26 + $0x10] sm:$0xc] }
  0xa5   : > { %4664 = vmatprep.mubr.msk.bf16.mxu0 %vm481_vm3, %v1784_v63  ;;  %v1833_v63 = vrot.slane %v1831_v51, 1  ;;  %v5538_v52 = vcombine.low %v2450_v35, %v5447_v17 }
  0xa6   : > { %v1828_v53 = vor.u32 %v1827_v6, %v1824_v46  ;;  %v2583_v46 = vrot.slane %v5452_v11, 2 }
  0xa7   : > { %v1837_v24 = vor.u32 %v1836_v3, %v1833_v63  ;;  %v2585_v63 = vrot.slane %v5457_v4, 2 }
  0xa8   : > { %v1829_v61 = vsel %vm1695_vm6, %v1819_v43, %v1828_v53  ;;  %v1860_v43 = vrot.slane %v1858_v14, 1 }
  0xa9   : > { %v1847_v60 = vsel %vm1695_vm6, %v1837_v24, %v1846_v34 }
  0xab   : > { %4631 = vmatmul.mubr.msk.bf16.gmra.mxu1 %vm481_vm3, %v1406_v36  ;;  %v1861_v36 = vshll.u32 %v5404_v39, 16 }
  0xac   : > { %4665 = vmatmul.mubr.msk.bf16.gmra.mxu0 %vm481_vm3, %v1793_v40  ;;  %4634 = vmatprep.mubr.msk.bf16.mxu1 %vm481_vm3, %v1408_v49  ;;  %v1838_v40 = vsel %vm1695_vm6, %v1828_v53, %v1837_v24  ;;  %v1855_v49 = vor.u32 %v1854_v21, %v1851_v37  ;;  %v5568_v53 = vld [vmem:[%s4977_s26 + $0x38] sm:$0xff]  }
  0xad   : > { %4668 = vmatprep.mubr.msk.bf16.mxu0 %vm481_vm3, %v1802_v15  ;;  %v1414_v15 = vsel %vm942_vm4, %v1411_v31, %v1413_v0  ;;  %v1863_v51 = vrot.slane %v1861_v36, 2  ;;  %v1418_v31 = vsel %vm942_vm4, %v1415_v25, %v1417_v44  ;;  %v5615_v37 = vld [vmem:[%s4977_s26 + $0x58] sm:$0xff]   ;;  %v5639_v44 = vld [vmem:[%s4977_s26 + $0x60] sm:$0xff]  }
  0xae   : > { %v1856_v58 = vsel %vm1695_vm6, %v1846_v34, %v1855_v49  ;;  %v2599_v34 = vrot.slane %v5615_v37, 2 }
  0xaf   : > { %v1864_v39 = vor.u32 %v1863_v51, %v1860_v43  ;;  %v5647_v43 = vld [vmem:[%s4977_s26 + $0x68] sm:$0xff]  }
  0xb1   : > { %v1865_v17 = vsel %vm1695_vm6, %v1855_v49, %v1864_v39 }
  0xb3   : > { %4635 = vmatmul.mubr.msk.bf16.gmra.mxu1 %vm481_vm3, %v1410_v9  ;;  %v5564_v9 = vld [vmem:[%s4977_s26 + $0x30] sm:$0xff]  }
  0xb4   : > { %4669 = vmatmul.mubr.msk.bf16.gmra.mxu0 %vm481_vm3, %v1811_v59  ;;  %4638 = vmatprep.mubr.msk.bf16.mxu1 %vm481_vm3, %v1412_v8  ;;  %v2582_v59 = vrot.slane %v5538_v52, 2 }
  0xb5   : > { %4672 = vmatprep.mubr.msk.bf16.mxu0 %vm481_vm3, %v1820_v13  ;;  %v5551_v13 = vld [vmem:[%s4977_s26 + $0x28] sm:$0xff]  }
  0xb6   : > { %v2584_v6 = vsel %vm2142_vm5, %v2582_v59, %v2583_v46  ;;  %v2587_v3 = vrot.slane %v5551_v13, 2  ;;  %v2603_v59 = vrot.slane %v5647_v43, 2 }
  0xb8   : > { %v2588_v8 = vsel %vm2142_vm5, %v2585_v63, %v2587_v3 }
  0xbb   : > { %4639 = vmatmul.mubr.msk.bf16.gmra.mxu1 %vm481_vm3, %v1414_v15  ;;  %v2597_v15 = vrot.slane %v5607_v47, 2 }
  0xbc   : > { %4673 = vmatmul.mubr.msk.bf16.gmra.mxu0 %vm481_vm3, %v1829_v61  ;;  %4642 = vmatprep.mubr.msk.bf16.mxu1 %vm481_vm3, %v1416_v30 }
  0xbd   : > { %4676 = vmatprep.mubr.msk.bf16.mxu0 %vm481_vm3, %v1838_v40 }
  0xc3   : > { %4643 = vmatmul.mubr.msk.bf16.gmra.mxu1 %vm481_vm3, %v1418_v31 }
  0xc4   : > { %4677 = vmatmul.mubr.msk.bf16.gmra.mxu0 %vm481_vm3, %v1847_v60  ;;  %4686 = vmatprep.mubr.msk.bf16.mxu1 %vm481_vm3, %v5220_v62  ;;  %v2586_v62 = vsel %vm2142_vm5, %v2583_v46, %v2585_v63  ;;  %v5671_v63 = vld [vmem:[%s4977_s26 + $0x70] sm:$0xff]  }
  0xc5   : > { %4680 = vmatprep.mubr.msk.bf16.mxu0 %vm481_vm3, %v1856_v58  ;;  %v2601_v58 = vrot.slane %v5639_v44, 2 }
  0xcb   : > { %4687 = vmatmul.mubr.msk.bf16.vlgmr.msra.gmra.mxu1 %vm481_vm3, %v5229_v2  ;;  %v2589_v2 = vrot.slane %v5564_v9, 2 }
  0xcc   : > { %4681 = vmatmul.mubr.msk.bf16.gmra.mxu0 %vm481_vm3, %v1865_v17  ;;  %4761 = vmatpush3.bf16.msra.mxu1 %v5378_v16 }
  0xcd   : > { %4724 = vmatprep.mubr.msk.bf16.mxu0 %vm481_vm3, %v2584_v6  ;;  %4690 = vmatprep.mubr.msk.bf16.mxu1 %vm481_vm3, %v5238_v7  ;;  %v2591_v7 = vrot.slane %v5568_v53, 2  ;;  %v2590_v16 = vsel %vm2142_vm5, %v2587_v3, %v2589_v2  ;;  %v2602_v6 = vsel %vm2142_vm5, %v2599_v34, %v2601_v58 }
  0xcf   : > { %v2592_v29 = vsel %vm2142_vm5, %v2589_v2, %v2591_v7 }
  0xd3   : > { %4691 = vmatmul.mubr.msk.bf16.gmra.mxu1 %vm481_vm3, %v5253_v18  ;;  %v2593_v18 = vrot.slane %v5581_v5, 2 }
  0xd4   : > { %4725 = vmatmul.mubr.msk.bf16.vlgmr.msra.gmra.mxu0 %vm481_vm3, %v2586_v62  ;;  %4694 = vmatprep.mubr.msk.bf16.mxu1 %vm481_vm3, %v5256_v22 }
  0xd5   : > { %4799 = vmatpush3.bf16.msra.mxu0 %v5408_v27  ;;  %4728 = vmatprep.mubr.msk.bf16.mxu0 %vm481_vm3, %v2588_v8  ;;  %v5585_v27 = vld [vmem:[%s4977_s26 + $0x48] sm:$0xff]   ;;  %v2594_v61 = vsel %vm2142_vm5, %v2591_v7, %v2593_v18  ;;  %v5679_v8 = vld [vmem:[%s4977_s26 + $0x78] sm:$0xff]   ;;  %v2605_v7 = vrot.slane %v5671_v63, 2 }
  0xd6   : > { %v2595_v48 = vrot.slane %v5585_v27, 2 }
  0xd8   : > { %v2598_v49 = vsel %vm2142_vm5, %v2595_v48, %v2597_v15 }
  0xdb   : > { %v5592_v33 = vpop.f32.mrf.mxu1  ;;  %4695 = vmatmul.mubr.msk.bf16.gmra.mxu1 %vm481_vm3, %v5260_v23  ;;  %v2596_v23 = vsel %vm2142_vm5, %v2593_v18, %v2595_v48  ;;  %v2607_v18 = vrot.slane %v5679_v8, 2 }
  0xdc   : > { %v5587_v24 = vpop.f32.mrf.mxu0  ;;  %4729 = vmatmul.mubr.msk.bf16.gmra.mxu0 %vm481_vm3, %v2590_v16  ;;  %4698 = vmatprep.mubr.msk.bf16.mxu1 %vm481_vm3, %v5268_v28 }
  0xdd   : > { %4732 = vmatprep.mubr.msk.bf16.mxu0 %vm481_vm3, %v2592_v29  ;;  %v5601_v0 = vpop.f32.mrf.mxu1 }
  0xde   : > { %v5596_v22 = vpop.f32.mrf.mxu0 }
  0xdf   : > { %v5609_v1 = vpop.f32.mrf.mxu1 }
  0xe0   : > { %v5603_v25 = vpop.f32.mrf.mxu0 }
  0xe1   : > { %v5617_v21 = vpop.f32.mrf.mxu1 }
  0xe2   : > { %v5611_v40 = vpop.f32.mrf.mxu0 }
  0xe3   : > { %v5624_v38 = vpop.f32.mrf.mxu1  ;;  %4699 = vmatmul.mubr.msk.bf16.gmra.mxu1 %vm481_vm3, %v5271_v32  ;;  %v2600_v32 = vsel %vm2142_vm5, %v2597_v15, %v2599_v34  ;;  %v5703_v15 = vld [vmem:[%s4977_s26 + $0x80] sm:$0xff]  }
  0xe4   : > { %v5619_v28 = vpop.f32.mrf.mxu0  ;;  %4733 = vmatmul.mubr.msk.bf16.gmra.mxu0 %vm481_vm3, %v2594_v61  ;;  %4702 = vmatprep.mubr.msk.bf16.mxu1 %vm481_vm3, %v5290_v42  ;;  %6430 = vst [vmem:[#allocation10_spill] sm:$0xff] %v5703_v15 }
  0xe5   : > { %4736 = vmatprep.mubr.msk.bf16.mxu0 %vm481_vm3, %v2596_v23  ;;  %v5633_v14 = vpop.f32.mrf.mxu1  ;;  %v2606_v23 = vsel %vm2142_vm5, %v2603_v59, %v2605_v7 }
  0xe6   : > { %v5628_v30 = vpop.f32.mrf.mxu0 }
  0xe7   : > { %v5641_v35 = vpop.f32.mrf.mxu1 }
  0xe8   : > { %v5635_v36 = vpop.f32.mrf.mxu0  ;;  %6422 = vst [vmem:[#allocation2_spill] sm:$0xff] %v5641_v35 }
  0xe9   : > { %v5649_v51 = vpop.f32.mrf.mxu1 }
  0xea   : > { %v5643_v60 = vpop.f32.mrf.mxu0  ;;  %6423 = vst [vmem:[#allocation3_spill] sm:$0xff] %v5649_v51 }
  0xeb   : > { %v5656_v31 = vpop.f32.mrf.mxu1  ;;  %4703 = vmatmul.mubr.msk.bf16.gmra.mxu1 %vm481_vm3, %v5295_v12  ;;  %v2604_v12 = vsel %vm2142_vm5, %v2601_v58, %v2603_v59 }
  0xec   : > { %v5651_v42 = vpop.f32.mrf.mxu0  ;;  %4737 = vmatmul.mubr.msk.bf16.gmra.mxu0 %vm481_vm3, %v2598_v49  ;;  %6424 = vst [vmem:[#allocation4_spill] sm:$0xff] %v5656_v31  ;;  %4706 = vmatprep.mubr.msk.bf16.mxu1 %vm481_vm3, %v5316_v50 }
  0xed   : > { %4740 = vmatprep.mubr.msk.bf16.mxu0 %vm481_vm3, %v2600_v32  ;;  %v5665_v46 = vpop.f32.mrf.mxu1  ;;  %v5711_v32 = vld [vmem:[%s4977_s26 + $0x88] sm:$0xff]  }
  0xee   : > { %v5660_v39 = vpop.f32.mrf.mxu0  ;;  %6425 = vst [vmem:[#allocation5_spill] sm:$0xff] %v5665_v46  ;;  %6432 = vst [vmem:[#allocation12_spill] sm:$0xff] %v5711_v32  ;;  %v5743_v46 = vld [vmem:[%s4977_s26 + $0x98] sm:$0xff]  }
  0xef   : > { %v5673_v3 = vpop.f32.mrf.mxu1  ;;  %6434 = vst [vmem:[#allocation14_spill] sm:$0xff] %v5743_v46 }
  0xf0   : > { %v5667_v17 = vpop.f32.mrf.mxu0  ;;  %6426 = vst [vmem:[#allocation6_spill] sm:$0xff] %v5673_v3  ;;  %v5737_v3 = vld [vmem:[%s4977_s26 + $0x90] sm:$0xff]  }
  0xf1   : > { %v5681_v2 = vpop.f32.mrf.mxu1 }
  0xf2   : > { %v5675_v62 = vpop.f32.mrf.mxu0  ;;  %6427 = vst [vmem:[#allocation7_spill] sm:$0xff] %v5681_v2 }
  0xf3   : > { %v5688_v16 = vpop.f32.mrf.mxu1  ;;  %4707 = vmatmul.mubr.msk.bf16.gmra.mxu1 %vm481_vm3, %v5321_v54  ;;  %v2608_v54 = vsel %vm2142_vm5, %v2605_v7, %v2607_v18  ;;  %v2611_v7 = vrot.slane %v5711_v32, 2 }
  0xf4   : > { %v5683_v50 = vpop.f32.mrf.mxu0  ;;  %4741 = vmatmul.mubr.msk.bf16.gmra.mxu0 %vm481_vm3, %v2602_v6  ;;  %6428 = vst [vmem:[#allocation8_spill] sm:$0xff] %v5688_v16  ;;  %4710 = vmatprep.mubr.msk.bf16.mxu1 %vm481_vm3, %v5345_v19  ;;  %v2609_v19 = vrot.slane %v5703_v15, 2 }
  0xf5   : > { %4744 = vmatprep.mubr.msk.bf16.mxu0 %vm481_vm3, %v2604_v12  ;;  %v5697_v48 = vpop.f32.mrf.mxu1 }
  0xf6   : > { %v5692_v29 = vpop.f32.mrf.mxu0  ;;  %6429 = vst [vmem:[#allocation9_spill] sm:$0xff] %v5697_v48  ;;  %v2905_v48 = vshrl.u32 %v5452_v11, 16  ;;  %v2610_v2 = vsel %vm2142_vm5, %v2607_v18, %v2609_v19 }
  0xf7   : > { %v5705_v34 = vpop.f32.mrf.mxu1 }
  0xf8   : > { %v5699_v61 = vpop.f32.mrf.mxu0  ;;  %6431 = vst [vmem:[#allocation11_spill] sm:$0xff] %v5705_v34  ;;  %v2900_v34 = vshll.u32 %v5538_v52, 16 }
  0xf9   : > { %v5713_v58 = vpop.f32.mrf.mxu1 }
  0xfa   : > { %v5707_v49 = vpop.f32.mrf.mxu0  ;;  %6433 = vst [vmem:[#allocation13_spill] sm:$0xff] %v5713_v58  ;;  %v2902_v32 = vrot.slane %v2900_v34, 3 }
  0xfb   : > { %v4536_v59 = vpop.f32.mrf.mxu1  ;;  %4711 = vmatmul.mubr.msk.bf16.gmra.mxu1 %vm481_vm3, %v5351_v26  ;;  %v2908_v26 = vshll.u32 %v5452_v11, 16 }
  0xfc   : > { %v5715_v6 = vpop.f32.mrf.mxu0  ;;  %4745 = vmatmul.mubr.msk.bf16.gmra.mxu0 %vm481_vm3, %v2606_v23  ;;  %v802_v45 = vadd.f32 %v4536_v59, %v5587_v24  ;;  %4714 = vmatprep.mubr.msk.bf16.mxu1 %vm481_vm3, %v5381_v56  ;;  %v2612_v56 = vsel %vm2142_vm5, %v2609_v19, %v2611_v7  ;;  %v2613_v19 = vrot.slane %v5737_v3, 2 }
  0xfd   : > { %4748 = vmatprep.mubr.msk.bf16.mxu0 %vm481_vm3, %v2608_v54  ;;  %v793_v23 = vpop.f32.mrf.mxu1  ;;  %v2897_v54 = vshrl.u32 %v5538_v52, 16 }
  0xfe   : > { %v5722_v12 = vpop.f32.mrf.mxu0  ;;  %v794_v16 = vadd.f32 %v793_v23, %v5596_v22  ;;  %v2907_v22 = vrot.slane %v2905_v48, 2  ;;  %v2910_v23 = vrot.slane %v2908_v26, 3 }
  0xff   : > { %v4537_v24 = vpop.f32.mrf.mxu1  ;;  %v2899_v11 = vrot.slane %v2897_v54, 2 }
 0x100   : > { %v5728_v58 = vpop.f32.mrf.mxu0  ;;  %v805_v31 = vadd.f32 %v4537_v24, %v5603_v25  ;;  %v2615_v24 = vrot.slane %v5743_v46, 2  ;;  %v2911_v26 = vor.u32 %v2910_v23, %v2907_v22 }
 0x101   : > { %v796_v52 = vpop.f32.mrf.mxu1  ;;  %v2903_v54 = vor.u32 %v2902_v32, %v2899_v11 }
 0x102   : > { %v5739_v59 = vpop.f32.mrf.mxu0  ;;  %v797_v18 = vadd.f32 %v796_v52, %v5611_v40  ;;  %v2917_v40 = vshll.u32 %v5457_v4, 16 }
 0x103   : > { %v4540_v35 = vpop.f32.mrf.mxu1  ;;  %4715 = vmatmul.mubr.msk.bf16.gmra.mxu1 %vm481_vm3, %v5387_v10  ;;  %v2923_v10 = vshrl.u32 %v5551_v13, 16 }
 0x104   : > { %v4574_v51 = vpop.f32.mrf.mxu0  ;;  %4749 = vmatmul.mubr.msk.bf16.gmra.mxu0 %vm481_vm3, %v2610_v2  ;;  %v818_v2 = vadd.f32 %v4540_v35, %v5619_v28  ;;  %4718 = vmatprep.mubr.msk.bf16.mxu1 %vm481_vm3, %v5416_v41  ;;  %v2614_v35 = vsel %vm2142_vm5, %v2611_v7, %v2613_v19  ;;  %v4908_v41 = vld [vmem:[%s4977_s26 + $0xa0] ss:$0 sps:$4 sm:$0x33]   ;;  %v2919_v22 = vrot.slane %v2917_v40, 3  ;;  %v2935_v40 = vshll.u32 %v5564_v9, 16 }
 0x105   : > { %v5748_v15 = vadd.f32 %v4574_v51, %v802_v45  ;;  %4752 = vmatprep.mubr.msk.bf16.mxu0 %vm481_vm3, %v2612_v56  ;;  %v2914_v45 = vshrl.u32 %v5457_v4, 16  ;;  %v809_v51 = vpop.f32.mrf.mxu1  ;;  %v2926_v56 = vshll.u32 %v5551_v13, 16 }
 0x106   : > { %v1071_v25 = vpop.f32.mrf.mxu0  ;;  %v810_v52 = vadd.f32 %v809_v51, %v5628_v30  ;;  %v2912_v30 = vsel %vm2895_vm8, %v2903_v54, %v2911_v26 }
 0x107   : > { %6435 = vst [vmem:[#allocation15_spill] sm:$0xff] %v5748_v15  ;;  %v5756_v48 = vadd.f32 %v1071_v25, %v794_v16  ;;  %v4541_v16 = vpop.f32.mrf.mxu1  ;;  %v2916_v11 = vrot.slane %v2914_v45, 2  ;;  %v2928_v7 = vrot.slane %v2926_v56, 3  ;;  %v2932_v45 = vshrl.u32 %v5564_v9, 16 }
 0x108   : > { %v4575_v34 = vpop.f32.mrf.mxu0  ;;  %v821_v15 = vadd.f32 %v4541_v16, %v5635_v36  ;;  %v2941_v56 = vshrl.u32 %v5568_v53, 16 }
 0x109   : > { %6436 = vst [vmem:[#allocation16_spill] sm:$0xff] %v5756_v48  ;;  %v5765_v28 = vadd.f32 %v4575_v34, %v805_v31  ;;  %v2616_v48 = vsel %vm2142_vm5, %v2613_v19, %v2615_v24  ;;  %v812_v23 = vpop.f32.mrf.mxu1  ;;  %v2925_v31 = vrot.slane %v2923_v10, 2  ;;  %v2617_v19 = vrot.slane %v4908_v41, 2 }
 0x10a   : > { %v1074_v25 = vpop.f32.mrf.mxu0  ;;  %v813_v51 = vadd.f32 %v812_v23, %v5643_v60  ;;  %v2920_v60 = vor.u32 %v2919_v22, %v2916_v11  ;;  %v2937_v23 = vrot.slane %v2935_v40, 3 }
 0x10b   : > { %v5771_v32 = vadd.f32 %v1074_v25, %v797_v18  ;;  %v4544_v36 = vpop.f32.mrf.mxu1  ;;  %4719 = vmatmul.mubr.msk.bf16.gmra.mxu1 %vm481_vm3, %v5423_v20  ;;  %v2618_v16 = vsel %vm2142_vm5, %v2615_v24, %v2617_v19 }
 0x10c   : > { %v4578_v46 = vpop.f32.mrf.mxu0  ;;  %4753 = vmatmul.mubr.msk.bf16.gmra.mxu0 %vm481_vm3, %v2614_v35  ;;  %v834_v54 = vadd.f32 %v4544_v36, %v5651_v42  ;;  %4762 = vmatprep.mubr.msk.bf16.mxu1 %vm481_vm3, %v2912_v30  ;;  %v2944_v35 = vshll.u32 %v5568_v53, 16  ;;  %v2921_v22 = vsel %vm2895_vm8, %v2911_v26, %v2920_v60 }
 0x10d   : > { %v5776_v34 = vadd.f32 %v4578_v46, %v818_v2  ;;  %4756 = vmatprep.mubr.msk.bf16.mxu0 %vm481_vm3, %v2616_v48  ;;  %v825_v46 = vpop.f32.mrf.mxu1  ;;  %v2929_v48 = vor.u32 %v2928_v7, %v2925_v31 }
 0x10e   : > { %v1087_v18 = vpop.f32.mrf.mxu0  ;;  %v826_v20 = vadd.f32 %v825_v46, %v5660_v39  ;;  %v2946_v36 = vrot.slane %v2944_v35, 3 }
 0x10f   : > { %v5784_v10 = vadd.f32 %v1087_v18, %v810_v52  ;;  %v4545_v25 = vpop.f32.mrf.mxu1  ;;  %v2934_v52 = vrot.slane %v2932_v45, 2  ;;  %v2930_v39 = vsel %vm2895_vm8, %v2920_v60, %v2929_v48  ;;  %v3348_v18 = vrot.slane %v5551_v13, 3 }
 0x110   : > { %v4579_v2 = vpop.f32.mrf.mxu0  ;;  %v837_v30 = vadd.f32 %v4545_v25, %v5667_v17  ;;  %v6437_v25 = vrot.slane %v5457_v4, 3 }
 0x111   : > { %v5790_v41 = vadd.f32 %v4579_v2, %v821_v15  ;;  %v828_v31 = vpop.f32.mrf.mxu1  ;;  %v2943_v15 = vrot.slane %v2941_v56, 2  ;;  %v2938_v26 = vor.u32 %v2937_v23, %v2934_v52  ;;  %v2959_v2 = vshrl.u32 %v5585_v27, 16 }
 0x112   : > { %v1090_v42 = vpop.f32.mrf.mxu0  ;;  %v829_v24 = vadd.f32 %v828_v31, %v5675_v62  ;;  %v2950_v62 = vshrl.u32 %v5581_v5, 16  ;;  %v2962_v56 = vshll.u32 %v5585_v27, 16 }
 0x113   : > { %v5794_v11 = vadd.f32 %v1090_v42, %v813_v51  ;;  %v4548_v17 = vpop.f32.mrf.mxu1  ;;  %4763 = vmatmul.mubr.msk.bf16.vlgmr.msra.gmra.mxu1 %vm481_vm3, %v2921_v22  ;;  %v3349_v42 = vsel %vm3342_vm7, %v6437_v25, %v3348_v18 }
 0x114   : > { %v4582_v7 = vpop.f32.mrf.mxu0  ;;  %4757 = vmatmul.mubr.msk.bf16.gmra.mxu0 %vm481_vm3, %v2618_v16  ;;  %v850_v45 = vadd.f32 %v4548_v17, %v5683_v50  ;;  %4766 = vmatprep.mubr.msk.bf16.mxu1 %vm481_vm3, %v2930_v39  ;;  %v2939_v16 = vsel %vm2895_vm8, %v2929_v48, %v2938_v26  ;;  %v2952_v22 = vrot.slane %v2950_v62, 2  ;;  %v3352_v17 = vrot.slane %v5568_v53, 3 }
 0x115   : > { %v5800_v19 = vadd.f32 %v4582_v7, %v834_v54  ;;  %4800 = vmatprep.mubr.msk.bf16.mxu0 %vm481_vm3, %v5468_v57  ;;  %v2953_v54 = vshll.u32 %v5581_v5, 16  ;;  %v841_v60 = vpop.f32.mrf.mxu1  ;;  %v2947_v57 = vor.u32 %v2946_v36, %v2943_v15  ;;  %v2964_v15 = vrot.slane %v2962_v56, 3 }
 0x116   : > { %v1103_v51 = vpop.f32.mrf.mxu0  ;;  %v842_v35 = vadd.f32 %v841_v60, %v5692_v29  ;;  %v2977_v60 = vshrl.u32 %v5615_v37, 16 }
 0x117   : > { %v5807_v40 = vadd.f32 %v1103_v51, %v826_v20  ;;  %v4549_v50 = vpop.f32.mrf.mxu1  ;;  %v2955_v31 = vrot.slane %v2953_v54, 3  ;;  %v2948_v29 = vsel %vm2895_vm8, %v2938_v26, %v2947_v57  ;;  %v2971_v51 = vshll.u32 %v5607_v47, 16 }
 0x118   : > { %v4583_v46 = vpop.f32.mrf.mxu0  ;;  %v853_v52 = vadd.f32 %v4549_v50, %v5699_v61  ;;  %v3350_v61 = vrot.slane %v5564_v9, 3 }
 0x119   : > { %v5815_v13 = vadd.f32 %v4583_v46, %v837_v30  ;;  %v844_v7 = vpop.f32.mrf.mxu1  ;;  %v2961_v30 = vrot.slane %v2959_v2, 2  ;;  %v2980_v46 = vshll.u32 %v5615_v37, 16 }
 0x11a   : > { %v1106_v20 = vpop.f32.mrf.mxu0  ;;  %v845_v48 = vadd.f32 %v844_v7, %v5707_v49  ;;  %v2956_v49 = vor.u32 %v2955_v31, %v2952_v22  ;;  %v3351_v56 = vsel %vm3342_vm7, %v3348_v18, %v3350_v61 }
 0x11b   : > { %v5822_v23 = vadd.f32 %v1106_v20, %v829_v24  ;;  %v4552_v36 = vpop.f32.mrf.mxu1  ;;  %4767 = vmatmul.mubr.msk.bf16.gmra.mxu1 %vm481_vm3, %v2939_v16  ;;  %v2965_v9 = vor.u32 %v2964_v15, %v2961_v30  ;;  %v2973_v16 = vrot.slane %v2971_v51, 3  ;;  %v2982_v18 = vrot.slane %v2980_v46, 3 }
 0x11c   : > { %v4586_v39 = vpop.f32.mrf.mxu0  ;;  %4801 = vmatmul.mubr.msk.bf16.vlgmr.msra.gmra.mxu0 %vm481_vm3, %v5476_v55  ;;  %v2968_v55 = vshrl.u32 %v5607_v47, 16  ;;  %v866_v26 = vadd.f32 %v4552_v36, %v5715_v6  ;;  %4770 = vmatprep.mubr.msk.bf16.mxu1 %vm481_vm3, %v2948_v29  ;;  %v2957_v22 = vsel %vm2895_vm8, %v2947_v57, %v2956_v49  ;;  %v2986_v36 = vshrl.u32 %v5639_v44, 16 }
 0x11d   : > { %v5828_v4 = vadd.f32 %v4586_v39, %v850_v45  ;;  %4804 = vmatprep.mubr.msk.bf16.mxu0 %vm481_vm3, %v3349_v42  ;;  %v857_v45 = vpop.f32.mrf.mxu1 }
 0x11e   : > { %v1119_v24 = vpop.f32.mrf.mxu0  ;;  %v858_v53 = vadd.f32 %v857_v45, %v5722_v12  ;;  %v2970_v20 = vrot.slane %v2968_v55, 2  ;;  %v2966_v12 = vsel %vm2895_vm8, %v2956_v49, %v2965_v9 }
 0x11f   : > { %v5837_v62 = vadd.f32 %v1119_v24, %v842_v35  ;;  %v4553_v50 = vpop.f32.mrf.mxu1  ;;  %v3353_v35 = vsel %vm3342_vm7, %v3350_v61, %v3352_v17 }
 0x120   : > { %v4587_v54 = vpop.f32.mrf.mxu0  ;;  %v869_v25 = vadd.f32 %v4553_v50, %v5728_v58  ;;  %v3354_v58 = vrot.slane %v5581_v5, 3  ;;  %v2974_v15 = vor.u32 %v2973_v16, %v2970_v20  ;;  %v2995_v5 = vshrl.u32 %v5647_v43, 16 }
 0x121   : > { %v5843_v2 = vadd.f32 %v4587_v54, %v853_v52  ;;  %v860_v31 = vpop.f32.mrf.mxu1  ;;  %v2979_v52 = vrot.slane %v2977_v60, 2  ;;  %v2988_v50 = vrot.slane %v2986_v36, 2  ;;  %v3016_v36 = vshll.u32 %v5679_v8, 16 }
 0x122   : > { %v1122_v6 = vpop.f32.mrf.mxu0  ;;  %v861_v39 = vadd.f32 %v860_v31, %v5739_v59  ;;  %v2989_v59 = vshll.u32 %v5639_v44, 16  ;;  %v3355_v45 = vsel %vm3342_vm7, %v3352_v17, %v3354_v58  ;;  %v2975_v60 = vsel %vm2895_vm8, %v2965_v9, %v2974_v15 }
 0x123   : > { %v5848_v42 = vadd.f32 %v1122_v6, %v845_v48  ;;  %v4556_v30 = vpop.f32.mrf.mxu1  ;;  %4771 = vmatmul.mubr.msk.bf16.gmra.mxu1 %vm481_vm3, %v2957_v22  ;;  %v3356_v48 = vrot.slane %v5585_v27, 3  ;;  %v2983_v51 = vor.u32 %v2982_v18, %v2979_v52  ;;  %v3004_v52 = vshrl.u32 %v5671_v63, 16 }
 0x124   : > { %v4590_v7 = vpop.f32.mrf.mxu0  ;;  %4805 = vmatmul.mubr.msk.bf16.gmra.mxu0 %vm481_vm3, %v3351_v56  ;;  %4774 = vmatprep.mubr.msk.bf16.mxu1 %vm481_vm3, %v2966_v12  ;;  %v2991_v6 = vrot.slane %v2989_v59, 3  ;;  %v3360_v12 = vrot.slane %v5615_v37, 3  ;;  %v3007_v18 = vshll.u32 %v5671_v63, 16 }
 0x125   : > { %v5854_v29 = vadd.f32 %v4590_v7, %v866_v26  ;;  %4808 = vmatprep.mubr.msk.bf16.mxu0 %vm481_vm3, %v3353_v35  ;;  %v873_v24 = vpop.f32.mrf.mxu1  ;;  %v2998_v26 = vshll.u32 %v5647_v43, 16  ;;  %v3357_v46 = vsel %vm3342_vm7, %v3354_v58, %v3356_v48  ;;  %v2984_v16 = vsel %vm2895_vm8, %v2974_v15, %v2983_v51 }
 0x126   : > { %v1135_v57 = vpop.f32.mrf.mxu0  ;;  %v874_v22 = vadd.f32 %v873_v24, %v5601_v0  ;;  %v2992_v0 = vor.u32 %v2991_v6, %v2988_v50  ;;  %v3013_v15 = vshrl.u32 %v5679_v8, 16 }
 0x127   : > { %v5860_v61 = vadd.f32 %v1135_v57, %v858_v53  ;;  %v4557_v27 = vpop.f32.mrf.mxu1  ;;  %v882_v53 = vadd.f32 %v4556_v30, %v5592_v33  ;;  %v3000_v17 = vrot.slane %v2998_v26, 3  ;;  %v3358_v33 = vrot.slane %v5607_v47, 3 }
 0x128   : > { %v4591_v55 = vpop.f32.mrf.mxu0  ;;  %v3006_v26 = vrot.slane %v3004_v52, 2  ;;  %v3015_v50 = vrot.slane %v3013_v15, 2 }
 0x129   : > { %v5867_v49 = vadd.f32 %v4591_v55, %v869_v25  ;;  %v876_v35 = vpop.f32.mrf.mxu1  ;;  %v2997_v25 = vrot.slane %v2995_v5, 2  ;;  %v3359_v24 = vsel %vm3342_vm7, %v3356_v48, %v3358_v33  ;;  %v3361_v5 = vsel %vm3342_vm7, %v3358_v33, %v3360_v12 }
 0x12a   : > { %v1138_v54 = vpop.f32.mrf.mxu0  ;;  %v877_v37 = vadd.f32 %v876_v35, %v5617_v21  ;;  %v3018_v48 = vrot.slane %v3016_v36, 3 }
 0x12b   : > { %v5873_v56 = vadd.f32 %v1138_v54, %v861_v39  ;;  %v4560_v9 = vpop.f32.mrf.mxu1  ;;  %4775 = vmatmul.mubr.msk.bf16.gmra.mxu1 %vm481_vm3, %v2975_v60  ;;  %v885_v39 = vadd.f32 %v4557_v27, %v5609_v1  ;;  %v3001_v47 = vor.u32 %v3000_v17, %v2997_v25  ;;  %v2993_v60 = vsel %vm2895_vm8, %v2983_v51, %v2992_v0  ;;  %v6438_v17 = vld [vmem:[#allocation2_spill] sm:$0xff] }
 0x12c   : > { %v4594_v20 = vpop.f32.mrf.mxu0  ;;  %4809 = vmatmul.mubr.msk.bf16.gmra.mxu0 %vm481_vm3, %v3355_v45  ;;  %4778 = vmatprep.mubr.msk.bf16.mxu1 %vm481_vm3, %v2984_v16  ;;  %v3009_v45 = vrot.slane %v3007_v18, 3  ;;  %v898_v27 = vadd.f32 %v4560_v9, %v5624_v38  ;;  %v3362_v38 = vrot.slane %v5639_v44, 3  ;;  %v3364_v25 = vrot.slane %v5647_v43, 3 }
 0x12d   : > { %v5878_v31 = vadd.f32 %v4594_v20, %v882_v53  ;;  %4812 = vmatprep.mubr.msk.bf16.mxu0 %vm481_vm3, %v3357_v46  ;;  %v889_v30 = vpop.f32.mrf.mxu1  ;;  %v3002_v21 = vsel %vm2895_vm8, %v2992_v0, %v3001_v47  ;;  %v3019_v44 = vor.u32 %v3018_v48, %v3015_v50  ;;  %v6443_v48 = vld [vmem:[#allocation5_spill] sm:$0xff] }
 0x12e   : > { %v1151_v7 = vpop.f32.mrf.mxu0  ;;  %v890_v6 = vadd.f32 %v889_v30, %v5633_v14  ;;  %v3010_v16 = vor.u32 %v3009_v45, %v3006_v26  ;;  %v6439_v14 = vld [vmem:[#allocation10_spill] sm:$0xff]  ;;  %v3363_v36 = vsel %vm3342_vm7, %v3360_v12, %v3362_v38 }
 0x12f   : > { %v5887_v58 = vadd.f32 %v1151_v7, %v874_v22  ;;  %v4561_v55 = vpop.f32.mrf.mxu1  ;;  %v3022_v9 = vshrl.u32 %v6439_v14, 16  ;;  %v3025_v7 = vshll.u32 %v6439_v14, 16 }
 0x130   : > { %v4595_v57 = vpop.f32.mrf.mxu0  ;;  %v901_v22 = vadd.f32 %v4561_v55, %v6438_v17  ;;  %v3011_v55 = vsel %vm2895_vm8, %v3001_v47, %v3010_v16  ;;  %v3366_v47 = vrot.slane %v5671_v63, 3  ;;  %v3368_v17 = vrot.slane %v5679_v8, 3  ;;  %v6446_v8 = vld [vmem:[#allocation7_spill] sm:$0xff] }
 0x131   : > { %v5893_v59 = vadd.f32 %v4595_v57, %v885_v39  ;;  %v892_v46 = vpop.f32.mrf.mxu1  ;;  %v6440_v39 = vld [vmem:[#allocation12_spill] sm:$0xff]  ;;  %v6441_v57 = vld [vmem:[#allocation3_spill] sm:$0xff] }
 0x132   : > { %v1154_v1 = vpop.f32.mrf.mxu0  ;;  %v3031_v0 = vshrl.u32 %v6440_v39, 16  ;;  %v3034_v30 = vshll.u32 %v6440_v39, 16  ;;  %v893_v15 = vadd.f32 %v892_v46, %v6441_v57  ;;  %v3020_v46 = vsel %vm2895_vm8, %v3010_v16, %v3019_v44  ;;  %v6445_v57 = vld [vmem:[#allocation14_spill] sm:$0xff] }
 0x133   : > { %v5898_v54 = vadd.f32 %v1154_v1, %v877_v37  ;;  %v4564_v20 = vpop.f32.mrf.mxu1  ;;  %4779 = vmatmul.mubr.msk.bf16.gmra.mxu1 %vm481_vm3, %v2993_v60  ;;  %v3365_v1 = vsel %vm3342_vm7, %v3362_v38, %v3364_v25  ;;  %v3027_v60 = vrot.slane %v3025_v7, 3  ;;  %v3043_v16 = vshll.u32 %v5737_v3, 16 }
 0x134   : > { %v4598_v53 = vpop.f32.mrf.mxu0  ;;  %4813 = vmatmul.mubr.msk.bf16.gmra.mxu0 %vm481_vm3, %v3359_v24  ;;  %4782 = vmatprep.mubr.msk.bf16.mxu1 %vm481_vm3, %v3002_v21  ;;  %v3033_v50 = vrot.slane %v3031_v0, 2  ;;  %v3036_v12 = vrot.slane %v3034_v30, 3 }
 0x135   : > { %v5904_v35 = vadd.f32 %v4598_v53, %v898_v27  ;;  %4816 = vmatprep.mubr.msk.bf16.mxu0 %vm481_vm3, %v3361_v5  ;;  %v905_v52 = vpop.f32.mrf.mxu1  ;;  %v6442_v5 = vld [vmem:[#allocation4_spill] sm:$0xff]  ;;  %v3024_v27 = vrot.slane %v3022_v9, 2  ;;  %v6444_v9 = vld [vmem:[#allocation6_spill] sm:$0xff] }
 0x136   : > { %v1167_v51 = vpop.f32.mrf.mxu0  ;;  %v914_v26 = vadd.f32 %v4564_v20, %v6442_v5  ;;  %v3037_v30 = vor.u32 %v3036_v12, %v3033_v50 }
 0x137   : > { %v5911_v33 = vadd.f32 %v1167_v51, %v890_v6  ;;  %v4565_v37 = vpop.f32.mrf.mxu1  ;;  %v906_v6 = vadd.f32 %v905_v52, %v6443_v48  ;;  %v3028_v52 = vor.u32 %v3027_v60, %v3024_v27  ;;  %v5950_v27 = vld [vmem:[%s4977_s26 + $0xa0] ss:$0 sps:$4 sm:$0x77]   ;;  %v6447_v60 = vld [vmem:[#allocation8_spill] sm:$0xff] }
 0x138   : > { %v4599_v18 = vpop.f32.mrf.mxu0  ;;  %v917_v7 = vadd.f32 %v4565_v37, %v6444_v9 }
 0x139   : > { %v5919_v43 = vadd.f32 %v4599_v18, %v901_v22  ;;  %v908_v53 = vpop.f32.mrf.mxu1  ;;  %v3040_v22 = vshrl.u32 %v5737_v3, 16  ;;  %v3029_v48 = vsel %vm2895_vm8, %v3019_v44, %v3028_v52 }
 0x13a   : > { %v1170_v24 = vpop.f32.mrf.mxu0 }
 0x13b   : > { %v5925_v45 = vadd.f32 %v1170_v24, %v893_v15  ;;  %v4568_v38 = vpop.f32.mrf.mxu1  ;;  %4783 = vmatmul.mubr.msk.bf16.gmra.mxu1 %vm481_vm3, %v3011_v55  ;;  %v3049_v15 = vshrl.u32 %v6445_v57, 16  ;;  %v909_v24 = vadd.f32 %v908_v53, %v6446_v8  ;;  %v3372_v8 = vrot.slane %v6440_v39, 3 }
 0x13c   : > { %v4602_v21 = vpop.f32.mrf.mxu0  ;;  %4817 = vmatmul.mubr.msk.bf16.gmra.mxu0 %vm481_vm3, %v3363_v36  ;;  %4786 = vmatprep.mubr.msk.bf16.mxu1 %vm481_vm3, %v3020_v46  ;;  %v3052_v36 = vshll.u32 %v6445_v57, 16  ;;  %v3045_v46 = vrot.slane %v3043_v16, 3  ;;  %v930_v50 = vadd.f32 %v4568_v38, %v6447_v60  ;;  %v3370_v38 = vrot.slane %v6439_v14, 3 }
 0x13d   : > { %v5930_v51 = vadd.f32 %v4602_v21, %v914_v26  ;;  %4820 = vmatprep.mubr.msk.bf16.mxu0 %vm481_vm3, %v3365_v1  ;;  %v921_v0 = vpop.f32.mrf.mxu1  ;;  %v3367_v1 = vsel %vm3342_vm7, %v3364_v25, %v3366_v47  ;;  %v3369_v26 = vsel %vm3342_vm7, %v3366_v47, %v3368_v17  ;;  %v3042_v21 = vrot.slane %v3040_v22, 2 }
 0x13e   : > { %v1183_v20 = vpop.f32.mrf.mxu0  ;;  %v3038_v25 = vsel %vm2895_vm8, %v3028_v52, %v3037_v30  ;;  %v3054_v9 = vrot.slane %v3052_v36, 3  ;;  %v6449_v52 = vld [vmem:[#allocation11_spill] sm:$0xff] }
 0x13f   : > { %v5939_v18 = vadd.f32 %v1183_v20, %v906_v6  ;;  %v4569_v37 = vpop.f32.mrf.mxu1  ;;  %v3051_v20 = vrot.slane %v3049_v15, 2  ;;  %v6450_v36 = vld [vmem:[#allocation15_spill] sm:$0xff] }
 0x140   : > { %v4603_v63 = vpop.f32.mrf.mxu0  ;;  %v933_v15 = vadd.f32 %v4569_v37, %v6449_v52 }
 0x141   : > { %v5945_v55 = vadd.f32 %v4603_v63, %v917_v7  ;;  %v924_v6 = vpop.f32.mrf.mxu1  ;;  %v6448_v7 = vld [vmem:[#allocation9_spill] sm:$0xff]  ;;  %v3046_v63 = vor.u32 %v3045_v46, %v3042_v21  ;;  %v3055_v60 = vor.u32 %v3054_v9, %v3051_v20  ;;  %v6452_v21 = vld [vmem:[#allocation16_spill] sm:$0xff] }
 0x142   : > { %v1186_v5 = vpop.f32.mrf.mxu0  ;;  %v922_v47 = vadd.f32 %v921_v0, %v6448_v7 }
 0x143   : > { %v5953_v12 = vadd.f32 %v1186_v5, %v909_v24  ;;  %v4612_v16 = vpop.f32.mrf.mxu1  ;;  %4787 = vmatmul.mubr.msk.bf16.gmra.mxu1 %vm481_vm3, %v3029_v48  ;;  %v3058_v24 = vshrl.u32 %v5950_v27, 16  ;;  %v3061_v5 = vshll.u32 %v5950_v27, 16 }
 0x144   : > { %v4606_v53 = vpop.f32.mrf.mxu0  ;;  %4821 = vmatmul.mubr.msk.bf16.gmra.mxu0 %vm481_vm3, %v3367_v1  ;;  %v1655_v1 = vadd.f32 %v4612_v16, %v6450_v36  ;;  %4790 = vmatprep.mubr.msk.bf16.mxu1 %vm481_vm3, %v3038_v25  ;;  %v3373_v16 = vsel %vm3342_vm7, %v3370_v38, %v3372_v8 }
 0x145   : > { %v5959_v22 = vadd.f32 %v4606_v53, %v930_v50  ;;  %4824 = vmatprep.mubr.msk.bf16.mxu0 %vm481_vm3, %v3369_v26  ;;  %v1510_v14 = vpop.f32.mrf.mxu1  ;;  %v6451_v50 = vld [vmem:[#allocation13_spill] sm:$0xff]  ;;  %v3371_v53 = vsel %vm3342_vm7, %v3368_v17, %v3370_v38  ;;  %v3060_v52 = vrot.slane %v3058_v24, 2  ;;  %v3063_v20 = vrot.slane %v3061_v5, 3 }
 0x146   : > { %v1199_v44 = vpop.f32.mrf.mxu0  ;;  %v925_v48 = vadd.f32 %v924_v6, %v6451_v50  ;;  %v1653_v46 = vadd.f32 %v1510_v14, %v6452_v21  ;;  %v3376_v24 = vrot.slane %v6445_v57, 3 }
 0x147   : > { %v5968_v0 = vadd.f32 %v1199_v44, %v922_v47  ;;  %v4613_v37 = vpop.f32.mrf.mxu1  ;;  %v3047_v47 = vsel %vm2895_vm8, %v3037_v30, %v3046_v63  ;;  %v3374_v30 = vrot.slane %v5737_v3, 3 }
 0x148   : > { %v4607_v26 = vpop.f32.mrf.mxu0  ;;  %v1656_v25 = vadd.f32 %v4613_v37, %v5765_v28 }
 0x149   : > { %v5974_v39 = vadd.f32 %v4607_v26, %v933_v15  ;;  %v1513_v9 = vpop.f32.mrf.mxu1  ;;  %v3056_v15 = vsel %vm2895_vm8, %v3046_v63, %v3055_v60  ;;  %v3064_v63 = vor.u32 %v3063_v20, %v3060_v52  ;;  %v3375_v3 = vsel %vm3342_vm7, %v3372_v8, %v3374_v30 }
 0x14a   : > { %v1202_v7 = vpop.f32.mrf.mxu0  ;;  %v1654_v17 = vadd.f32 %v1513_v9, %v5771_v32  ;;  %v3378_v8 = vrot.slane %v5950_v27, 3 }
 0x14b   : > { %v5980_v44 = vadd.f32 %v1202_v7, %v925_v48  ;;  %v4616_v38 = vpop.f32.mrf.mxu1  ;;  %4791 = vmatmul.mubr.msk.bf16.gmra.mxu1 %vm481_vm3, %v3047_v47 }
 0x14c   : > { %v4650_v6 = vpop.f32.mrf.mxu0  ;;  %4825 = vmatmul.mubr.msk.bf16.gmra.mxu0 %vm481_vm3, %v3371_v53  ;;  %v1659_v5 = vadd.f32 %v4616_v38, %v5776_v34  ;;  %4794 = vmatprep.mubr.msk.bf16.mxu1 %vm481_vm3, %v3056_v15  ;;  %v3377_v53 = vsel %vm3342_vm7, %v3374_v30, %v3376_v24 }
 0x14d   : > { %v5985_v36 = vadd.f32 %v4650_v6, %v1655_v1  ;;  %4828 = vmatprep.mubr.msk.bf16.mxu0 %vm481_vm3, %v3373_v16  ;;  %v1526_v32 = vpop.f32.mrf.mxu1 }
 0x14e   : > { %v1957_v28 = vpop.f32.mrf.mxu0  ;;  %v1657_v26 = vadd.f32 %v1526_v32, %v5784_v10 }
 0x14f   : > { %v5992_v14 = vadd.f32 %v1957_v28, %v1653_v46  ;;  %v4617_v48 = vpop.f32.mrf.mxu1  ;;  %v3065_v46 = vsel %vm2895_vm8, %v3055_v60, %v3064_v63 }
 0x150   : > { %v4651_v1 = vpop.f32.mrf.mxu0  ;;  %v1660_v57 = vadd.f32 %v4617_v48, %v5790_v41 }
 0x151   : > { %v5996_v50 = vadd.f32 %v4651_v1, %v1656_v25  ;;  %v1529_v37 = vpop.f32.mrf.mxu1 }
 0x152   : > { %v1960_v21 = vpop.f32.mrf.mxu0  ;;  %v1658_v10 = vadd.f32 %v1529_v37, %v5794_v11  ;;  %v3379_v11 = vsel %vm3342_vm7, %v3376_v24, %v3378_v8 }
 0x153   : > { %v6001_v34 = vadd.f32 %v1960_v21, %v1654_v17  ;;  %v4620_v16 = vpop.f32.mrf.mxu1  ;;  %4795 = vmatmul.mubr.msk.bf16.gmra.mxu1 %vm481_vm3, %v3065_v46 }
 0x154   : > { %v4654_v7 = vpop.f32.mrf.mxu0  ;;  %4829 = vmatmul.mubr.msk.bf16.gmra.mxu0 %vm481_vm3, %v3375_v3  ;;  %v1663_v25 = vadd.f32 %v4620_v16, %v5800_v19 }
 0x155   : > { %v6006_v47 = vadd.f32 %v4654_v7, %v1659_v5  ;;  %4832 = vmatprep.mubr.msk.bf16.mxu0 %vm481_vm3, %v3377_v53  ;;  %v1542_v60 = vpop.f32.mrf.mxu1 }
 0x156   : > { %v1973_v41 = vpop.f32.mrf.mxu0  ;;  %v1661_v9 = vadd.f32 %v1542_v60, %v5807_v40 }
 0x157   : > { %v6012_v52 = vadd.f32 %v1973_v41, %v1657_v26  ;;  %v4621_v15 = vpop.f32.mrf.mxu1 }
 0x158   : > { %v4655_v20 = vpop.f32.mrf.mxu0  ;;  %v1664_v27 = vadd.f32 %v4621_v15, %v5815_v13 }
 0x159   : > { %v6015_v6 = vadd.f32 %v4655_v20, %v1660_v57  ;;  %v1545_v38 = vpop.f32.mrf.mxu1 }
 0x15a   : > { %v1976_v17 = vpop.f32.mrf.mxu0  ;;  %v1662_v19 = vadd.f32 %v1545_v38, %v5822_v23 }
 0x15b   : > { %v6019_v30 = vadd.f32 %v1976_v17, %v1658_v10  ;;  %v4624_v63 = vpop.f32.mrf.mxu1 }
 0x15c   : > { %v4658_v28 = vpop.f32.mrf.mxu0  ;;  %4833 = vmatmul.mubr.msk.bf16.gmra.mxu0 %vm481_vm3, %v3379_v11  ;;  %v1667_v32 = vadd.f32 %v4624_v63, %v5828_v4 }
 0x15d   : > { %v6023_v5 = vadd.f32 %v4658_v28, %v1663_v25  ;;  %v1558_v24 = vpop.f32.mrf.mxu1 }
 0x15e   : > { %v1989_v40 = vpop.f32.mrf.mxu0  ;;  %v1665_v13 = vadd.f32 %v1558_v24, %v5837_v62 }
 0x15f   : > { %v6026_v1 = vadd.f32 %v1989_v40, %v1661_v9  ;;  %v4625_v48 = vpop.f32.mrf.mxu1 }
 0x160   : > { %v4659_v26 = vpop.f32.mrf.mxu0  ;;  %v1668_v53 = vadd.f32 %v4625_v48, %v5843_v2 }
 0x161   : > { %v6029_v3 = vadd.f32 %v4659_v26, %v1664_v27  ;;  %v1561_v23 = vpop.f32.mrf.mxu1 }
 0x162   : > { %v1992_v21 = vpop.f32.mrf.mxu0  ;;  %v1666_v37 = vadd.f32 %v1561_v23, %v5848_v42 }
 0x163   : > { %v6032_v57 = vadd.f32 %v1992_v21, %v1662_v19  ;;  %v4628_v4 = vpop.f32.mrf.mxu1 }
 0x164   : > { %v4662_v46 = vpop.f32.mrf.mxu0  ;;  %v1671_v8 = vadd.f32 %v4628_v4, %v5854_v29 }
 0x165   : > { %v6035_v7 = vadd.f32 %v4662_v46, %v1667_v32  ;;  %v1574_v62 = vpop.f32.mrf.mxu1 }
 0x166   : > { %v2005_v10 = vpop.f32.mrf.mxu0  ;;  %v1669_v25 = vadd.f32 %v1574_v62, %v5860_v61 }
 0x167   : > { %v6038_v16 = vadd.f32 %v2005_v10, %v1665_v13  ;;  %v4629_v2 = vpop.f32.mrf.mxu1 }
 0x168   : > { %v4663_v41 = vpop.f32.mrf.mxu0  ;;  %v1672_v9 = vadd.f32 %v4629_v2, %v5867_v49 }
 0x169   : > { %v6041_v60 = vadd.f32 %v4663_v41, %v1668_v53  ;;  %v1577_v42 = vpop.f32.mrf.mxu1 }
 0x16a   : > { %v2008_v20 = vpop.f32.mrf.mxu0  ;;  %v1670_v17 = vadd.f32 %v1577_v42, %v5873_v56 }
 0x16b   : > { %v6044_v11 = vadd.f32 %v2008_v20, %v1666_v37  ;;  %v4632_v29 = vpop.f32.mrf.mxu1 }
 0x16c   : > { %v4666_v15 = vpop.f32.mrf.mxu0  ;;  %v1675_v28 = vadd.f32 %v4632_v29, %v5878_v31 }
 0x16d   : > { %v6047_v27 = vadd.f32 %v4666_v15, %v1671_v8  ;;  %v1590_v61 = vpop.f32.mrf.mxu1 }
 0x16e   : > { %v2021_v38 = vpop.f32.mrf.mxu0  ;;  %v1673_v40 = vadd.f32 %v1590_v61, %v5887_v58 }
 0x16f   : > { %v6050_v19 = vadd.f32 %v2021_v38, %v1669_v25  ;;  %v4633_v49 = vpop.f32.mrf.mxu1 }
 0x170   : > { %v4667_v63 = vpop.f32.mrf.mxu0  ;;  %v1676_v26 = vadd.f32 %v4633_v49, %v5893_v59 }
 0x171   : > { %v6053_v32 = vadd.f32 %v4667_v63, %v1672_v9  ;;  %v1593_v56 = vpop.f32.mrf.mxu1 }
 0x172   : > { %v2024_v24 = vpop.f32.mrf.mxu0  ;;  %v1674_v21 = vadd.f32 %v1593_v56, %v5898_v54 }
 0x173   : > { %v6056_v13 = vadd.f32 %v2024_v24, %v1670_v17  ;;  %v4636_v31 = vpop.f32.mrf.mxu1 }
 0x174   : > { %v4670_v48 = vpop.f32.mrf.mxu0  ;;  %v1679_v46 = vadd.f32 %v4636_v31, %v5904_v35 }
 0x175   : > { %v6059_v53 = vadd.f32 %v4670_v48, %v1675_v28  ;;  %v1606_v58 = vpop.f32.mrf.mxu1 }
 0x176   : > { %v2037_v23 = vpop.f32.mrf.mxu0  ;;  %v1677_v10 = vadd.f32 %v1606_v58, %v5911_v33 }
 0x177   : > { %v6062_v37 = vadd.f32 %v2037_v23, %v1673_v40  ;;  %v4637_v59 = vpop.f32.mrf.mxu1 }
 0x178   : > { %v4671_v4 = vpop.f32.mrf.mxu0  ;;  %v1680_v41 = vadd.f32 %v4637_v59, %v5919_v43 }
 0x179   : > { %v6065_v8 = vadd.f32 %v4671_v4, %v1676_v26  ;;  %v1609_v54 = vpop.f32.mrf.mxu1 }
 0x17a   : > { %v2040_v62 = vpop.f32.mrf.mxu0  ;;  %v1678_v20 = vadd.f32 %v1609_v54, %v5925_v45 }
 0x17b   : > { %v6068_v25 = vadd.f32 %v2040_v62, %v1674_v21  ;;  %v4640_v35 = vpop.f32.mrf.mxu1 }
 0x17c   : > { %v4674_v2 = vpop.f32.mrf.mxu0  ;;  %v1683_v15 = vadd.f32 %v4640_v35, %v5930_v51 }
 0x17d   : > { %v6071_v9 = vadd.f32 %v4674_v2, %v1679_v46  ;;  %v1622_v33 = vpop.f32.mrf.mxu1 }
 0x17e   : > { %v2053_v42 = vpop.f32.mrf.mxu0  ;;  %v1681_v38 = vadd.f32 %v1622_v33, %v5939_v18 }
 0x17f   : > { %v6074_v17 = vadd.f32 %v2053_v42, %v1677_v10  ;;  %v4641_v43 = vpop.f32.mrf.mxu1 }
 0x180   : > { %v4675_v29 = vpop.f32.mrf.mxu0  ;;  %v1684_v63 = vadd.f32 %v4641_v43, %v5945_v55 }
 0x181   : > { %v6077_v28 = vadd.f32 %v4675_v29, %v1680_v41  ;;  %v1625_v45 = vpop.f32.mrf.mxu1 }
 0x182   : > { %v2056_v61 = vpop.f32.mrf.mxu0  ;;  %v1682_v24 = vadd.f32 %v1625_v45, %v5953_v12 }
 0x183   : > { %v6080_v40 = vadd.f32 %v2056_v61, %v1678_v20  ;;  %v4644_v51 = vpop.f32.mrf.mxu1 }
 0x184   : > { %v4678_v49 = vpop.f32.mrf.mxu0  ;;  %v1687_v48 = vadd.f32 %v4644_v51, %v5959_v22 }
 0x185   : > { %v6083_v26 = vadd.f32 %v4678_v49, %v1683_v15  ;;  %v1638_v18 = vpop.f32.mrf.mxu1 }
 0x186   : > { %v2069_v56 = vpop.f32.mrf.mxu0  ;;  %v1685_v23 = vadd.f32 %v1638_v18, %v5968_v0 }
 0x187   : > { %v6086_v21 = vadd.f32 %v2069_v56, %v1681_v38  ;;  %v4645_v55 = vpop.f32.mrf.mxu1 }
 0x188   : > { %v4679_v31 = vpop.f32.mrf.mxu0  ;;  %v1688_v4 = vadd.f32 %v4645_v55, %v5974_v39 }
 0x189   : > { %v6089_v46 = vadd.f32 %v4679_v31, %v1684_v63  ;;  %v1641_v12 = vpop.f32.mrf.mxu1 }
 0x18a   : > { %v2072_v58 = vpop.f32.mrf.mxu0  ;;  %v1686_v62 = vadd.f32 %v1641_v12, %v5980_v44 }
 0x18b   : > { %v6092_v10 = vadd.f32 %v2072_v58, %v1682_v24  ;;  %v4688_v22 = vpop.f32.mrf.mxu1 }
 0x18c   : > { %v4682_v59 = vpop.f32.mrf.mxu0  ;;  %v2416_v2 = vadd.f32 %v4688_v22, %v5985_v36 }
 0x18d   : > { %v6095_v41 = vadd.f32 %v4682_v59, %v1687_v48  ;;  %v2271_v0 = vpop.f32.mrf.mxu1 }
 0x18e   : > { %v2085_v54 = vpop.f32.mrf.mxu0  ;;  %v2414_v42 = vadd.f32 %v2271_v0, %v5992_v14 }
 0x18f   : > { %v6098_v20 = vadd.f32 %v2085_v54, %v1685_v23  ;;  %v4689_v39 = vpop.f32.mrf.mxu1 }
 0x190   : > { %v4683_v35 = vpop.f32.mrf.mxu0  ;;  %v2417_v29 = vadd.f32 %v4689_v39, %v5996_v50 }
 0x191   : > { %v6101_v15 = vadd.f32 %v4683_v35, %v1688_v4  ;;  %v2274_v44 = vpop.f32.mrf.mxu1 }
 0x192   : > { %v2088_v33 = vpop.f32.mrf.mxu0  ;;  %v2415_v61 = vadd.f32 %v2274_v44, %v6001_v34 }
 0x193   : > { %v6104_v38 = vadd.f32 %v2088_v33, %v1686_v62  ;;  %v4692_v36 = vpop.f32.mrf.mxu1 }
 0x194   : > { %v4726_v43 = vpop.f32.mrf.mxu0  ;;  %v2420_v49 = vadd.f32 %v4692_v36, %v6006_v47 }
 0x195   : > { %v6107_v63 = vadd.f32 %v4726_v43, %v2416_v2  ;;  %v2287_v14 = vpop.f32.mrf.mxu1 }
 0x196   : > { %v2710_v45 = vpop.f32.mrf.mxu0  ;;  %v2418_v56 = vadd.f32 %v2287_v14, %v6012_v52 }
 0x197   : > { %v6110_v24 = vadd.f32 %v2710_v45, %v2414_v42  ;;  %v4693_v50 = vpop.f32.mrf.mxu1 }
 0x198   : > { %v4727_v51 = vpop.f32.mrf.mxu0  ;;  %v2421_v31 = vadd.f32 %v4693_v50, %v6015_v6 }
 0x199   : > { %v6113_v48 = vadd.f32 %v4727_v51, %v2417_v29  ;;  %v2290_v34 = vpop.f32.mrf.mxu1 }
 0x19a   : > { %v2713_v18 = vpop.f32.mrf.mxu0  ;;  %v2419_v58 = vadd.f32 %v2290_v34, %v6019_v30 }
 0x19b   : > { %v6116_v23 = vadd.f32 %v2713_v18, %v2415_v61  ;;  %v4696_v47 = vpop.f32.mrf.mxu1 }
 0x19c   : > { %v4730_v55 = vpop.f32.mrf.mxu0  ;;  %v2424_v59 = vadd.f32 %v4696_v47, %v6023_v5 }
 0x19d   : > { %v6119_v4 = vadd.f32 %v4730_v55, %v2420_v49  ;;  %v2303_v52 = vpop.f32.mrf.mxu1 }
 0x19e   : > { %v2726_v12 = vpop.f32.mrf.mxu0  ;;  %v2422_v54 = vadd.f32 %v2303_v52, %v6026_v1 }
 0x19f   : > { %v6122_v62 = vadd.f32 %v2726_v12, %v2418_v56  ;;  %v4697_v6 = vpop.f32.mrf.mxu1 }
 0x1a0   : > { %v4731_v22 = vpop.f32.mrf.mxu0  ;;  %v2425_v35 = vadd.f32 %v4697_v6, %v6029_v3 }
 0x1a1   : > { %v6125_v2 = vadd.f32 %v4731_v22, %v2421_v31  ;;  %v2306_v30 = vpop.f32.mrf.mxu1 }
 0x1a2   : > { %v2729_v0 = vpop.f32.mrf.mxu0  ;;  %v2423_v33 = vadd.f32 %v2306_v30, %v6032_v57 }
 0x1a3   : > { %v6128_v42 = vadd.f32 %v2729_v0, %v2419_v58  ;;  %v4700_v5 = vpop.f32.mrf.mxu1 }
 0x1a4   : > { %v4734_v39 = vpop.f32.mrf.mxu0  ;;  %v2428_v43 = vadd.f32 %v4700_v5, %v6035_v7 }
 0x1a5   : > { %v6131_v29 = vadd.f32 %v4734_v39, %v2424_v59  ;;  %v2319_v1 = vpop.f32.mrf.mxu1 }
 0x1a6   : > { %v2742_v44 = vpop.f32.mrf.mxu0  ;;  %v2426_v45 = vadd.f32 %v2319_v1, %v6038_v16 }
 0x1a7   : > { %v6134_v61 = vadd.f32 %v2742_v44, %v2422_v54  ;;  %v4701_v3 = vpop.f32.mrf.mxu1 }
 0x1a8   : > { %v4735_v36 = vpop.f32.mrf.mxu0  ;;  %v2429_v51 = vadd.f32 %v4701_v3, %v6041_v60 }
 0x1a9   : > { %v6137_v49 = vadd.f32 %v4735_v36, %v2425_v35  ;;  %v2322_v57 = vpop.f32.mrf.mxu1 }
 0x1aa   : > { %v2745_v14 = vpop.f32.mrf.mxu0  ;;  %v2427_v18 = vadd.f32 %v2322_v57, %v6044_v11 }
 0x1ab   : > { %v6140_v56 = vadd.f32 %v2745_v14, %v2423_v33  ;;  %v4704_v7 = vpop.f32.mrf.mxu1 }
 0x1ac   : > { %v4738_v50 = vpop.f32.mrf.mxu0  ;;  %v2432_v55 = vadd.f32 %v4704_v7, %v6047_v27 }
 0x1ad   : > { %v6143_v31 = vadd.f32 %v4738_v50, %v2428_v43  ;;  %v2335_v16 = vpop.f32.mrf.mxu1 }
 0x1ae   : > { %v2758_v34 = vpop.f32.mrf.mxu0  ;;  %v2430_v12 = vadd.f32 %v2335_v16, %v6050_v19 }
 0x1af   : > { %v6146_v58 = vadd.f32 %v2758_v34, %v2426_v45  ;;  %v4705_v60 = vpop.f32.mrf.mxu1 }
 0x1b0   : > { %v4739_v47 = vpop.f32.mrf.mxu0  ;;  %v2433_v22 = vadd.f32 %v4705_v60, %v6053_v32 }
 0x1b1   : > { %v6149_v59 = vadd.f32 %v4739_v47, %v2429_v51  ;;  %v2338_v11 = vpop.f32.mrf.mxu1 }
 0x1b2   : > { %v2761_v52 = vpop.f32.mrf.mxu0  ;;  %v2431_v0 = vadd.f32 %v2338_v11, %v6056_v13 }
 0x1b3   : > { %v6152_v54 = vadd.f32 %v2761_v52, %v2427_v18  ;;  %v4708_v27 = vpop.f32.mrf.mxu1 }
 0x1b4   : > { %v4742_v6 = vpop.f32.mrf.mxu0  ;;  %v2436_v39 = vadd.f32 %v4708_v27, %v6059_v53 }
 0x1b5   : > { %v6155_v35 = vadd.f32 %v4742_v6, %v2432_v55  ;;  %v2351_v19 = vpop.f32.mrf.mxu1 }
 0x1b6   : > { %v2774_v30 = vpop.f32.mrf.mxu0  ;;  %v2434_v44 = vadd.f32 %v2351_v19, %v6062_v37 }
 0x1b7   : > { %v6158_v33 = vadd.f32 %v2774_v30, %v2430_v12  ;;  %v4709_v32 = vpop.f32.mrf.mxu1 }
 0x1b8   : > { %v4743_v5 = vpop.f32.mrf.mxu0  ;;  %v2437_v36 = vadd.f32 %v4709_v32, %v6065_v8 }
 0x1b9   : > { %v6161_v43 = vadd.f32 %v4743_v5, %v2433_v22  ;;  %v2354_v13 = vpop.f32.mrf.mxu1 }
 0x1ba   : > { %v2777_v1 = vpop.f32.mrf.mxu0  ;;  %v2435_v14 = vadd.f32 %v2354_v13, %v6068_v25 }
 0x1bb   : > { %v6164_v45 = vadd.f32 %v2777_v1, %v2431_v0  ;;  %v4712_v53 = vpop.f32.mrf.mxu1 }
 0x1bc   : > { %v4746_v3 = vpop.f32.mrf.mxu0  ;;  %v2440_v50 = vadd.f32 %v4712_v53, %v6071_v9 }
 0x1bd   : > { %v6167_v51 = vadd.f32 %v4746_v3, %v2436_v39  ;;  %v2367_v37 = vpop.f32.mrf.mxu1 }
 0x1be   : > { %v2790_v57 = vpop.f32.mrf.mxu0  ;;  %v2438_v34 = vadd.f32 %v2367_v37, %v6074_v17 }
 0x1bf   : > { %v6170_v18 = vadd.f32 %v2790_v57, %v2434_v44  ;;  %v4713_v8 = vpop.f32.mrf.mxu1 }
 0x1c0   : > { %v4747_v7 = vpop.f32.mrf.mxu0  ;;  %v2441_v47 = vadd.f32 %v4713_v8, %v6077_v28 }
 0x1c1   : > { %v6173_v55 = vadd.f32 %v4747_v7, %v2437_v36  ;;  %v2370_v25 = vpop.f32.mrf.mxu1 }
 0x1c2   : > { %v2793_v16 = vpop.f32.mrf.mxu0  ;;  %v2439_v52 = vadd.f32 %v2370_v25, %v6080_v40 }
 0x1c3   : > { %v6176_v12 = vadd.f32 %v2793_v16, %v2435_v14  ;;  %v4716_v9 = vpop.f32.mrf.mxu1 }
 0x1c4   : > { %v4750_v60 = vpop.f32.mrf.mxu0  ;;  %v2444_v6 = vadd.f32 %v4716_v9, %v6083_v26 }
 0x1c5   : > { %v6179_v22 = vadd.f32 %v4750_v60, %v2440_v50  ;;  %v2383_v17 = vpop.f32.mrf.mxu1 }
 0x1c6   : > { %v2806_v11 = vpop.f32.mrf.mxu0  ;;  %v2442_v30 = vadd.f32 %v2383_v17, %v6086_v21 }
 0x1c7   : > { %v6182_v0 = vadd.f32 %v2806_v11, %v2438_v34  ;;  %v4717_v28 = vpop.f32.mrf.mxu1 }
 0x1c8   : > { %v4751_v27 = vpop.f32.mrf.mxu0  ;;  %v2445_v5 = vadd.f32 %v4717_v28, %v6089_v46 }
 0x1c9   : > { %v6185_v39 = vadd.f32 %v4751_v27, %v2441_v47  ;;  %v2386_v40 = vpop.f32.mrf.mxu1 }
 0x1ca   : > { %v2809_v19 = vpop.f32.mrf.mxu0  ;;  %v2443_v1 = vadd.f32 %v2386_v40, %v6092_v10  ;;  %v6221_v40 = vld [vmem:[%s6413_s3] ss:$0 sm:$0xff] }
 0x1cb   : > { %v6188_v44 = vadd.f32 %v2809_v19, %v2439_v52  ;;  %v4720_v26 = vpop.f32.mrf.mxu1 }
 0x1cc   : > { %v4754_v32 = vpop.f32.mrf.mxu0  ;;  %v2448_v3 = vadd.f32 %v4720_v26, %v6095_v41 }
 0x1cd   : > { %v6191_v36 = vadd.f32 %v4754_v32, %v2444_v6  ;;  %v2399_v21 = vpop.f32.mrf.mxu1 }
 0x1ce   : > { %v2822_v13 = vpop.f32.mrf.mxu0  ;;  %v2446_v57 = vadd.f32 %v2399_v21, %v6098_v20 }
 0x1cf   : > { %v6194_v14 = vadd.f32 %v2822_v13, %v2442_v30  ;;  %v4721_v46 = vpop.f32.mrf.mxu1 }
 0x1d0   : > { %v4755_v53 = vpop.f32.mrf.mxu0  ;;  %v2449_v7 = vadd.f32 %v4721_v46, %v6101_v15 }
 0x1d1   : > { %v6197_v50 = vadd.f32 %v4755_v53, %v2445_v5  ;;  %v2402_v10 = vpop.f32.mrf.mxu1 }
 0x1d2   : > { %v2825_v37 = vpop.f32.mrf.mxu0  ;;  %v2447_v16 = vadd.f32 %v2402_v10, %v6104_v38  ;;  %v6215_v38 = vld [vmem:[%s6412_s2] ss:$0 sm:$0xff] }
 0x1d3   : > { %v6200_v34 = vadd.f32 %v2825_v37, %v2443_v1  ;;  %v4764_v41 = vpop.f32.mrf.mxu1 }
 0x1d4   : > { %v4758_v8 = vpop.f32.mrf.mxu0  ;;  %v3302_v15 = vadd.f32 %v4764_v41, %v6107_v63 }
 0x1d5   : > { %v6203_v47 = vadd.f32 %v4758_v8, %v2448_v3  ;;  %v3157_v52 = vpop.f32.mrf.mxu1 }
 0x1d6   : > { %v2838_v25 = vpop.f32.mrf.mxu0  ;;  %v3300_v28 = vadd.f32 %v3157_v52, %v6110_v24 }
 0x1d7   : > { %v6205_v60 = vadd.f32 %v2838_v25, %v2446_v57  ;;  %v4765_v11 = vpop.f32.mrf.mxu1 }
 0x1d8   : > { %v4759_v20 = vpop.f32.mrf.mxu0  ;;  %v3303_v63 = vadd.f32 %v4765_v11, %v6113_v48 }
 0x1d9   : > { %v6207_v9 = vadd.f32 %v4759_v20, %v2449_v7  ;;  %v3160_v27 = vpop.f32.mrf.mxu1 }
 0x1da   : > { %v2841_v6 = vpop.f32.mrf.mxu0  ;;  %v3301_v57 = vadd.f32 %v3160_v27, %v6116_v23 }
 0x1db   : > { %v6210_v17 = vadd.f32 %v2841_v6, %v2447_v16  ;;  %v4768_v5 = vpop.f32.mrf.mxu1 }
 0x1dc   : > { %v4802_v30 = vpop.f32.mrf.mxu0  ;;  %v3306_v8 = vadd.f32 %v4768_v5, %v6119_v4 }
 0x1dd   : > { %v3616_v19 = vadd.f32 %v4802_v30, %v3302_v15  ;;  %v3173_v13 = vpop.f32.mrf.mxu1 }
 0x1de   : > { %v3471_v32 = vpop.f32.mrf.mxu0  ;;  %v3304_v52 = vadd.f32 %v3173_v13, %v6122_v62 }
 0x1df   : > { %v3659_v1 = vmul.f32 %v6215_v38, %v3616_v19  ;;  %v3614_v26 = vadd.f32 %v3471_v32, %v3300_v28  ;;  %v4769_v46 = vpop.f32.mrf.mxu1 }
 0x1e0   : > { %v4803_v3 = vpop.f32.mrf.mxu0  ;;  %v3307_v28 = vadd.f32 %v4769_v46, %v6125_v2 }
 0x1e1   : > { %v3702_v21 = vadd.f32 %v6221_v40, %v3659_v1  ;;  %v3657_v24 = vmul.f32 %v6215_v38, %v3614_v26  ;;  %v3617_v53 = vadd.f32 %v4803_v3, %v3303_v63  ;;  %v3176_v16 = vpop.f32.mrf.mxu1 }
 0x1e2   : > { %v3474_v37 = vpop.f32.mrf.mxu0  ;;  %v3305_v13 = vadd.f32 %v3176_v16, %v6128_v42 }
 0x1e3   : > { %v3738_v7 = vmax.f32 %v3702_v21, 0.0  ;;  %v3700_v10 = vadd.f32 %v6221_v40, %v3657_v24  ;;  %v3660_v48 = vmul.f32 %v6215_v38, %v3617_v53  ;;  %v3615_v41 = vadd.f32 %v3474_v37, %v3301_v57  ;;  %v4772_v4 = vpop.f32.mrf.mxu1 }
 0x1e4   : > { %v4806_v25 = vpop.f32.mrf.mxu0 }
 0x1e5   : > { %v4289_v23 = vpack.c.bf16 %v3738_v7, %v3738_v7  ;;  %v3736_v20 = vmax.f32 %v3700_v10, 0.0  ;;  %v3703_v11 = vadd.f32 %v6221_v40, %v3660_v48  ;;  %v3658_v6 = vmul.f32 %v6215_v38, %v3615_v41  ;;  %v3189_v63 = vpop.f32.mrf.mxu1 }
 0x1e6   : > { %v3620_v15 = vadd.f32 %v4806_v25, %v3306_v8  ;;  %v3487_v27 = vpop.f32.mrf.mxu0  ;;  %v3310_v48 = vadd.f32 %v4772_v4, %v6131_v29 }
 0x1e7   : > { %3919 = vst.msk [vmem:[%s6235_s21 + $0x8] sm:$0xf] %vm3916_vm9, %v4289_v23  ;;  %v4287_v30 = vpack.c.bf16 %v3736_v20, %v3736_v20  ;;  %v3739_v19 = vmax.f32 %v3703_v11, 0.0  ;;  %v3618_v5 = vadd.f32 %v3487_v27, %v3304_v52  ;;  %v3701_v32 = vadd.f32 %v6221_v40, %v3658_v6  ;;  %v4773_v53 = vpop.f32.mrf.mxu1 }
 0x1e8   : > { %v3663_v62 = vmul.f32 %v6215_v38, %v3620_v15  ;;  %v4807_v1 = vpop.f32.mrf.mxu0  ;;  %v3308_v20 = vadd.f32 %v3189_v63, %v6134_v61  ;;  %v3311_v29 = vadd.f32 %v4773_v53, %v6137_v49 }
 0x1e9   : > { %3917 = vst.msk [vmem:[%s6235_s21] sm:$0xf] %vm3916_vm9, %v4287_v30  ;;  %v4290_v26 = vpack.c.bf16 %v3739_v19, %v3739_v19  ;;  %v3661_v3 = vmul.f32 %v6215_v38, %v3618_v5  ;;  %v3621_v21 = vadd.f32 %v4807_v1, %v3307_v28  ;;  %v3737_v24 = vmax.f32 %v3701_v32, 0.0  ;;  %v3192_v8 = vpop.f32.mrf.mxu1 }
 0x1ea   : > { %v3706_v2 = vadd.f32 %v6221_v40, %v3663_v62  ;;  %v3490_v57 = vpop.f32.mrf.mxu0  ;;  %v3309_v62 = vadd.f32 %v3192_v8, %v6140_v56 }
 0x1eb   : > { %3920 = vst.msk [vmem:[%s6235_s21 + $0xc] sm:$0xf] %vm3916_vm9, %v4290_v26  ;;  %v3704_v46 = vadd.f32 %v6221_v40, %v3661_v3  ;;  %v3664_v37 = vmul.f32 %v6215_v38, %v3621_v21  ;;  %v3619_v7 = vadd.f32 %v3490_v57, %v3305_v13  ;;  %v4288_v10 = vpack.c.bf16 %v3737_v24, %v3737_v24  ;;  %v4776_v11 = vpop.f32.mrf.mxu1 }
 0x1ec   : > { %v3742_v42 = vmax.f32 %v3706_v2, 0.0  ;;  %v4810_v16 = vpop.f32.mrf.mxu0  ;;  %v3314_v24 = vadd.f32 %v4776_v11, %v6143_v31 }
 0x1ed   : > { %v3740_v41 = vmax.f32 %v3704_v46, 0.0  ;;  %v3707_v25 = vadd.f32 %v6221_v40, %v3664_v37  ;;  %v3662_v23 = vmul.f32 %v6215_v38, %v3619_v7  ;;  %3918 = vst.msk [vmem:[%s6235_s21 + $0x4] sm:$0xf] %vm3916_vm9, %v4288_v10  ;;  %v3624_v6 = vadd.f32 %v4810_v16, %v3310_v48  ;;  %v3205_v19 = vpop.f32.mrf.mxu1 }
 0x1ee   : > { %v4293_v52 = vpack.c.bf16 %v3742_v42, %v3742_v42  ;;  %v3503_v15 = vpop.f32.mrf.mxu0  ;;  %v3312_v8 = vadd.f32 %v3205_v19, %v6146_v58 }
 0x1ef   : > { %v4291_v27 = vpack.c.bf16 %v3740_v41, %v3740_v41  ;;  %v3743_v4 = vmax.f32 %v3707_v25, 0.0  ;;  %v3705_v30 = vadd.f32 %v6221_v40, %v3662_v23  ;;  %v3667_v28 = vmul.f32 %v6215_v38, %v3624_v6  ;;  %v4777_v13 = vpop.f32.mrf.mxu1 }
 0x1f0   : > { %3923 = vst.msk [vmem:[%s6235_s21 + $0x18] sm:$0xf] %vm3916_vm9, %v4293_v52  ;;  %v3622_v5 = vadd.f32 %v3503_v15, %v3308_v20  ;;  %v4811_v32 = vpop.f32.mrf.mxu0  ;;  %v3315_v11 = vadd.f32 %v4777_v13, %v6149_v59 }
 0x1f1   : > { %3921 = vst.msk [vmem:[%s6235_s21 + $0x10] sm:$0xf] %vm3916_vm9, %v4291_v27  ;;  %v4294_v61 = vpack.c.bf16 %v3743_v4, %v3743_v4  ;;  %v3741_v63 = vmax.f32 %v3705_v30, 0.0  ;;  %v3625_v1 = vadd.f32 %v4811_v32, %v3311_v29  ;;  %v3710_v49 = vadd.f32 %v6221_v40, %v3667_v28  ;;  %v3208_v46 = vpop.f32.mrf.mxu1 }
 0x1f2   : > { %v3665_v26 = vmul.f32 %v6215_v38, %v3622_v5  ;;  %v3506_v3 = vpop.f32.mrf.mxu0  ;;  %v3313_v58 = vadd.f32 %v3208_v46, %v6152_v54 }
 0x1f3   : > { %3924 = vst.msk [vmem:[%s6235_s21 + $0x1c] sm:$0xf] %vm3916_vm9, %v4294_v61  ;;  %v4292_v21 = vpack.c.bf16 %v3741_v63, %v3741_v63  ;;  %v3668_v2 = vmul.f32 %v6215_v38, %v3625_v1  ;;  %v3623_v53 = vadd.f32 %v3506_v3, %v3309_v62  ;;  %v3746_v57 = vmax.f32 %v3710_v49, 0.0  ;;  %v4780_v16 = vpop.f32.mrf.mxu1 }
 0x1f4   : > { %v3708_v56 = vadd.f32 %v6221_v40, %v3665_v26  ;;  %v4814_v37 = vpop.f32.mrf.mxu0  ;;  %v3318_v61 = vadd.f32 %v4780_v16, %v6155_v35 }
 0x1f5   : > { %3922 = vst.msk [vmem:[%s6235_s21 + $0x14] sm:$0xf] %vm3916_vm9, %v4292_v21  ;;  %v3711_v7 = vadd.f32 %v6221_v40, %v3668_v2  ;;  %v3666_v10 = vmul.f32 %v6215_v38, %v3623_v53  ;;  %v3628_v48 = vadd.f32 %v4814_v37, %v3314_v24  ;;  %v4297_v42 = vpack.c.bf16 %v3746_v57, %v3746_v57  ;;  %v3221_v6 = vpop.f32.mrf.mxu1 }
 0x1f6   : > { %v3744_v31 = vmax.f32 %v3708_v56, 0.0  ;;  %v3519_v41 = vpop.f32.mrf.mxu0  ;;  %v3316_v3 = vadd.f32 %v3221_v6, %v6158_v33 }
 0x1f7   : > { %v3747_v25 = vmax.f32 %v3711_v7, 0.0  ;;  %v3709_v23 = vadd.f32 %v6221_v40, %v3666_v10  ;;  %v3671_v52 = vmul.f32 %v6215_v38, %v3628_v48  ;;  %3927 = vst.msk [vmem:[%s6235_s21 + $0x28] sm:$0xf] %vm3916_vm9, %v4297_v42  ;;  %v3626_v15 = vadd.f32 %v3519_v41, %v3312_v8  ;;  %v4781_v19 = vpop.f32.mrf.mxu1 }
 0x1f8   : > { %v4295_v20 = vpack.c.bf16 %v3744_v31, %v3744_v31  ;;  %v4815_v27 = vpop.f32.mrf.mxu0  ;;  %v3319_v10 = vadd.f32 %v4781_v19, %v6161_v43 }
 0x1f9   : > { %v4298_v29 = vpack.c.bf16 %v3747_v25, %v3747_v25  ;;  %v3745_v4 = vmax.f32 %v3709_v23, 0.0  ;;  %v3714_v30 = vadd.f32 %v6221_v40, %v3671_v52  ;;  %v3669_v28 = vmul.f32 %v6215_v38, %v3626_v15  ;;  %v3224_v49 = vpop.f32.mrf.mxu1 }
 0x1fa   : > { %3925 = vst.msk [vmem:[%s6235_s21 + $0x20] sm:$0xf] %vm3916_vm9, %v4295_v20  ;;  %v3629_v5 = vadd.f32 %v4815_v27, %v3315_v11  ;;  %v3522_v32 = vpop.f32.mrf.mxu0  ;;  %v3317_v25 = vadd.f32 %v3224_v49, %v6164_v45 }
 0x1fb   : > { %3928 = vst.msk [vmem:[%s6235_s21 + $0x2c] sm:$0xf] %vm3916_vm9, %v4298_v29  ;;  %v4296_v59 = vpack.c.bf16 %v3745_v4, %v3745_v4  ;;  %v3750_v62 = vmax.f32 %v3714_v30, 0.0  ;;  %v3627_v63 = vadd.f32 %v3522_v32, %v3313_v58  ;;  %v3712_v54 = vadd.f32 %v6221_v40, %v3669_v28  ;;  %v4784_v53 = vpop.f32.mrf.mxu1 }
 0x1fc   : > { %v3672_v1 = vmul.f32 %v6215_v38, %v3629_v5  ;;  %v4818_v26 = vpop.f32.mrf.mxu0  ;;  %v3322_v43 = vadd.f32 %v4784_v53, %v6167_v51 }
 0x1fd   : > { %3926 = vst.msk [vmem:[%s6235_s21 + $0x24] sm:$0xf] %vm3916_vm9, %v4296_v59  ;;  %v4301_v13 = vpack.c.bf16 %v3750_v62, %v3750_v62  ;;  %v3670_v21 = vmul.f32 %v6215_v38, %v3627_v63  ;;  %v3632_v24 = vadd.f32 %v4818_v26, %v3318_v61  ;;  %v3748_v2 = vmax.f32 %v3712_v54, 0.0  ;;  %v3237_v48 = vpop.f32.mrf.mxu1 }
 0x1fe   : > { %v3715_v35 = vadd.f32 %v6221_v40, %v3672_v1  ;;  %v3535_v57 = vpop.f32.mrf.mxu0  ;;  %v3320_v30 = vadd.f32 %v3237_v48, %v6170_v18 }
 0x1ff   : > { %3931 = vst.msk [vmem:[%s6235_s21 + $0x38] sm:$0xf] %vm3916_vm9, %v4301_v13  ;;  %v3713_v56 = vadd.f32 %v6221_v40, %v3670_v21  ;;  %v3675_v46 = vmul.f32 %v6215_v38, %v3632_v24  ;;  %v3630_v37 = vadd.f32 %v3535_v57, %v3316_v3  ;;  %v4299_v7 = vpack.c.bf16 %v3748_v2, %v3748_v2  ;;  %v4785_v23 = vpop.f32.mrf.mxu1 }
 0x200   : > { %v3751_v33 = vmax.f32 %v3715_v35, 0.0  ;;  %v4819_v42 = vpop.f32.mrf.mxu0  ;;  %v3323_v62 = vadd.f32 %v4785_v23, %v6173_v55 }
 0x201   : > { %v3749_v8 = vmax.f32 %v3713_v56, 0.0  ;;  %v3718_v31 = vadd.f32 %v6221_v40, %v3675_v46  ;;  %v3673_v16 = vmul.f32 %v6215_v38, %v3630_v37  ;;  %3929 = vst.msk [vmem:[%s6235_s21 + $0x30] sm:$0xf] %vm3916_vm9, %v4299_v7  ;;  %v3633_v52 = vadd.f32 %v4819_v42, %v3319_v10  ;;  %v3240_v29 = vpop.f32.mrf.mxu1 }
 0x202   : > { %v4302_v41 = vpack.c.bf16 %v3751_v33, %v3751_v33  ;;  %v3538_v20 = vpop.f32.mrf.mxu0  ;;  %v3321_v2 = vadd.f32 %v3240_v29, %v6176_v12 }
 0x203   : > { %v4300_v11 = vpack.c.bf16 %v3749_v8, %v3749_v8  ;;  %v3754_v6 = vmax.f32 %v3718_v31, 0.0  ;;  %v3716_v15 = vadd.f32 %v6221_v40, %v3673_v16  ;;  %v3676_v27 = vmul.f32 %v6215_v38, %v3633_v52  ;;  %v4788_v32 = vpop.f32.mrf.mxu1 }
 0x204   : > { %3932 = vst.msk [vmem:[%s6235_s21 + $0x3c] sm:$0xf] %vm3916_vm9, %v4302_v41  ;;  %v3631_v58 = vadd.f32 %v3538_v20, %v3317_v25  ;;  %v4822_v4 = vpop.f32.mrf.mxu0  ;;  %v3326_v7 = vadd.f32 %v4788_v32, %v6179_v22 }
 0x205   : > { %3930 = vst.msk [vmem:[%s6235_s21 + $0x34] sm:$0xf] %vm3916_vm9, %v4300_v11  ;;  %v4305_v45 = vpack.c.bf16 %v3754_v6, %v3754_v6  ;;  %v3752_v28 = vmax.f32 %v3716_v15, 0.0  ;;  %v3636_v19 = vadd.f32 %v4822_v4, %v3322_v43  ;;  %v3719_v51 = vadd.f32 %v6221_v40, %v3676_v27  ;;  %v3253_v49 = vpop.f32.mrf.mxu1 }
 0x206   : > { %v3674_v5 = vmul.f32 %v6215_v38, %v3631_v58  ;;  %v3551_v59 = vpop.f32.mrf.mxu0  ;;  %v3324_v12 = vadd.f32 %v3253_v49, %v6182_v0 }
 0x207   : > { %3935 = vst.msk [vmem:[%s6235_s21 + $0x48] sm:$0xf] %vm3916_vm9, %v4305_v45  ;;  %v4303_v61 = vpack.c.bf16 %v3752_v28, %v3752_v28  ;;  %v3679_v63 = vmul.f32 %v6215_v38, %v3636_v19  ;;  %v3634_v54 = vadd.f32 %v3551_v59, %v3320_v30  ;;  %v3755_v1 = vmax.f32 %v3719_v51, 0.0  ;;  %v4789_v35 = vpop.f32.mrf.mxu1 }
 0x208   : > { %v3717_v18 = vadd.f32 %v6221_v40, %v3674_v5  ;;  %v4823_v26 = vpop.f32.mrf.mxu0  ;;  %v3327_v52 = vadd.f32 %v4789_v35, %v6185_v39 }
 0x209   : > { %3933 = vst.msk [vmem:[%s6235_s21 + $0x40] sm:$0xf] %vm3916_vm9, %v4303_v61  ;;  %v3722_v13 = vadd.f32 %v6221_v40, %v3679_v63  ;;  %v3677_v3 = vmul.f32 %v6215_v38, %v3634_v54  ;;  %v3637_v21 = vadd.f32 %v4823_v26, %v3323_v62  ;;  %v4306_v24 = vpack.c.bf16 %v3755_v1, %v3755_v1  ;;  %v3256_v10 = vpop.f32.mrf.mxu1 }
 0x20a   : > { %v3753_v55 = vmax.f32 %v3717_v18, 0.0  ;;  %v3554_v53 = vpop.f32.mrf.mxu0  ;;  %v3325_v29 = vadd.f32 %v3256_v10, %v6188_v44 }
 0x20b   : > { %v3758_v57 = vmax.f32 %v3722_v13, 0.0  ;;  %v3720_v56 = vadd.f32 %v6221_v40, %v3677_v3  ;;  %v3680_v46 = vmul.f32 %v6215_v38, %v3637_v21  ;;  %3936 = vst.msk [vmem:[%s6235_s21 + $0x4c] sm:$0xf] %vm3916_vm9, %v4306_v24  ;;  %v3635_v33 = vadd.f32 %v3554_v53, %v3321_v2  ;;  %v4792_v41 = vpop.f32.mrf.mxu1 }
 0x20c   : > { %v4304_v37 = vpack.c.bf16 %v3753_v55, %v3753_v55  ;;  %v4826_v48 = vpop.f32.mrf.mxu0  ;;  %v3330_v59 = vadd.f32 %v4792_v41, %v6191_v36 }
 0x20d   : > { %v4309_v42 = vpack.c.bf16 %v3758_v57, %v3758_v57  ;;  %v3756_v8 = vmax.f32 %v3720_v56, 0.0  ;;  %v3723_v31 = vadd.f32 %v6221_v40, %v3680_v46  ;;  %v3678_v16 = vmul.f32 %v6215_v38, %v3635_v33  ;;  %v3269_v6 = vpop.f32.mrf.mxu1 }
 0x20e   : > { %3934 = vst.msk [vmem:[%s6235_s21 + $0x44] sm:$0xf] %vm3916_vm9, %v4304_v37  ;;  %v3640_v25 = vadd.f32 %v4826_v48, %v3326_v7  ;;  %v3567_v23 = vpop.f32.mrf.mxu0  ;;  %v3328_v49 = vadd.f32 %v3269_v6, %v6194_v14 }
 0x20f   : > { %3939 = vst.msk [vmem:[%s6235_s21 + $0x58] sm:$0xf] %vm3916_vm9, %v4309_v42  ;;  %v4307_v22 = vpack.c.bf16 %v3756_v8, %v3756_v8  ;;  %v3759_v20 = vmax.f32 %v3723_v31, 0.0  ;;  %v3638_v11 = vadd.f32 %v3567_v23, %v3324_v12  ;;  %v3721_v0 = vadd.f32 %v6221_v40, %v3678_v16  ;;  %v4793_v30 = vpop.f32.mrf.mxu1 }
 0x210   : > { %v3683_v43 = vmul.f32 %v6215_v38, %v3640_v25  ;;  %v4827_v15 = vpop.f32.mrf.mxu0  ;;  %v3331_v36 = vadd.f32 %v4793_v30, %v6197_v50 }
 0x211   : > { %3937 = vst.msk [vmem:[%s6235_s21 + $0x50] sm:$0xf] %vm3916_vm9, %v4307_v22  ;;  %v4310_v27 = vpack.c.bf16 %v3759_v20, %v3759_v20  ;;  %v3681_v58 = vmul.f32 %v6215_v38, %v3638_v11  ;;  %v3641_v4 = vadd.f32 %v4827_v15, %v3327_v52  ;;  %v3757_v45 = vmax.f32 %v3721_v0, 0.0  ;;  %v3272_v61 = vpop.f32.mrf.mxu1 }
 0x212   : > { %v3726_v39 = vadd.f32 %v6221_v40, %v3683_v43  ;;  %v3570_v28 = vpop.f32.mrf.mxu0  ;;  %v3329_v56 = vadd.f32 %v3272_v61, %v6200_v34 }
 0x213   : > { %3940 = vst.msk [vmem:[%s6235_s21 + $0x5c] sm:$0xf] %vm3916_vm9, %v4310_v27  ;;  %v3724_v19 = vadd.f32 %v6221_v40, %v3681_v58  ;;  %v3684_v51 = vmul.f32 %v6215_v38, %v3641_v4  ;;  %v3639_v5 = vadd.f32 %v3570_v28, %v3325_v29  ;;  %v4308_v32 = vpack.c.bf16 %v3757_v45, %v3757_v45  ;;  %v4796_v26 = vpop.f32.mrf.mxu1 }
 0x214   : > { %v3762_v44 = vmax.f32 %v3726_v39, 0.0  ;;  %v4830_v62 = vpop.f32.mrf.mxu0  ;;  %v3334_v42 = vadd.f32 %v4796_v26, %v6203_v47 }
 0x215   : > { %v3760_v63 = vmax.f32 %v3724_v19, 0.0  ;;  %v3727_v54 = vadd.f32 %v6221_v40, %v3684_v51  ;;  %v3682_v1 = vmul.f32 %v6215_v38, %v3639_v5  ;;  %3938 = vst.msk [vmem:[%s6235_s21 + $0x54] sm:$0xf] %vm3916_vm9, %v4308_v32  ;;  %v3644_v13 = vadd.f32 %v4830_v62, %v3330_v59  ;;  %v3285_v35 = vpop.f32.mrf.mxu1 }
 0x216   : > { %v4313_v18 = vpack.c.bf16 %v3762_v44, %v3762_v44  ;;  %v3583_v3 = vpop.f32.mrf.mxu0  ;;  %v3332_v41 = vadd.f32 %v3285_v35, %v6205_v60 }
 0x217   : > { %v4311_v21 = vpack.c.bf16 %v3760_v63, %v3760_v63  ;;  %v3763_v24 = vmax.f32 %v3727_v54, 0.0  ;;  %v3725_v2 = vadd.f32 %v6221_v40, %v3682_v1  ;;  %v3687_v55 = vmul.f32 %v6215_v38, %v3644_v13  ;;  %v4797_v10 = vpop.f32.mrf.mxu1 }
 0x218   : > { %3943 = vst.msk [vmem:[%s6235_s21 + $0x68] sm:$0xf] %vm3916_vm9, %v4313_v18  ;;  %v3642_v53 = vadd.f32 %v3583_v3, %v3328_v49  ;;  %v4831_v57 = vpop.f32.mrf.mxu0  ;;  %v3335_v27 = vadd.f32 %v4797_v10, %v6207_v9 }
 0x219   : > { %3941 = vst.msk [vmem:[%s6235_s21 + $0x60] sm:$0xf] %vm3916_vm9, %v4311_v21  ;;  %v4314_v14 = vpack.c.bf16 %v3763_v24, %v3763_v24  ;;  %v3761_v46 = vmax.f32 %v3725_v2, 0.0  ;;  %v3645_v37 = vadd.f32 %v4831_v57, %v3331_v36  ;;  %v3730_v50 = vadd.f32 %v6221_v40, %v3687_v55  ;;  %v3288_v23 = vpop.f32.mrf.mxu1 }
 0x21a   : > { %v3685_v7 = vmul.f32 %v6215_v38, %v3642_v53  ;;  %v3586_v33 = vpop.f32.mrf.mxu0  ;;  %v3333_v29 = vadd.f32 %v3288_v23, %v6210_v17 }
 0x21b   : > { %3944 = vst.msk [vmem:[%s6235_s21 + $0x6c] sm:$0xf] %vm3916_vm9, %v4314_v14  ;;  %v4312_v48 = vpack.c.bf16 %v3761_v46, %v3761_v46  ;;  %v3688_v12 = vmul.f32 %v6215_v38, %v3645_v37  ;;  %v3643_v8 = vadd.f32 %v3586_v33, %v3329_v56  ;;  %v3766_v31 = vmax.f32 %v3730_v50, 0.0 }
 0x21c   : > { %v3728_v34 = vadd.f32 %v6221_v40, %v3685_v7  ;;  %v4834_v16 = vpop.f32.mrf.mxu0 }
 0x21d   : > { %3942 = vst.msk [vmem:[%s6235_s21 + $0x64] sm:$0xf] %vm3916_vm9, %v4312_v48  ;;  %v3731_v25 = vadd.f32 %v6221_v40, %v3688_v12  ;;  %v3686_v22 = vmul.f32 %v6215_v38, %v3643_v8  ;;  %v3648_v52 = vadd.f32 %v4834_v16, %v3334_v42  ;;  %v4317_v20 = vpack.c.bf16 %v3766_v31, %v3766_v31 }
 0x21e   : > { %v3764_v47 = vmax.f32 %v3728_v34, 0.0  ;;  %v3599_v11 = vpop.f32.mrf.mxu0 }
 0x21f   : > { %v3767_v0 = vmax.f32 %v3731_v25, 0.0  ;;  %v3729_v43 = vadd.f32 %v6221_v40, %v3686_v22  ;;  %v3691_v6 = vmul.f32 %v6215_v38, %v3648_v52  ;;  %v3646_v15 = vadd.f32 %v3599_v11, %v3332_v41  ;;  %3947 = vst.msk [vmem:[%s6235_s21 + $0x78] sm:$0xf] %vm3916_vm9, %v4317_v20 }
 0x220   : > { %v4315_v60 = vpack.c.bf16 %v3764_v47, %v3764_v47  ;;  %v4835_v58 = vpop.f32.mrf.mxu0 }
 0x221   : > { %v4318_v4 = vpack.c.bf16 %v3767_v0, %v3767_v0  ;;  %v3765_v45 = vmax.f32 %v3729_v43, 0.0  ;;  %v3734_v39 = vadd.f32 %v6221_v40, %v3691_v6  ;;  %v3689_v30 = vmul.f32 %v6215_v38, %v3646_v15 }
 0x222   : > { %3945 = vst.msk [vmem:[%s6235_s21 + $0x70] sm:$0xf] %vm3916_vm9, %v4315_v60  ;;  %v3649_v28 = vadd.f32 %v4835_v58, %v3335_v27  ;;  %v3602_v19 = vpop.f32.mrf.mxu0 }
 0x223   : > { %3948 = vst.msk [vmem:[%s6235_s21 + $0x7c] sm:$0xf] %vm3916_vm9, %v4318_v4  ;;  %v4316_v51 = vpack.c.bf16 %v3765_v45, %v3765_v45  ;;  %v3770_v9 = vmax.f32 %v3734_v39, 0.0  ;;  %v3732_v5 = vadd.f32 %v6221_v40, %v3689_v30  ;;  %v3647_v17 = vadd.f32 %v3602_v19, %v3333_v29 }
 0x224   : > { %v3692_v32 = vmul.f32 %v6215_v38, %v3649_v28 }
 0x225   : > { %3946 = vst.msk [vmem:[%s6235_s21 + $0x74] sm:$0xf] %vm3916_vm9, %v4316_v51  ;;  %v4321_v59 = vpack.c.bf16 %v3770_v9, %v3770_v9  ;;  %v3768_v44 = vmax.f32 %v3732_v5, 0.0  ;;  %v3690_v61 = vmul.f32 %v6215_v38, %v3647_v17 }
 0x226   : > { %v3735_v62 = vadd.f32 %v6221_v40, %v3692_v32 }
 0x227   : > { %3951 = vst.msk [vmem:[%s6235_s21 + $0x88] sm:$0xf] %vm3916_vm9, %v4321_v59  ;;  %v4319_v63 = vpack.c.bf16 %v3768_v44, %v3768_v44  ;;  %v3733_v54 = vadd.f32 %v6221_v40, %v3690_v61 }
 0x228   : > { %v3771_v1 = vmax.f32 %v3735_v62, 0.0 }
 0x229   : > { %3949 = vst.msk [vmem:[%s6235_s21 + $0x80] sm:$0xf] %vm3916_vm9, %v4319_v63  ;;  %v3769_v18 = vmax.f32 %v3733_v54, 0.0 }
 0x22a   : > { %v4322_v49 = vpack.c.bf16 %v3771_v1, %v3771_v1 }
 0x22b   : > { %v4320_v26 = vpack.c.bf16 %v3769_v18, %v3769_v18 }
 0x22c   : > { %3952 = vst.msk [vmem:[%s6235_s21 + $0x8c] sm:$0xf] %vm3916_vm9, %v4322_v49 }
 0x22d   : > { %3950 = vst.msk [vmem:[%s6235_s21 + $0x84] sm:$0xf] %vm3916_vm9, %v4320_v26 }
 0x22e PF: > { %s14_s15 = sadd.s32 1, %s4917_s15  }
 0x22f   : > { %p11_p4 = scmp.ge.s32.totalorder %s14_s15, 4  }
 0x231   :  { %13 = sbr.rel (!%p11_p4) target bundleno = 1 (0x1), region = 74 }

// kernel: cross_relation_net.17
= control target key start
LH: loop header
LB: loop body
LE: loop exit
PB: predicated region body
PF: predicated region fallthrough
CT: control target
= control target key end

     0   :  { %s473_s9 = smov 0   ;;  %s475_s10 = smov 0   ;;  %s522_s0 = inlined_call_operand.vmem [shape: bf16[2,16,64], index: 0, kind: input, shape index: {}]   ;;  %s523_s1 = inlined_call_operand.vmem [shape: bf16[32,64], index: 1, kind: input, shape index: {}]   ;;  %s524_s2 = inlined_call_operand.vmem [shape: f32[2,1,32], index: 2, kind: output, shape index: {}]  }
   0x1   :  { %s477_s11 = smov 0  }
   0x2 LB: > { %s24_s12 = sadd.s32 1, %s450_s10  ;;  %p382_p0 = scmp.ge.s32.totalorder %s454_s11, 1  ;;  %s454_s11 = sphi %s477_s11, %s12_s11   ;;  %s450_s10 = sphi %s475_s10, %s526_s10   ;;  %s446_s9 = sphi %s473_s9, %s525_s9  }
   0x3   : > { %p26_p1 = scmp.ge.s32.totalorder %s24_s12, 2  ;;  %p137_p2 = scmp.lt.s32.totalorder %s454_s11, 3 }
   0x5   : > { %s528_s12 = smov (%p26_p1, %s24_s12), 0  ;;  %p138_p3 = pnand %p382_p0, %p137_p2 }
   0x6   : > { %p165_p4 = scmp.lt.s32.totalorder (!%p138_p3), %s446_s9, 1 }
   0x7   : > { %141 = sbr.rel (%p138_p3) target bundleno = 278 (0x116), region = 28 }
   0xc   : > { %v429_v0 = vld [vmem:[%s523_s1 + $0x8] sm:$0xff]   ;;  %v456_v1 = vmov 0.0   ;;  %vm204_vm0 = vcmask 523264   ;;  %vm457_vm1 = vmmov 0   ;;  %v430_v3 = vld [vmem:[%s523_s1] sm:$0xff]   ;;  %s530_s9 = smov (!%p165_p4, %s446_s9), 1 }
   0xd   : > { %395 = vmatprep.subr.bf16.mxu0 %v456_v1  ;;  %v212_v2 = vsel %vm204_vm0, %v429_v0, 0  ;;  %399 = vmatprep.mubr.msk.bf16.mxu0 %vm457_vm1, %v456_v1  ;;  %s391_s17 = sshll.u32 %s530_s9, 3  ;;  %v209_v4 = vsel %vm204_vm0, %v430_v3, 0  ;;  %vm255_vm2 = vcmask 261120   ;;  %s181_s23 = scalar_lea.vmem %s524_s2, %s530_s9  ;;  %vm294_vm7 = vcmask 253952  }
   0xe   : > { %396 = vmatpush3.bf16.xpose.msra.mxu0 %v212_v2  ;;  %s169_s20 = scalar_lea.vmem %s522_s0, %s391_s17 }
   0xf   : > { %397 = vmatprep.subr.bf16.mxu0 %v456_v1  ;;  %v431_v5 = vld [vmem:[%s169_s20] sm:$0xff]  }
  0x16   : > { %398 = vmatpush3.bf16.xpose.msra.mxu0 %v209_v4 }
  0x1d   : > { %400 = vmatmul.mubr.msk.bf16.vlgmr.msra.gmra.mxu0 %vm204_vm0, %v431_v5 }
  0xdd   : > { %v248_v6 = vpop.f32.mrf.mxu0 }
  0xde   : > { %v256_v9 = vsel %vm255_vm2, %v248_v6, -inf }
  0xdf   : > { %v401_v7 = vpop.f32.mrf.mxu0 }
  0xe1   : > { %v251_v8 = vpop.f32.mrf.mxu0 }
  0xe2   : > { %v257_v10 = vsel %vm255_vm2, %v251_v8, -inf }
  0xe3   : > { %v258_v11 = vmax.f32 %v256_v9, %v257_v10  ;;  %v402_v12 = vpop.f32.mrf.mxu0 }
  0xe5   : > { %v259_v13 = vrot.slane %v258_v11, 4 }
  0xe7   : > { %v260_v14 = vmax.f32 %v258_v11, %v259_v13 }
  0xe9   : > { %v261_v15 = vrot.slane %v260_v14, 2 }
  0xeb   : > { %v262_v16 = vmax.f32 %v260_v14, %v261_v15 }
  0xed   : > { %v263_v17 = vrot.slane %v262_v16, 1 }
  0xef   : > { %v264_v18 = vmax.f32 %v262_v16, %v263_v17 }
  0xf1   : > { %vm266_vm3 = vcmp.ge.f32.partialorder %v248_v6, %v264_v18  ;;  %vm267_vm4 = vcmp.ge.f32.partialorder %v251_v8, %v264_v18 }
  0xf2   : > { %v268_v19 = vsel %vm266_vm3, -inf, %v248_v6  ;;  %v269_v20 = vsel %vm267_vm4, -inf, %v251_v8 }
  0xf3   : > { %v270_v21 = vsel %vm255_vm2, %v268_v19, -inf  ;;  %v271_v22 = vsel %vm255_vm2, %v269_v20, -inf }
  0xf4   : > { %v272_v23 = vmax.f32 %v270_v21, %v271_v22 }
  0xf6   : > { %v273_v24 = vrot.slane %v272_v23, 4 }
  0xf8   : > { %v274_v25 = vmax.f32 %v272_v23, %v273_v24 }
  0xfa   : > { %v275_v26 = vrot.slane %v274_v25, 2 }
  0xfc   : > { %v276_v27 = vmax.f32 %v274_v25, %v275_v26 }
  0xfe   : > { %v277_v28 = vrot.slane %v276_v27, 1 }
 0x100   : > { %v278_v29 = vmax.f32 %v276_v27, %v277_v28 }
 0x102   : > { %vm280_vm5 = vcmp.ge.f32.partialorder %v268_v19, %v278_v29  ;;  %vm281_vm6 = vcmp.ge.f32.partialorder %v269_v20, %v278_v29  ;;  %v279_v40 = vadd.f32 %v278_v29, %v264_v18 }
 0x103   : > { %v282_v30 = vsel %vm280_vm5, -inf, %v268_v19  ;;  %v283_v31 = vsel %vm281_vm6, -inf, %v269_v20 }
 0x104   : > { %v284_v32 = vsel %vm255_vm2, %v282_v30, -inf  ;;  %v285_v33 = vsel %vm255_vm2, %v283_v31, -inf }
 0x105   : > { %v286_v34 = vmax.f32 %v284_v32, %v285_v33 }
 0x107   : > { %v287_v35 = vrot.slane %v286_v34, 4 }
 0x109   : > { %v288_v36 = vmax.f32 %v286_v34, %v287_v35 }
 0x10b   : > { %v289_v37 = vrot.slane %v288_v36, 2 }
 0x10d   : > { %v290_v38 = vmax.f32 %v288_v36, %v289_v37 }
 0x10f   : > { %v291_v39 = vrot.slane %v290_v38, 1 }
 0x111   : > { %v292_v41 = vmax.f32 %v290_v38, %v291_v39 }
 0x113   : > { %v293_v42 = vadd.f32 %v292_v41, %v279_v40 }
 0x115   : > { %295 = vst.msk [vmem:[%s181_s23] sm:$0x1] %vm294_vm7, %v293_v42 }
 0x116 PF: > { %s12_s11 = sadd.s32 1, %s454_s11   ;;  %s525_s9 = smov %s450_s10 }
 0x117   : > { %p9_p5 = scmp.ge.s32.totalorder %s12_s11, 4   ;;  %s526_s10 = smov %s528_s12 }
 0x119   :  { %11 = sbr.rel (!%p9_p5) target bundleno = 2 (0x2), region = 61 }

</bundles_post_ra>
